<compile_context>
chip_gen: v7x
topology: tpu7x:2x2x1
jax: 0.10.0
libtpu: 0.0.40
codegen_flags: <defaults>
</compile_context>

<pallas_src>
import functools
import math

import jax
import jax.numpy as jnp
import numpy as np
from jax.experimental import pallas as pl
from jax.experimental.pallas import tpu as pltpu


# ----------------------------------------------------------------------------
# Generation-aware knobs
# ----------------------------------------------------------------------------
def _vmem_limit_bytes():
    cap = None
    try:
        info = pltpu.get_tpu_info()
        for attr in ("vmem_capacity_bytes", "vmem_size_bytes", "vmem_bytes"):
            v = getattr(info, attr, None)
            if v:
                cap = int(v)
                break
    except Exception:
        cap = None
    if cap is None:
        try:
            kind = jax.devices()[0].device_kind.lower()
        except Exception:
            kind = ""
        cap = 64 * 1024 * 1024 if "v7" in kind else 128 * 1024 * 1024
    # ~40 MiB on v7x (64 MiB physical, leave compiler scratch headroom),
    # ~80 MiB on the 128 MiB v5e/v6e parts.
    return min(int(cap * 5 // 8), 100 * 1024 * 1024)


def _default_tq(T):
    try:
        kind = jax.devices()[0].device_kind.lower()
    except Exception:
        kind = ""
    pref = 128 if "v5" in kind else 256     # 4x128 MXU on v5e, 2x256 on v6e/v7x
    if T <= pref:
        return T
    for cand in range(pref, 15, -16):       # keep tq a multiple of 16 (bf16 packing)
        if T % cand == 0:
            return cand
    return T


# ----------------------------------------------------------------------------
# Fused multi-head attention Pallas kernel
# ----------------------------------------------------------------------------
def _mha_kernel(*refs, num_heads, window, shared_kv):
    if shared_kv:
        (q_ref, kv_ref,
         wq_ref, bq_ref, wk_ref, bk_ref, wv_ref, bv_ref, wo_ref, bo_ref,
         o_ref, kh_sc, vh_sc) = refs
        k_ref = v_ref = kv_ref
    else:
        (q_ref, k_ref, v_ref,
         wq_ref, bq_ref, wk_ref, bk_ref, wv_ref, bv_ref, wo_ref, bo_ref,
         o_ref, kh_sc, vh_sc) = refs

    tq = q_ref.shape[1]
    n_kv = k_ref.shape[1]
    D = wq_ref.shape[1]
    H = num_heads
    hd = D // H
    scale = 1.0 / math.sqrt(hd)
    bf16, f32 = jnp.bfloat16, jnp.float32
    t = pl.program_id(1)

    # ---- K/V projections + head-major relayout: ONCE per batch (t == 0) -------
    # Cached in VMEM scratch and reused by every remaining q tile of this batch.
    @pl.when(t == 0)
    def _():
        kp = jnp.dot(k_ref[0], wk_ref[...], preferred_element_type=f32) + bk_ref[...]
        vp = jnp.dot(v_ref[0], wv_ref[...], preferred_element_type=f32) + bv_ref[...]
        kh_sc[...] = pltpu.einshape("nhd->hnd", kp.reshape(n_kv, H, hd)).astype(bf16)
        vh_sc[...] = pltpu.einshape("nhd->hnd", vp.reshape(n_kv, H, hd)).astype(bf16)

    # ---- q projection for this tile (1/sqrt(hd) folded into the small slab) ----
    qp = jnp.dot(q_ref[0], wq_ref[...], preferred_element_type=f32) + bq_ref[...]
    qp = qp * scale
    qh = pltpu.einshape("thd->htd", qp.reshape(tq, H, hd)).astype(bf16)   # (H, tq, hd)

    kh = kh_sc[...]                                                       # (H, n_kv, hd)
    vh = vh_sc[...]

    # ---- batched (all heads) scores: contraction on the minor dim, no K^T ------
    s = jnp.einsum("htd,hnd->htn", qh, kh,
                   preferred_element_type=f32)                            # (H, tq, n_kv)

    if window is not None:
        # Banded restricted-attention mask generated in-kernel (no HBM mask DMA).
        row = jax.lax.broadcasted_iota(jnp.int32, (tq, n_kv), 0) + t * tq
        col = jax.lax.broadcasted_iota(jnp.int32, (tq, n_kv), 1)
        rel = col - row
        allowed = (rel >= -window) & (rel <= window)     # diagonal always allowed
        s = jnp.where(allowed[None, :, :], s, -jnp.inf)

    # f32 softmax; normalization through the EUP reciprocal (off the VALU)
    row_max = jnp.max(s, axis=-1, keepdims=True)
    e = jnp.exp(s - row_max)
    denom = jnp.sum(e, axis=-1, keepdims=True)
    prob = e * pl.reciprocal(denom, approx=True)

    att = jnp.einsum("htn,hnd->htd", prob.astype(bf16), vh,
                     preferred_element_type=f32)                          # (H, tq, hd)
    att = pltpu.einshape("htd->thd", att).reshape(tq, D)                  # (tq, D)

    out = jnp.dot(att.astype(bf16), wo_ref[...],
                  preferred_element_type=f32) + bo_ref[...]
    o_ref[0] = out.astype(o_ref.dtype)
    # TODO(synk): for production T (~2048) add an n_kv grid axis with online-softmax
    # (flash) f32 accumulators and restrict K/V per q tile to the window band
    # [t*tq - W, t*tq + tq + W] so the live score tile is O(tq + 2W), not O(N).


def mha_pallas(q, k, v, p, *, num_heads, window=None, tq=None):
    """Fused MHA: q/k/v projections + all-heads SDPA (+optional banded mask) + out proj."""
    B, T, d_q = q.shape
    _, N, d_kv = k.shape
    D = p["wq"].shape[1]
    assert D % num_heads == 0
    hd = D // num_heads

    shared_kv = k is v              # both attention sites in MAGNET pass k is v
    out_dtype = q.dtype             # keep the residual stream in the caller's dtype

    bf16 = jnp.bfloat16
    # bf16 activations at the pallas_call boundary: halves q/k/v HBM->VMEM DMA bytes
    # (the MXU consumes bf16 anyway; accumulation stays f32 inside the kernel).
    q = q.astype(bf16)
    k = k.astype(bf16)
    v = k if shared_kv else v.astype(bf16)

    if tq is None:
        tq = _default_tq(T)
    assert T % tq == 0 and (tq % 8 == 0 or tq == T), (T, tq)
    nt = T // tq

    # Weights are stored bf16 at init time (no per-call convert); biases stay f32.
    wq, wk, wv, wo = (p["wq"].astype(bf16), p["wk"].astype(bf16),
                      p["wv"].astype(bf16), p["wo"].astype(bf16))  # no-ops if already bf16
    bq, bk, bv, bo = p["bq"], p["bk"], p["bv"], p["bo"]

    q_spec = pl.BlockSpec((1, tq, d_q), lambda b, t: (b, t, 0))
    kv_spec = pl.BlockSpec((1, N, d_kv), lambda b, t: (b, 0, 0))
    o_spec = pl.BlockSpec((1, tq, D), lambda b, t: (b, t, 0))
    # Weights / biases / K/V are VMEM-resident across the t axis (constant index_map).
    # TODO(synk): on v7x single-buffer these (pipeline_mode=pl.Buffered(1)) to halve
    # their VMEM reservation once buffer_count=1 is supported by the deployed jax.
    w_spec = lambda r, c: pl.BlockSpec((r, c), lambda b, t: (0, 0))

    in_specs = [q_spec, kv_spec]
    args = [q, k]
    if not shared_kv:
        in_specs.append(kv_spec)
        args.append(v)
    in_specs += [w_spec(d_q, D), w_spec(1, D), w_spec(d_kv, D), w_spec(1, D),
                 w_spec(d_kv, D), w_spec(1, D), w_spec(D, D), w_spec(1, D)]
    args += [wq, bq, wk, bk, wv, bv, wo, bo]

    # K/V projection now really is computed once per batch (cached in scratch).
    flops = 2 * B * (T * d_q * D + 2 * N * d_kv * D
                     + 2 * num_heads * T * N * hd + T * D * D)
    bytes_accessed = (2 * (q.size + k.size + (0 if shared_kv else v.size))
                      + 4 * B * T * D
                      + 2 * (wq.size + wk.size + wv.size + wo.size)
                      + 4 * (bq.size + bk.size + bv.size + bo.size))
    cost = pl.CostEstimate(flops=int(flops),
                           transcendentals=int(B * num_heads * T * N),
                           bytes_accessed=int(bytes_accessed))

    kernel = functools.partial(_mha_kernel, num_heads=num_heads, window=window,
                               shared_kv=shared_kv)

    return pl.pallas_call(
        kernel,
        out_shape=jax.ShapeDtypeStruct((B, T, D), out_dtype),
        grid_spec=pltpu.PrefetchScalarGridSpec(
            num_scalar_prefetch=0,
            grid=(B, nt),
            in_specs=in_specs,
            out_specs=o_spec,
            scratch_shapes=[pltpu.VMEM((num_heads, N, hd), jnp.bfloat16),
                            pltpu.VMEM((num_heads, N, hd), jnp.bfloat16)],
        ),
        compiler_params=pltpu.CompilerParams(
            # batch stays the leading "parallel" axis (megacore sharding on v7x);
            # the q-tile axis is "arbitrary" so the cached K/V scratch is reused.
            dimension_semantics=("parallel", "arbitrary"),
            vmem_limit_bytes=_vmem_limit_bytes(),
        ),
        cost_estimate=cost,
    )(*args)


# ----------------------------------------------------------------------------
# Pure-JAX reference attention (mirrors the PyTorch Attention.forward exactly)
# ----------------------------------------------------------------------------
def restricted_att_mask(maxlen, window):
    idx = jnp.arange(maxlen)
    rel = idx[None, :] - idx[:, None]                     # key - query (shift = 0)
    allowed = (rel >= -window) & (rel <= window)
    return jnp.where(allowed, 0.0, -jnp.inf).astype(jnp.float32)


def mha_reference(q, k, v, p, *, num_heads, window=None, tq=None):
    del tq
    B, T, _ = q.shape
    N = k.shape[1]
    D = p["wq"].shape[1]
    hd = D // num_heads
    qp = q @ p["wq"] + p["bq"]
    kp = k @ p["wk"] + p["bk"]
    vp = v @ p["wv"] + p["bv"]
    qh = qp.reshape(B, T, num_heads, hd).transpose(0, 2, 1, 3)
    kh = kp.reshape(B, N, num_heads, hd).transpose(0, 2, 1, 3)
    vh = vp.reshape(B, N, num_heads, hd).transpose(0, 2, 1, 3)
    s = jnp.einsum("bhtd,bhnd->bhtn", qh, kh) / math.sqrt(hd)
    if window is not None:
        s = s + restricted_att_mask(T, window)
    prob = jax.nn.softmax(s, axis=-1)
    att = jnp.einsum("bhtn,bhnd->bhtd", prob, vh)
    att = att.transpose(0, 2, 1, 3).reshape(B, T, D)
    return att @ p["wo"] + p["bo"]


# ----------------------------------------------------------------------------
# MAGNET forward: JAX glue around the fused attention kernel
# TODO(synk): embedding gathers, LayerNorms, GELU FFN and the per-codebook heads
# are left to XLA (simple bandwidth-bound ops); only attention is a Pallas kernel.
# ----------------------------------------------------------------------------
def layer_norm(x, g, b, eps=1e-5):
    m = jnp.mean(x, axis=-1, keepdims=True)
    v = jnp.mean((x - m) ** 2, axis=-1, keepdims=True)
    return (x - m) * jax.lax.rsqrt(v + eps) * g + b


def sinusoidal_pos_emb(maxlen, dim):
    p, i = np.meshgrid(np.arange(float(maxlen)), np.arange(dim / 2.0) * 2)
    theta = (p / 10000.0 ** (i / dim)).T
    pos = np.stack([np.sin(theta), np.cos(theta)], axis=-1).reshape(maxlen, dim)[None]
    return jnp.asarray(pos, dtype=jnp.float32)


def transformer_layer(x, cond, window, lp, num_heads, attn_fn):
    h = layer_norm(x, lp["ln1_g"], lp["ln1_b"])
    x = x + attn_fn(h, h, h, lp["satt"], num_heads=num_heads, window=window)
    if cond is not None:
        h = layer_norm(x, lp["ln2_g"], lp["ln2_b"])
        x = x + attn_fn(h, cond, cond, lp["catt"], num_heads=num_heads, window=None)
    h = layer_norm(x, lp["ln3_g"], lp["ln3_b"])
    h = jax.nn.gelu(h @ lp["ffn_w1"] + lp["ffn_b1"], approximate=True)
    h = h @ lp["ffn_w2"] + lp["ffn_b2"]
    return x + h


def magnet_forward(tokens, cond, params, *, num_heads, attn_window, attn_fn):
    B, nq, T = tokens.shape
    x = params["emb"][0][tokens[:, 0]]
    for cb in range(1, nq):
        x = x + params["emb"][cb][tokens[:, cb]]
    x = x + params["pos_emb"][:, :T]              # MAGNET requires T == max_seq_len
    for lp in params["layers"]:
        x = transformer_layer(x, cond, attn_window, lp, num_heads, attn_fn)
    x = layer_norm(x, params["out_g"], params["out_b"])
    logits = jnp.stack(
        [x @ params["head_w"][cb] + params["head_b"][cb] for cb in range(nq)], axis=1)
    return logits


# ----------------------------------------------------------------------------
# Deterministic parameter init (torch.nn.Linear-like scales; weights stored
# transposed so x @ W matches PyTorch's x @ W.T)
# ----------------------------------------------------------------------------
def _uniform_linear(key, d_in, d_out, bias_shape=None):
    kw, kb = jax.random.split(key)
    bound = 1.0 / math.sqrt(d_in)
    w = jax.random.uniform(kw, (d_in, d_out), jnp.float32, -bound, bound)
    b = jax.random.uniform(kb, bias_shape or (d_out,), jnp.float32, -bound, bound)
    return w, b


def init_attention(key, d_q, d_kv, d_model):
    ks = jax.random.split(key, 4)
    wq, bq = _uniform_linear(ks[0], d_q, d_model, (1, d_model))
    wk, bk = _uniform_linear(ks[1], d_kv, d_model, (1, d_model))
    wv, bv = _uniform_linear(ks[2], d_kv, d_model, (1, d_model))
    wo, bo = _uniform_linear(ks[3], d_model, d_model, (1, d_model))
    bf16 = jnp.bfloat16
    # Weights converted to bf16 ONCE here (native MXU dtype, half the HBM weight
    # footprint, no per-layer per-call convert); biases stay f32.
    return dict(wq=wq.astype(bf16), bq=bq, wk=wk.astype(bf16), bk=bk,
                wv=wv.astype(bf16), bv=bv, wo=wo.astype(bf16), bo=bo)


def init_layer(key, d_model, cond_dim):
    ks = jax.random.split(key, 4)
    ffn_w1, ffn_b1 = _uniform_linear(ks[2], d_model, 4 * d_model)
    ffn_w2, ffn_b2 = _uniform_linear(ks[3], 4 * d_model, d_model)
    ones, zeros = jnp.ones((d_model,), jnp.float32), jnp.zeros((d_model,), jnp.float32)
    return dict(
        ln1_g=ones, ln1_b=zeros, ln2_g=ones, ln2_b=zeros, ln3_g=ones, ln3_b=zeros,
        satt=init_attention(ks[0], d_model, d_model, d_model),
        catt=init_attention(ks[1], d_model, cond_dim, d_model),
        ffn_w1=ffn_w1, ffn_b1=ffn_b1, ffn_w2=ffn_w2, ffn_b2=ffn_b2,
    )


def init_params(key, *, d_model, num_layers, nq, cardinality, cond_dim, maxlen):
    keys = jax.random.split(key, num_layers + 2 * nq)
    layers = [init_layer(keys[i], d_model, cond_dim) for i in range(num_layers)]
    emb = [0.02 * jax.random.normal(keys[num_layers + c], (cardinality + 1, d_model),
                                    jnp.float32) for c in range(nq)]
    heads = [_uniform_linear(keys[num_layers + nq + c], d_model, cardinality)
             for c in range(nq)]
    return dict(
        layers=layers, emb=emb,
        head_w=[w for w, _ in heads], head_b=[b for _, b in heads],
        out_g=jnp.ones((d_model,), jnp.float32),
        out_b=jnp.zeros((d_model,), jnp.float32),
        pos_emb=sinusoidal_pos_emb(maxlen, d_model),
    )


if __name__ == "__main__":
    # Small config consistent with the module (d_model a multiple of 128 for
    # lane-dense stores; tq a multiple of 16 for bf16 sublane packing).
    B, NQ, T = 2, 4, 32
    D_MODEL, NUM_HEADS, NUM_LAYERS = 128, 4, 2
    CARDINALITY = 32
    COND_N, COND_DIM = 8, 64
    ATTN_WINDOW = 5
    MAXLEN = T            # MAGNET adds the full (1, maxlen, D) pos-emb, so T == maxlen
    TQ = 16               # 2 q tiles -> exercises the cached-K/V (t > 0) path;
                          # real runs use the generation-aware default (128 / 256).

    key = jax.random.PRNGKey(0)
    k_tok, k_cond, k_par = jax.random.split(key, 3)
    tokens = jax.random.randint(k_tok, (B, NQ, T), 0, CARDINALITY + 1, dtype=jnp.int32)
    cond = jax.random.normal(k_cond, (B, COND_N, COND_DIM), jnp.float32)
    params = init_params(k_par, d_model=D_MODEL, num_layers=NUM_LAYERS, nq=NQ,
                         cardinality=CARDINALITY, cond_dim=COND_DIM, maxlen=MAXLEN)

    attn_pallas = functools.partial(mha_pallas, tq=TQ)
    fwd_pallas = jax.jit(functools.partial(magnet_forward, num_heads=NUM_HEADS,
                                           attn_window=ATTN_WINDOW,
                                           attn_fn=attn_pallas))
    fwd_ref = jax.jit(functools.partial(magnet_forward, num_heads=NUM_HEADS,
                                        attn_window=ATTN_WINDOW,
                                        attn_fn=mha_reference))

    out = jax.block_until_ready(fwd_pallas(tokens, cond, params))
    ref = jax.block_until_ready(fwd_ref(tokens, cond, params))

    assert out.shape == (B, NQ, T, CARDINALITY), out.shape
    # Tolerances account for bf16 MXU operands/activations + approximate-reciprocal
    # softmax (f32 reference); genuine bugs (mask / head mapping / K-V cache reuse)
    # blow far past them.
    max_abs = float(jnp.max(jnp.abs(out - ref)))
    rel_rms = float(jnp.sqrt(jnp.mean((out - ref) ** 2) /
                             (jnp.mean(ref ** 2) + 1e-12)))
    assert max_abs < 2e-1 and rel_rms < 5e-2, (max_abs, rel_rms)

    print("KERNEL_OK")
</pallas_src>

<mosaic_0001>
module attributes {stable_mosaic.version = 11 : i64} {
  func.func @_mha_kernel(%arg0: i32, %arg1: i32, %arg2: memref<1x16x128xbf16, #tpu.memory_space<vmem>>, %arg3: memref<1x32x128xbf16, #tpu.memory_space<vmem>>, %arg4: memref<128x128xbf16, #tpu.memory_space<vmem>>, %arg5: memref<1x128xf32, #tpu.memory_space<vmem>>, %arg6: memref<128x128xbf16, #tpu.memory_space<vmem>>, %arg7: memref<1x128xf32, #tpu.memory_space<vmem>>, %arg8: memref<128x128xbf16, #tpu.memory_space<vmem>>, %arg9: memref<1x128xf32, #tpu.memory_space<vmem>>, %arg10: memref<128x128xbf16, #tpu.memory_space<vmem>>, %arg11: memref<1x128xf32, #tpu.memory_space<vmem>>, %arg12: memref<1x16x128xf32, #tpu.memory_space<vmem>>, %arg13: memref<4x32x32xbf16, #tpu.memory_space<vmem>>, %arg14: memref<4x32x32xbf16, #tpu.memory_space<vmem>>) attributes {dimension_semantics = [#tpu.dimension_semantics<parallel>, #tpu.dimension_semantics<arbitrary>], iteration_bounds = array<i64: 2, 2>, scalar_prefetch = 0 : i64, scratch_operands = 2 : i64, tpu.core_type = #tpu.core_type<tc>, window_params = [{transform_indices = @transform_0, window_bounds = array<i64: 1, 16, 128>}, {transform_indices = @transform_1, window_bounds = array<i64: 1, 32, 128>}, {pipeline_mode = #tpu.pipeline_mode<synchronous>, transform_indices = @transform_2, window_bounds = array<i64: 128, 128>}, {pipeline_mode = #tpu.pipeline_mode<synchronous>, transform_indices = @transform_3, window_bounds = array<i64: 1, 128>}, {pipeline_mode = #tpu.pipeline_mode<synchronous>, transform_indices = @transform_4, window_bounds = array<i64: 128, 128>}, {pipeline_mode = #tpu.pipeline_mode<synchronous>, transform_indices = @transform_5, window_bounds = array<i64: 1, 128>}, {pipeline_mode = #tpu.pipeline_mode<synchronous>, transform_indices = @transform_6, window_bounds = array<i64: 128, 128>}, {pipeline_mode = #tpu.pipeline_mode<synchronous>, transform_indices = @transform_7, window_bounds = array<i64: 1, 128>}, {pipeline_mode = #tpu.pipeline_mode<synchronous>, transform_indices = @transform_8, window_bounds = array<i64: 128, 128>}, {pipeline_mode = #tpu.pipeline_mode<synchronous>, transform_indices = @transform_9, window_bounds = array<i64: 1, 128>}, {transform_indices = @transform_10, window_bounds = array<i64: 1, 16, 128>}]} {
    %c0_i32 = arith.constant 0 : i32
    %0 = arith.cmpi eq, %arg1, %c0_i32 : i32
    %1 = arith.extui %0 : i1 to i32
    %c0_i32_0 = arith.constant 0 : i32
    %2 = arith.cmpi ne, %1, %c0_i32_0 : i32
    scf.if %2 {
      %c0_27 = arith.constant 0 : index
      %c0_28 = arith.constant 0 : index
      %c0_29 = arith.constant 0 : index
      %57 = vector.load %arg3[%c0_27, %c0_28, %c0_29] : memref<1x32x128xbf16, #tpu.memory_space<vmem>>, vector<1x32x128xbf16>
      %58 = vector.shape_cast %57 : vector<1x32x128xbf16> to vector<32x128xbf16>
      %c0_30 = arith.constant 0 : index
      %c0_31 = arith.constant 0 : index
      %59 = vector.load %arg6[%c0_30, %c0_31] : memref<128x128xbf16, #tpu.memory_space<vmem>>, vector<128x128xbf16>
      %cst_32 = arith.constant dense<0.000000e+00> : vector<32x128xf32>
      %60 = tpu.matmul %58, %59, %cst_32 {dimension_numbers = #tpu.dot_dimension_numbers<[1], [0], [0], [1], [0, 0, 1, 1], [], []>} : vector<32x128xbf16>, vector<128x128xbf16>, vector<32x128xf32> -> vector<32x128xf32>
      %c0_33 = arith.constant 0 : index
      %c0_34 = arith.constant 0 : index
      %61 = vector.load %arg7[%c0_33, %c0_34] : memref<1x128xf32, #tpu.memory_space<vmem>>, vector<1x128xf32>
      %62 = vector.broadcast %61 : vector<1x128xf32> to vector<32x128xf32>
      %63 = arith.addf %60, %62 : vector<32x128xf32>
      %c0_35 = arith.constant 0 : index
      %c0_36 = arith.constant 0 : index
      %c0_37 = arith.constant 0 : index
      %64 = vector.load %arg3[%c0_35, %c0_36, %c0_37] : memref<1x32x128xbf16, #tpu.memory_space<vmem>>, vector<1x32x128xbf16>
      %65 = vector.shape_cast %64 : vector<1x32x128xbf16> to vector<32x128xbf16>
      %c0_38 = arith.constant 0 : index
      %c0_39 = arith.constant 0 : index
      %66 = vector.load %arg8[%c0_38, %c0_39] : memref<128x128xbf16, #tpu.memory_space<vmem>>, vector<128x128xbf16>
      %cst_40 = arith.constant dense<0.000000e+00> : vector<32x128xf32>
      %67 = tpu.matmul %65, %66, %cst_40 {dimension_numbers = #tpu.dot_dimension_numbers<[1], [0], [0], [1], [0, 0, 1, 1], [], []>} : vector<32x128xbf16>, vector<128x128xbf16>, vector<32x128xf32> -> vector<32x128xf32>
      %c0_41 = arith.constant 0 : index
      %c0_42 = arith.constant 0 : index
      %68 = vector.load %arg9[%c0_41, %c0_42] : memref<1x128xf32, #tpu.memory_space<vmem>>, vector<1x128xf32>
      %69 = vector.broadcast %68 : vector<1x128xf32> to vector<32x128xf32>
      %70 = arith.addf %67, %69 : vector<32x128xf32>
      %71 = vector.shape_cast %63 : vector<32x128xf32> to vector<32x4x32xf32>
      %72 = tpu.transpose %71, [1, 0, 2] : vector<32x4x32xf32> -> vector<4x32x32xf32>
      %73 = arith.truncf %72 : vector<4x32x32xf32> to vector<4x32x32xbf16>
      %c0_43 = arith.constant 0 : index
      %c0_44 = arith.constant 0 : index
      %c0_45 = arith.constant 0 : index
      %74 = vector.load %arg13[%c0_43, %c0_44, %c0_45] : memref<4x32x32xbf16, #tpu.memory_space<vmem>>, vector<4x32x32xbf16>
      tpu.vector_store %arg13[%c0_43, %c0_44, %c0_45], %73 {strides = array<i32>} : memref<4x32x32xbf16, #tpu.memory_space<vmem>>, vector<4x32x32xbf16>,
      %75 = vector.shape_cast %70 : vector<32x128xf32> to vector<32x4x32xf32>
      %76 = tpu.transpose %75, [1, 0, 2] : vector<32x4x32xf32> -> vector<4x32x32xf32>
      %77 = arith.truncf %76 : vector<4x32x32xf32> to vector<4x32x32xbf16>
      %c0_46 = arith.constant 0 : index
      %c0_47 = arith.constant 0 : index
      %c0_48 = arith.constant 0 : index
      %78 = vector.load %arg14[%c0_46, %c0_47, %c0_48] : memref<4x32x32xbf16, #tpu.memory_space<vmem>>, vector<4x32x32xbf16>
      tpu.vector_store %arg14[%c0_46, %c0_47, %c0_48], %77 {strides = array<i32>} : memref<4x32x32xbf16, #tpu.memory_space<vmem>>, vector<4x32x32xbf16>,
    } else {
    }
    %c0 = arith.constant 0 : index
    %c0_1 = arith.constant 0 : index
    %c0_2 = arith.constant 0 : index
    %3 = vector.load %arg2[%c0, %c0_1, %c0_2] : memref<1x16x128xbf16, #tpu.memory_space<vmem>>, vector<1x16x128xbf16>
    %4 = vector.shape_cast %3 : vector<1x16x128xbf16> to vector<16x128xbf16>
    %c0_3 = arith.constant 0 : index
    %c0_4 = arith.constant 0 : index
    %5 = vector.load %arg4[%c0_3, %c0_4] : memref<128x128xbf16, #tpu.memory_space<vmem>>, vector<128x128xbf16>
    %cst = arith.constant dense<0.000000e+00> : vector<16x128xf32>
    %6 = tpu.matmul %4, %5, %cst {dimension_numbers = #tpu.dot_dimension_numbers<[1], [0], [0], [1], [0, 0, 1, 1], [], []>} : vector<16x128xbf16>, vector<128x128xbf16>, vector<16x128xf32> -> vector<16x128xf32>
    %c0_5 = arith.constant 0 : index
    %c0_6 = arith.constant 0 : index
    %7 = vector.load %arg5[%c0_5, %c0_6] : memref<1x128xf32, #tpu.memory_space<vmem>>, vector<1x128xf32>
    %8 = vector.broadcast %7 : vector<1x128xf32> to vector<16x128xf32>
    %9 = arith.addf %6, %8 : vector<16x128xf32>
    %cst_7 = arith.constant 0.176776692 : f32
    %10 = vector.broadcast %cst_7 : f32 to vector<16x128xf32>
    %11 = arith.mulf %9, %10 : vector<16x128xf32>
    %12 = vector.shape_cast %11 : vector<16x128xf32> to vector<16x4x32xf32>
    %13 = tpu.transpose %12, [1, 0, 2] : vector<16x4x32xf32> -> vector<4x16x32xf32>
    %14 = arith.truncf %13 : vector<4x16x32xf32> to vector<4x16x32xbf16>
    %c0_8 = arith.constant 0 : index
    %c0_9 = arith.constant 0 : index
    %c0_10 = arith.constant 0 : index
    %15 = vector.load %arg13[%c0_8, %c0_9, %c0_10] : memref<4x32x32xbf16, #tpu.memory_space<vmem>>, vector<4x32x32xbf16>
    %c0_11 = arith.constant 0 : index
    %c0_12 = arith.constant 0 : index
    %c0_13 = arith.constant 0 : index
    %16 = vector.load %arg14[%c0_11, %c0_12, %c0_13] : memref<4x32x32xbf16, #tpu.memory_space<vmem>>, vector<4x32x32xbf16>
    "tpu.trace_start"() <{level = 10 : i32, message = "htd,hnd->htn"}> : () -> ()
    %cst_14 = arith.constant dense<0.000000e+00> : vector<4x16x32xf32>
    %17 = tpu.matmul %14, %15, %cst_14 {dimension_numbers = #tpu.dot_dimension_numbers<[2], [2], [1], [1], [0, 0, 0, 1, 1, 1], [0], [0]>} : vector<4x16x32xbf16>, vector<4x32x32xbf16>, vector<4x16x32xf32> -> vector<4x16x32xf32>
    "tpu.trace_stop"() : () -> ()
    %18 = tpu.iota {dimensions = array<i32: 0>} : vector<16x32xi32>
    %c16_i32 = arith.constant 16 : i32
    %19 = arith.muli %arg1, %c16_i32 : i32
    %20 = vector.broadcast %19 : i32 to vector<16x32xi32>
    %21 = arith.addi %18, %20 : vector<16x32xi32>
    %22 = tpu.iota {dimensions = array<i32: 1>} : vector<16x32xi32>
    %23 = arith.subi %22, %21 : vector<16x32xi32>
    %c-5_i32 = arith.constant -5 : i32
    %24 = vector.broadcast %c-5_i32 : i32 to vector<16x32xi32>
    %25 = arith.cmpi sge, %23, %24 : vector<16x32xi32>
    %c5_i32 = arith.constant 5 : i32
    %26 = vector.broadcast %c5_i32 : i32 to vector<16x32xi32>
    %27 = arith.cmpi sle, %23, %26 : vector<16x32xi32>
    %28 = arith.andi %25, %27 : vector<16x32xi1>
    %29 = vector.shape_cast %28 : vector<16x32xi1> to vector<1x16x32xi1>
    %cst_15 = arith.constant 0xFF800000 : f32
    %30 = vector.shape_cast %29 : vector<1x16x32xi1> to vector<1x16x32xi1>
    %31 = vector.broadcast %30 : vector<1x16x32xi1> to vector<4x16x32xi1>
    %32 = vector.broadcast %cst_15 : f32 to vector<4x16x32xf32>
    %33 = arith.select %31, %17, %32 : vector<4x16x32xi1>, vector<4x16x32xf32>
    %cst_16 = arith.constant dense<0xFF800000> : vector<4x16xf32>
    %34 = vector.multi_reduction <maximumf>, %33, %cst_16 [2] : vector<4x16x32xf32> to vector<4x16xf32>
    %35 = vector.shape_cast %34 : vector<4x16xf32> to vector<4x16x1xf32>
    %36 = vector.broadcast %35 : vector<4x16x1xf32> to vector<4x16x32xf32>
    %37 = arith.subf %33, %36 : vector<4x16x32xf32>
    %38 = math.exp %37 : vector<4x16x32xf32>
    %cst_17 = arith.constant dense<0.000000e+00> : vector<4x16xf32>
    %39 = vector.multi_reduction <add>, %38, %cst_17 [2] : vector<4x16x32xf32> to vector<4x16xf32>
    %40 = vector.shape_cast %39 : vector<4x16xf32> to vector<4x16x1xf32>
    %41 = tpu.reciprocal %40 {approx = true} : vector<4x16x1xf32> -> vector<4x16x1xf32>
    %42 = vector.broadcast %41 : vector<4x16x1xf32> to vector<4x16x32xf32>
    %43 = arith.mulf %38, %42 : vector<4x16x32xf32>
    %44 = arith.truncf %43 : vector<4x16x32xf32> to vector<4x16x32xbf16>
    "tpu.trace_start"() <{level = 10 : i32, message = "htn,hnd->htd"}> : () -> ()
    %cst_18 = arith.constant dense<0.000000e+00> : vector<4x16x32xf32>
    %45 = tpu.matmul %44, %16, %cst_18 {dimension_numbers = #tpu.dot_dimension_numbers<[2], [1], [1], [2], [0, 0, 0, 1, 1, 2], [0], [0]>} : vector<4x16x32xbf16>, vector<4x32x32xbf16>, vector<4x16x32xf32> -> vector<4x16x32xf32>
    "tpu.trace_stop"() : () -> ()
    %46 = tpu.transpose %45, [1, 0, 2] : vector<4x16x32xf32> -> vector<16x4x32xf32>
    %47 = vector.shape_cast %46 : vector<16x4x32xf32> to vector<16x128xf32>
    %48 = arith.truncf %47 : vector<16x128xf32> to vector<16x128xbf16>
    %c0_19 = arith.constant 0 : index
    %c0_20 = arith.constant 0 : index
    %49 = vector.load %arg10[%c0_19, %c0_20] : memref<128x128xbf16, #tpu.memory_space<vmem>>, vector<128x128xbf16>
    %cst_21 = arith.constant dense<0.000000e+00> : vector<16x128xf32>
    %50 = tpu.matmul %48, %49, %cst_21 {dimension_numbers = #tpu.dot_dimension_numbers<[1], [0], [0], [1], [0, 0, 1, 1], [], []>} : vector<16x128xbf16>, vector<128x128xbf16>, vector<16x128xf32> -> vector<16x128xf32>
    %c0_22 = arith.constant 0 : index
    %c0_23 = arith.constant 0 : index
    %51 = vector.load %arg11[%c0_22, %c0_23] : memref<1x128xf32, #tpu.memory_space<vmem>>, vector<1x128xf32>
    %52 = vector.broadcast %51 : vector<1x128xf32> to vector<16x128xf32>
    %53 = arith.addf %50, %52 : vector<16x128xf32>
    %c0_24 = arith.constant 0 : index
    %c0_25 = arith.constant 0 : index
    %c0_26 = arith.constant 0 : index
    %54 = vector.load %arg12[%c0_24, %c0_25, %c0_26] : memref<1x16x128xf32, #tpu.memory_space<vmem>>, vector<1x16x128xf32>
    %55 = vector.shape_cast %54 : vector<1x16x128xf32> to vector<16x128xf32>
    %56 = vector.shape_cast %53 : vector<16x128xf32> to vector<1x16x128xf32>
    tpu.vector_store %arg12[%c0_24, %c0_25, %c0_26], %56 {strides = array<i32>} : memref<1x16x128xf32, #tpu.memory_space<vmem>>, vector<1x16x128xf32>,
    return
  }
  func.func @transform_0(%arg0: i32, %arg1: i32) -> (i32, i32, i32) {
    %c0_i32 = arith.constant 0 : i32
    %c0_i32_0 = arith.constant 0 : i32
    return %arg0, %arg1, %c0_i32 : i32, i32, i32
  }
  func.func @transform_1(%arg0: i32, %arg1: i32) -> (i32, i32, i32) {
    %c0_i32 = arith.constant 0 : i32
    %c0_i32_0 = arith.constant 0 : i32
    %c0_i32_1 = arith.constant 0 : i32
    return %arg0, %c0_i32, %c0_i32_0 : i32, i32, i32
  }
  func.func @transform_2(%arg0: i32, %arg1: i32) -> (i32, i32) {
    %c0_i32 = arith.constant 0 : i32
    %c0_i32_0 = arith.constant 0 : i32
    %c0_i32_1 = arith.constant 0 : i32
    return %c0_i32, %c0_i32_0 : i32, i32
  }
  func.func @transform_3(%arg0: i32, %arg1: i32) -> (i32, i32) {
    %c0_i32 = arith.constant 0 : i32
    %c0_i32_0 = arith.constant 0 : i32
    %c0_i32_1 = arith.constant 0 : i32
    return %c0_i32, %c0_i32_0 : i32, i32
  }
  func.func @transform_4(%arg0: i32, %arg1: i32) -> (i32, i32) {
    %c0_i32 = arith.constant 0 : i32
    %c0_i32_0 = arith.constant 0 : i32
    %c0_i32_1 = arith.constant 0 : i32
    return %c0_i32, %c0_i32_0 : i32, i32
  }
  func.func @transform_5(%arg0: i32, %arg1: i32) -> (i32, i32) {
    %c0_i32 = arith.constant 0 : i32
    %c0_i32_0 = arith.constant 0 : i32
    %c0_i32_1 = arith.constant 0 : i32
    return %c0_i32, %c0_i32_0 : i32, i32
  }
  func.func @transform_6(%arg0: i32, %arg1: i32) -> (i32, i32) {
    %c0_i32 = arith.constant 0 : i32
    %c0_i32_0 = arith.constant 0 : i32
    %c0_i32_1 = arith.constant 0 : i32
    return %c0_i32, %c0_i32_0 : i32, i32
  }
  func.func @transform_7(%arg0: i32, %arg1: i32) -> (i32, i32) {
    %c0_i32 = arith.constant 0 : i32
    %c0_i32_0 = arith.constant 0 : i32
    %c0_i32_1 = arith.constant 0 : i32
    return %c0_i32, %c0_i32_0 : i32, i32
  }
  func.func @transform_8(%arg0: i32, %arg1: i32) -> (i32, i32) {
    %c0_i32 = arith.constant 0 : i32
    %c0_i32_0 = arith.constant 0 : i32
    %c0_i32_1 = arith.constant 0 : i32
    return %c0_i32, %c0_i32_0 : i32, i32
  }
  func.func @transform_9(%arg0: i32, %arg1: i32) -> (i32, i32) {
    %c0_i32 = arith.constant 0 : i32
    %c0_i32_0 = arith.constant 0 : i32
    %c0_i32_1 = arith.constant 0 : i32
    return %c0_i32, %c0_i32_0 : i32, i32
  }
  func.func @transform_10(%arg0: i32, %arg1: i32) -> (i32, i32, i32) {
    %c0_i32 = arith.constant 0 : i32
    %c0_i32_0 = arith.constant 0 : i32
    return %arg0, %arg1, %c0_i32 : i32, i32, i32
  }
}

module attributes {stable_mosaic.version = 11 : i64} {
  func.func @_mha_kernel(%arg0: i32, %arg1: i32, %arg2: memref<1x16x128xbf16, #tpu.memory_space<vmem>>, %arg3: memref<1x8x64xbf16, #tpu.memory_space<vmem>>, %arg4: memref<128x128xbf16, #tpu.memory_space<vmem>>, %arg5: memref<1x128xf32, #tpu.memory_space<vmem>>, %arg6: memref<64x128xbf16, #tpu.memory_space<vmem>>, %arg7: memref<1x128xf32, #tpu.memory_space<vmem>>, %arg8: memref<64x128xbf16, #tpu.memory_space<vmem>>, %arg9: memref<1x128xf32, #tpu.memory_space<vmem>>, %arg10: memref<128x128xbf16, #tpu.memory_space<vmem>>, %arg11: memref<1x128xf32, #tpu.memory_space<vmem>>, %arg12: memref<1x16x128xf32, #tpu.memory_space<vmem>>, %arg13: memref<4x8x32xbf16, #tpu.memory_space<vmem>>, %arg14: memref<4x8x32xbf16, #tpu.memory_space<vmem>>) attributes {dimension_semantics = [#tpu.dimension_semantics<parallel>, #tpu.dimension_semantics<arbitrary>], iteration_bounds = array<i64: 2, 2>, scalar_prefetch = 0 : i64, scratch_operands = 2 : i64, tpu.core_type = #tpu.core_type<tc>, window_params = [{transform_indices = @transform_0, window_bounds = array<i64: 1, 16, 128>}, {transform_indices = @transform_1, window_bounds = array<i64: 1, 8, 64>}, {pipeline_mode = #tpu.pipeline_mode<synchronous>, transform_indices = @transform_2, window_bounds = array<i64: 128, 128>}, {pipeline_mode = #tpu.pipeline_mode<synchronous>, transform_indices = @transform_3, window_bounds = array<i64: 1, 128>}, {pipeline_mode = #tpu.pipeline_mode<synchronous>, transform_indices = @transform_4, window_bounds = array<i64: 64, 128>}, {pipeline_mode = #tpu.pipeline_mode<synchronous>, transform_indices = @transform_5, window_bounds = array<i64: 1, 128>}, {pipeline_mode = #tpu.pipeline_mode<synchronous>, transform_indices = @transform_6, window_bounds = array<i64: 64, 128>}, {pipeline_mode = #tpu.pipeline_mode<synchronous>, transform_indices = @transform_7, window_bounds = array<i64: 1, 128>}, {pipeline_mode = #tpu.pipeline_mode<synchronous>, transform_indices = @transform_8, window_bounds = array<i64: 128, 128>}, {pipeline_mode = #tpu.pipeline_mode<synchronous>, transform_indices = @transform_9, window_bounds = array<i64: 1, 128>}, {transform_indices = @transform_10, window_bounds = array<i64: 1, 16, 128>}]} {
    %c0_i32 = arith.constant 0 : i32
    %0 = arith.cmpi eq, %arg1, %c0_i32 : i32
    %1 = arith.extui %0 : i1 to i32
    %c0_i32_0 = arith.constant 0 : i32
    %2 = arith.cmpi ne, %1, %c0_i32_0 : i32
    scf.if %2 {
      %c0_26 = arith.constant 0 : index
      %c0_27 = arith.constant 0 : index
      %c0_28 = arith.constant 0 : index
      %41 = vector.load %arg3[%c0_26, %c0_27, %c0_28] : memref<1x8x64xbf16, #tpu.memory_space<vmem>>, vector<1x8x64xbf16>
      %42 = vector.shape_cast %41 : vector<1x8x64xbf16> to vector<8x64xbf16>
      %c0_29 = arith.constant 0 : index
      %c0_30 = arith.constant 0 : index
      %43 = vector.load %arg6[%c0_29, %c0_30] : memref<64x128xbf16, #tpu.memory_space<vmem>>, vector<64x128xbf16>
      %cst_31 = arith.constant dense<0.000000e+00> : vector<8x128xf32>
      %44 = tpu.matmul %42, %43, %cst_31 {dimension_numbers = #tpu.dot_dimension_numbers<[1], [0], [0], [1], [0, 0, 1, 1], [], []>} : vector<8x64xbf16>, vector<64x128xbf16>, vector<8x128xf32> -> vector<8x128xf32>
      %c0_32 = arith.constant 0 : index
      %c0_33 = arith.constant 0 : index
      %45 = vector.load %arg7[%c0_32, %c0_33] : memref<1x128xf32, #tpu.memory_space<vmem>>, vector<1x128xf32>
      %46 = vector.broadcast %45 : vector<1x128xf32> to vector<8x128xf32>
      %47 = arith.addf %44, %46 : vector<8x128xf32>
      %c0_34 = arith.constant 0 : index
      %c0_35 = arith.constant 0 : index
      %c0_36 = arith.constant 0 : index
      %48 = vector.load %arg3[%c0_34, %c0_35, %c0_36] : memref<1x8x64xbf16, #tpu.memory_space<vmem>>, vector<1x8x64xbf16>
      %49 = vector.shape_cast %48 : vector<1x8x64xbf16> to vector<8x64xbf16>
      %c0_37 = arith.constant 0 : index
      %c0_38 = arith.constant 0 : index
      %50 = vector.load %arg8[%c0_37, %c0_38] : memref<64x128xbf16, #tpu.memory_space<vmem>>, vector<64x128xbf16>
      %cst_39 = arith.constant dense<0.000000e+00> : vector<8x128xf32>
      %51 = tpu.matmul %49, %50, %cst_39 {dimension_numbers = #tpu.dot_dimension_numbers<[1], [0], [0], [1], [0, 0, 1, 1], [], []>} : vector<8x64xbf16>, vector<64x128xbf16>, vector<8x128xf32> -> vector<8x128xf32>
      %c0_40 = arith.constant 0 : index
      %c0_41 = arith.constant 0 : index
      %52 = vector.load %arg9[%c0_40, %c0_41] : memref<1x128xf32, #tpu.memory_space<vmem>>, vector<1x128xf32>
      %53 = vector.broadcast %52 : vector<1x128xf32> to vector<8x128xf32>
      %54 = arith.addf %51, %53 : vector<8x128xf32>
      %55 = vector.shape_cast %47 : vector<8x128xf32> to vector<8x4x32xf32>
      %56 = tpu.transpose %55, [1, 0, 2] : vector<8x4x32xf32> -> vector<4x8x32xf32>
      %57 = arith.truncf %56 : vector<4x8x32xf32> to vector<4x8x32xbf16>
      %c0_42 = arith.constant 0 : index
      %c0_43 = arith.constant 0 : index
      %c0_44 = arith.constant 0 : index
      %58 = vector.load %arg13[%c0_42, %c0_43, %c0_44] : memref<4x8x32xbf16, #tpu.memory_space<vmem>>, vector<4x8x32xbf16>
      tpu.vector_store %arg13[%c0_42, %c0_43, %c0_44], %57 {strides = array<i32>} : memref<4x8x32xbf16, #tpu.memory_space<vmem>>, vector<4x8x32xbf16>,
      %59 = vector.shape_cast %54 : vector<8x128xf32> to vector<8x4x32xf32>
      %60 = tpu.transpose %59, [1, 0, 2] : vector<8x4x32xf32> -> vector<4x8x32xf32>
      %61 = arith.truncf %60 : vector<4x8x32xf32> to vector<4x8x32xbf16>
      %c0_45 = arith.constant 0 : index
      %c0_46 = arith.constant 0 : index
      %c0_47 = arith.constant 0 : index
      %62 = vector.load %arg14[%c0_45, %c0_46, %c0_47] : memref<4x8x32xbf16, #tpu.memory_space<vmem>>, vector<4x8x32xbf16>
      tpu.vector_store %arg14[%c0_45, %c0_46, %c0_47], %61 {strides = array<i32>} : memref<4x8x32xbf16, #tpu.memory_space<vmem>>, vector<4x8x32xbf16>,
    } else {
    }
    %c0 = arith.constant 0 : index
    %c0_1 = arith.constant 0 : index
    %c0_2 = arith.constant 0 : index
    %3 = vector.load %arg2[%c0, %c0_1, %c0_2] : memref<1x16x128xbf16, #tpu.memory_space<vmem>>, vector<1x16x128xbf16>
    %4 = vector.shape_cast %3 : vector<1x16x128xbf16> to vector<16x128xbf16>
    %c0_3 = arith.constant 0 : index
    %c0_4 = arith.constant 0 : index
    %5 = vector.load %arg4[%c0_3, %c0_4] : memref<128x128xbf16, #tpu.memory_space<vmem>>, vector<128x128xbf16>
    %cst = arith.constant dense<0.000000e+00> : vector<16x128xf32>
    %6 = tpu.matmul %4, %5, %cst {dimension_numbers = #tpu.dot_dimension_numbers<[1], [0], [0], [1], [0, 0, 1, 1], [], []>} : vector<16x128xbf16>, vector<128x128xbf16>, vector<16x128xf32> -> vector<16x128xf32>
    %c0_5 = arith.constant 0 : index
    %c0_6 = arith.constant 0 : index
    %7 = vector.load %arg5[%c0_5, %c0_6] : memref<1x128xf32, #tpu.memory_space<vmem>>, vector<1x128xf32>
    %8 = vector.broadcast %7 : vector<1x128xf32> to vector<16x128xf32>
    %9 = arith.addf %6, %8 : vector<16x128xf32>
    %cst_7 = arith.constant 0.176776692 : f32
    %10 = vector.broadcast %cst_7 : f32 to vector<16x128xf32>
    %11 = arith.mulf %9, %10 : vector<16x128xf32>
    %12 = vector.shape_cast %11 : vector<16x128xf32> to vector<16x4x32xf32>
    %13 = tpu.transpose %12, [1, 0, 2] : vector<16x4x32xf32> -> vector<4x16x32xf32>
    %14 = arith.truncf %13 : vector<4x16x32xf32> to vector<4x16x32xbf16>
    %c0_8 = arith.constant 0 : index
    %c0_9 = arith.constant 0 : index
    %c0_10 = arith.constant 0 : index
    %15 = vector.load %arg13[%c0_8, %c0_9, %c0_10] : memref<4x8x32xbf16, #tpu.memory_space<vmem>>, vector<4x8x32xbf16>
    %c0_11 = arith.constant 0 : index
    %c0_12 = arith.constant 0 : index
    %c0_13 = arith.constant 0 : index
    %16 = vector.load %arg14[%c0_11, %c0_12, %c0_13] : memref<4x8x32xbf16, #tpu.memory_space<vmem>>, vector<4x8x32xbf16>
    "tpu.trace_start"() <{level = 10 : i32, message = "htd,hnd->htn"}> : () -> ()
    %cst_14 = arith.constant dense<0.000000e+00> : vector<4x16x8xf32>
    %17 = tpu.matmul %14, %15, %cst_14 {dimension_numbers = #tpu.dot_dimension_numbers<[2], [2], [1], [1], [0, 0, 0, 1, 1, 1], [0], [0]>} : vector<4x16x32xbf16>, vector<4x8x32xbf16>, vector<4x16x8xf32> -> vector<4x16x8xf32>
    "tpu.trace_stop"() : () -> ()
    %cst_15 = arith.constant dense<0xFF800000> : vector<4x16xf32>
    %18 = vector.multi_reduction <maximumf>, %17, %cst_15 [2] : vector<4x16x8xf32> to vector<4x16xf32>
    %19 = vector.shape_cast %18 : vector<4x16xf32> to vector<4x16x1xf32>
    %20 = vector.broadcast %19 : vector<4x16x1xf32> to vector<4x16x8xf32>
    %21 = arith.subf %17, %20 : vector<4x16x8xf32>
    %22 = math.exp %21 : vector<4x16x8xf32>
    %cst_16 = arith.constant dense<0.000000e+00> : vector<4x16xf32>
    %23 = vector.multi_reduction <add>, %22, %cst_16 [2] : vector<4x16x8xf32> to vector<4x16xf32>
    %24 = vector.shape_cast %23 : vector<4x16xf32> to vector<4x16x1xf32>
    %25 = tpu.reciprocal %24 {approx = true} : vector<4x16x1xf32> -> vector<4x16x1xf32>
    %26 = vector.broadcast %25 : vector<4x16x1xf32> to vector<4x16x8xf32>
    %27 = arith.mulf %22, %26 : vector<4x16x8xf32>
    %28 = arith.truncf %27 : vector<4x16x8xf32> to vector<4x16x8xbf16>
    "tpu.trace_start"() <{level = 10 : i32, message = "htn,hnd->htd"}> : () -> ()
    %cst_17 = arith.constant dense<0.000000e+00> : vector<4x16x32xf32>
    %29 = tpu.matmul %28, %16, %cst_17 {dimension_numbers = #tpu.dot_dimension_numbers<[2], [1], [1], [2], [0, 0, 0, 1, 1, 2], [0], [0]>} : vector<4x16x8xbf16>, vector<4x8x32xbf16>, vector<4x16x32xf32> -> vector<4x16x32xf32>
    "tpu.trace_stop"() : () -> ()
    %30 = tpu.transpose %29, [1, 0, 2] : vector<4x16x32xf32> -> vector<16x4x32xf32>
    %31 = vector.shape_cast %30 : vector<16x4x32xf32> to vector<16x128xf32>
    %32 = arith.truncf %31 : vector<16x128xf32> to vector<16x128xbf16>
    %c0_18 = arith.constant 0 : index
    %c0_19 = arith.constant 0 : index
    %33 = vector.load %arg10[%c0_18, %c0_19] : memref<128x128xbf16, #tpu.memory_space<vmem>>, vector<128x128xbf16>
    %cst_20 = arith.constant dense<0.000000e+00> : vector<16x128xf32>
    %34 = tpu.matmul %32, %33, %cst_20 {dimension_numbers = #tpu.dot_dimension_numbers<[1], [0], [0], [1], [0, 0, 1, 1], [], []>} : vector<16x128xbf16>, vector<128x128xbf16>, vector<16x128xf32> -> vector<16x128xf32>
    %c0_21 = arith.constant 0 : index
    %c0_22 = arith.constant 0 : index
    %35 = vector.load %arg11[%c0_21, %c0_22] : memref<1x128xf32, #tpu.memory_space<vmem>>, vector<1x128xf32>
    %36 = vector.broadcast %35 : vector<1x128xf32> to vector<16x128xf32>
    %37 = arith.addf %34, %36 : vector<16x128xf32>
    %c0_23 = arith.constant 0 : index
    %c0_24 = arith.constant 0 : index
    %c0_25 = arith.constant 0 : index
    %38 = vector.load %arg12[%c0_23, %c0_24, %c0_25] : memref<1x16x128xf32, #tpu.memory_space<vmem>>, vector<1x16x128xf32>
    %39 = vector.shape_cast %38 : vector<1x16x128xf32> to vector<16x128xf32>
    %40 = vector.shape_cast %37 : vector<16x128xf32> to vector<1x16x128xf32>
    tpu.vector_store %arg12[%c0_23, %c0_24, %c0_25], %40 {strides = array<i32>} : memref<1x16x128xf32, #tpu.memory_space<vmem>>, vector<1x16x128xf32>,
    return
  }
  func.func @transform_0(%arg0: i32, %arg1: i32) -> (i32, i32, i32) {
    %c0_i32 = arith.constant 0 : i32
    %c0_i32_0 = arith.constant 0 : i32
    return %arg0, %arg1, %c0_i32 : i32, i32, i32
  }
  func.func @transform_1(%arg0: i32, %arg1: i32) -> (i32, i32, i32) {
    %c0_i32 = arith.constant 0 : i32
    %c0_i32_0 = arith.constant 0 : i32
    %c0_i32_1 = arith.constant 0 : i32
    return %arg0, %c0_i32, %c0_i32_0 : i32, i32, i32
  }
  func.func @transform_2(%arg0: i32, %arg1: i32) -> (i32, i32) {
    %c0_i32 = arith.constant 0 : i32
    %c0_i32_0 = arith.constant 0 : i32
    %c0_i32_1 = arith.constant 0 : i32
    return %c0_i32, %c0_i32_0 : i32, i32
  }
  func.func @transform_3(%arg0: i32, %arg1: i32) -> (i32, i32) {
    %c0_i32 = arith.constant 0 : i32
    %c0_i32_0 = arith.constant 0 : i32
    %c0_i32_1 = arith.constant 0 : i32
    return %c0_i32, %c0_i32_0 : i32, i32
  }
  func.func @transform_4(%arg0: i32, %arg1: i32) -> (i32, i32) {
    %c0_i32 = arith.constant 0 : i32
    %c0_i32_0 = arith.constant 0 : i32
    %c0_i32_1 = arith.constant 0 : i32
    return %c0_i32, %c0_i32_0 : i32, i32
  }
  func.func @transform_5(%arg0: i32, %arg1: i32) -> (i32, i32) {
    %c0_i32 = arith.constant 0 : i32
    %c0_i32_0 = arith.constant 0 : i32
    %c0_i32_1 = arith.constant 0 : i32
    return %c0_i32, %c0_i32_0 : i32, i32
  }
  func.func @transform_6(%arg0: i32, %arg1: i32) -> (i32, i32) {
    %c0_i32 = arith.constant 0 : i32
    %c0_i32_0 = arith.constant 0 : i32
    %c0_i32_1 = arith.constant 0 : i32
    return %c0_i32, %c0_i32_0 : i32, i32
  }
  func.func @transform_7(%arg0: i32, %arg1: i32) -> (i32, i32) {
    %c0_i32 = arith.constant 0 : i32
    %c0_i32_0 = arith.constant 0 : i32
    %c0_i32_1 = arith.constant 0 : i32
    return %c0_i32, %c0_i32_0 : i32, i32
  }
  func.func @transform_8(%arg0: i32, %arg1: i32) -> (i32, i32) {
    %c0_i32 = arith.constant 0 : i32
    %c0_i32_0 = arith.constant 0 : i32
    %c0_i32_1 = arith.constant 0 : i32
    return %c0_i32, %c0_i32_0 : i32, i32
  }
  func.func @transform_9(%arg0: i32, %arg1: i32) -> (i32, i32) {
    %c0_i32 = arith.constant 0 : i32
    %c0_i32_0 = arith.constant 0 : i32
    %c0_i32_1 = arith.constant 0 : i32
    return %c0_i32, %c0_i32_0 : i32, i32
  }
  func.func @transform_10(%arg0: i32, %arg1: i32) -> (i32, i32, i32) {
    %c0_i32 = arith.constant 0 : i32
    %c0_i32_0 = arith.constant 0 : i32
    return %arg0, %arg1, %c0_i32 : i32, i32, i32
  }
}

</mosaic_0001>

<bundles_post_ra>
// kernel: magnet_forward.5
= control target key start
LH: loop header
LB: loop body
LE: loop exit
PB: predicated region body
PF: predicated region fallthrough
CT: control target
= control target key end

     0   :  { %s4290_s0 = inlined_call_operand.hbm [shape: bf16[2,32,128], index: 0, kind: input, shape index: {}]   ;;  %s4291_s1 = inlined_call_operand.hbm [shape: bf16[2,8,64], index: 1, kind: input, shape index: {}]   ;;  %s4292_s2 = inlined_call_operand.hbm [shape: bf16[128,128], index: 2, kind: input, shape index: {}]   ;;  %s4293_s3 = inlined_call_operand.hbm [shape: f32[1,128], index: 3, kind: input, shape index: {}]   ;;  %s4294_s4 = inlined_call_operand.hbm [shape: bf16[64,128], index: 4, kind: input, shape index: {}]   ;;  %s4295_s5 = inlined_call_operand.hbm [shape: f32[1,128], index: 5, kind: input, shape index: {}]   ;;  %s4296_s6 = inlined_call_operand.hbm [shape: bf16[64,128], index: 6, kind: input, shape index: {}]   ;;  %s4297_s7 = inlined_call_operand.hbm [shape: f32[1,128], index: 7, kind: input, shape index: {}]   ;;  %s4298_s8 = inlined_call_operand.hbm [shape: bf16[128,128], index: 8, kind: input, shape index: {}]   ;;  %s4299_s9 = inlined_call_operand.hbm [shape: f32[1,128], index: 9, kind: input, shape index: {}]   ;;  %s4300_s10 = inlined_call_operand.hbm [shape: f32[2,32,128], index: 10, kind: output, shape index: {}]  }
   0x1   :  { %4317 = sst [smem:[#allocation36_spill]] %s4290_s0 }
   0x2   :  { %4318 = sst [smem:[#allocation37_spill]] %s4291_s1 }
   0x3   :  { %4319 = sst [smem:[#allocation38_spill]] %s4292_s2 }
   0x4   :  { %4320 = sst [smem:[#allocation39_spill]] %s4293_s3 }
   0x5   :  { %4321 = sst [smem:[#allocation40_spill]] %s4294_s4 }
   0x6   :  { %4322 = sst [smem:[#allocation41_spill]] %s4295_s5 }
   0x7   :  { %4323 = sst [smem:[#allocation42_spill]] %s4296_s6 }
   0x8   :  { %4324 = sst [smem:[#allocation43_spill]] %s4297_s7 }
   0x9   :  { %4325 = sst [smem:[#allocation44_spill]] %s4298_s8 }
   0xa   :  { %4326 = sst [smem:[#allocation45_spill]] %s4299_s9 }
   0xb   :  { %4327 = sst [smem:[#allocation46_spill]] %s4300_s10 }
   0xc   :  { %15 = vsyncpa [#allocation5], 0 }
   0xd   :  { %17 = vsyncpa [#allocation5 + $0x1], 0 }
   0xe   :  { %18 = vsyncpa [#allocation8], 0 }
   0xf   :  { %20 = vsyncpa [#allocation8 + $0x1], 0 }
  0x10   :  { %21 = vsyncpa [#allocation11], 0 }
  0x11   :  { %22 = vsyncpa [#allocation14], 0 }
  0x12   :  { %23 = vsyncpa [#allocation17], 0 }
  0x13   :  { %24 = vsyncpa [#allocation20], 0 }
  0x14   :  { %25 = vsyncpa [#allocation6], 0 }
  0x15   :  { %27 = vsyncpa [#allocation6 + $0x1], 0  ;;  %s3579_s13 = smov 0   ;;  %s3581_s14 = smov 0  }
  0x16   :  { %s3583_s15 = smov 0   ;;  %s3585_s16 = smov 0  }
  0x17   :  { %s3587_s17 = smov 0   ;;  %s3589_s18 = smov 0  }
  0x18   :  { %s3591_s19 = smov 0   ;;  %s3593_s20 = smov 0  }
  0x19   :  { %s3595_s21 = smov 0   ;;  %s3597_s22 = smov 0  }
  0x1a   :  { %s3599_s23 = smov 0  }
  0x1b LB: > { %4328 = sst [smem:[#allocation30_spill]] %s3453_s13  ;;  %s3635_s24 = sadd.s32 4294967295, %s3493_s23   ;;  %s3493_s23 = sphi %s3599_s23, %s33_s23   ;;  %s3489_s22 = sphi %s3597_s22, %s4395_s22   ;;  %s3485_s21 = sphi %s3595_s21, %s4394_s21   ;;  %s3481_s20 = sphi %s3593_s20, %s4393_s20   ;;  %s3477_s19 = sphi %s3591_s19, %s4392_s19   ;;  %s3473_s18 = sphi %s3589_s18, %s4391_s18   ;;  %s3469_s17 = sphi %s3587_s17, %s4390_s17   ;;  %s3465_s16 = sphi %s3585_s16, %s4389_s16   ;;  %s3461_s15 = sphi %s3583_s15, %s4388_s15   ;;  %s3457_s14 = sphi %s3581_s14, %s4387_s14   ;;  %s3453_s13 = sphi %s3579_s13, %s4384_s13  }
  0x1c   : > { %4329 = sst [smem:[#allocation31_spill]] %s3457_s14  ;;  %p2543_p0 = scmp.ge.s32.totalorder %s3493_s23, 1 }
  0x1d   : > { %4330 = sst [smem:[#allocation32_spill]] %s3461_s15  ;;  %p4307_p1 = scmp.eq.s32.totalorder %s3635_s24, 0 }
  0x1e   : > { %4331 = sst [smem:[#allocation33_spill]] %s3477_s19  ;;  %p300_p2 = scmp.lt.s32.totalorder %s3493_s23, 5 }
  0x1f   : > { %4332 = sst [smem:[#allocation34_spill]] %s3481_s20  ;;  %s3495_s26 = smov [#allocation9]  }
  0x20   : > { %p3640_p3 = pnand %p2543_p0, %p300_p2  ;;  %s312_s27 = sshll.u32 %s3495_s26, 4  ;;  %s3644_s27 = int_to_ptr.vmem [resolvable:$true] %s312_s27 }
  0x21   : > { %s3496_s29 = smov [#allocation10]   ;;  %s3497_s11 = smov [#allocation13]  }
  0x22   : > { %s4333_s25 = scalar_select %p3640_p3, 1, 0 }
  0x23   : > { %p2823_p4 = pneg %p3640_p3  ;;  %s326_s30 = sshll.u32 %s3496_s29, 4  ;;  %s3654_s30 = int_to_ptr.vmem [resolvable:$true] %s326_s30 }
  0x24   : > { %4334 = sst [smem:[#allocation35_spill]] %s4333_s25  ;;  %s3656_s12 = sshll.u32 %s3497_s11, 4  ;;  %s351_s12 = int_to_ptr.vmem [resolvable:$true] %s3656_s12 }
  0x25   : > { %p3650_p5 = pnand %p2823_p4, %p4307_p1  ;;  %s4336_s2 = sld [smem:[#allocation38_spill]] }
  0x27   : > { %p3666_p7 = pneg %p3650_p5 }
  0x2b   : > { %s3063_s26 = scalar_lea.hbm %s4336_s2, 1024 }
  0x2c   : > { %p3064_p6 = scmp.ne.s32.totalorder %s4336_s2, %s3063_s26  ;;  %p3070_p10 = scmp.lt.u32.totalorder %s3063_s26, %s4336_s2 }
  0x2e   : > { %p3066_p8 = pnand %p3666_p7, %p3064_p6 }
  0x30   : > { %p3067_p9 = pneg %p3066_p8 }
  0x32   : > { %p3072_p11 = pnand %p3070_p10, %p3067_p9 }
  0x34   : > { %3075 = shalt.err (!%p3072_p11)
}
  0x35   : > { %s3076_s10 = scalar_lea.vmem %s3644_s27, 1024  ;;  %p3084_p2 = scmp.lt.s32.totalorder %s3644_s27, %s3644_s27 }
  0x36   : > { %p3077_p12 = scmp.ne.s32.totalorder %s3644_s27, %s3076_s10  ;;  %p3085_p4 = scmp.lt.s32.totalorder %s3076_s10, %s3076_s10 }
  0x38   : > { %p3079_p13 = pnand %p3077_p12, %p3666_p7  ;;  %p3086_p6 = por %p3085_p4, %p3084_p2 }
  0x3a   : > { %p3080_p0 = pneg %p3079_p13 }
  0x3c   : > { %p3087_p8 = pnand %p3086_p6, %p3080_p0 }
  0x3e   : > { %3090 = shalt.err (!%p3087_p8)
}
  0x3f   : > { %s4309_s19 = smov 64   ;;  %s4311_s20 = smov 4  }
  0x40   : > { %2826 = dma.hbm_to_vmem [thread:$0]  (!%p3650_p5), %s4336_s2, 1024, %s3644_s27, [#allocation8], %s4309_s19, %s4309_s19, %s4311_s20  }
  0x41   : > { %s4338_s3 = sld [smem:[#allocation39_spill]] }
  0x47   : > { %s3091_s10 = scalar_lea.hbm %s4338_s3, 16 }
  0x48   : > { %p3092_p9 = scmp.ne.s32.totalorder %s4338_s3, %s3091_s10  ;;  %p3098_p12 = scmp.lt.u32.totalorder %s3091_s10, %s4338_s3 }
  0x4a   : > { %p3094_p10 = pnand %p3092_p9, %p3666_p7 }
  0x4c   : > { %p3095_p11 = pneg %p3094_p10 }
  0x4e   : > { %p3100_p13 = pnand %p3098_p12, %p3095_p11 }
  0x50   : > { %3103 = shalt.err (!%p3100_p13)
}
  0x51   : > { %s3104_s27 = scalar_lea.vmem %s3654_s30, 16  ;;  %s3111_s13 = scalar_lea.vmem %s3654_s30, 32 }
  0x52   : > { %p3105_p0 = scmp.ne.s32.totalorder %s3654_s30, %s3104_s27  ;;  %p3112_p6 = scmp.lt.s32.totalorder %s3654_s30, %s3654_s30 }
  0x53   : > { %p3113_p8 = scmp.lt.s32.totalorder %s3111_s13, %s3104_s27 }
  0x54   : > { %p3107_p2 = pnand %p3105_p0, %p3666_p7 }
  0x55   : > { %p3114_p9 = por %p3113_p8, %p3112_p6 }
  0x56   : > { %p3108_p4 = pneg %p3107_p2 }
  0x58   : > { %p3115_p10 = pnand %p3114_p9, %p3108_p4 }
  0x5a   : > { %3118 = shalt.err (!%p3115_p10)
}
  0x5b   : > { %2829 = dma.hbm_to_vmem [thread:$0]  (!%p3650_p5), %s4338_s3, 16, %s3654_s30, [#allocation11]  }
  0x5c   : > { %s4339_s5 = sld [smem:[#allocation41_spill]] }
  0x62   : > { %s3119_s26 = scalar_lea.hbm %s4339_s5, 16 }
  0x63   : > { %p3120_p11 = scmp.ne.s32.totalorder %s4339_s5, %s3119_s26  ;;  %p3126_p0 = scmp.lt.u32.totalorder %s3119_s26, %s4339_s5 }
  0x65   : > { %p3122_p12 = pnand %p3120_p11, %p3666_p7 }
  0x67   : > { %p3123_p13 = pneg %p3122_p12 }
  0x69   : > { %p3128_p2 = pnand %p3126_p0, %p3123_p13 }
  0x6b   : > { %3131 = shalt.err (!%p3128_p2)
}
  0x6c   : > { %s3132_s13 = scalar_lea.vmem %s351_s12, 16  ;;  %s3139_s30 = scalar_lea.vmem %s351_s12, 32 }
  0x6d   : > { %p3133_p4 = scmp.ne.s32.totalorder %s351_s12, %s3132_s13  ;;  %p3140_p9 = scmp.lt.s32.totalorder %s351_s12, %s351_s12 }
  0x6e   : > { %p3141_p10 = scmp.lt.s32.totalorder %s3139_s30, %s3132_s13 }
  0x6f   : > { %p3135_p6 = pnand %p3133_p4, %p3666_p7 }
  0x70   : > { %p3142_p1 = por %p3141_p10, %p3140_p9 }
  0x71   : > { %p3136_p8 = pneg %p3135_p6 }
  0x73   : > { %p3143_p3 = pnand %p3142_p1, %p3136_p8 }
  0x75   : > { %3146 = shalt.err (!%p3143_p3)
}
  0x76   : > { %2835 = dma.hbm_to_vmem [thread:$0]  (!%p3650_p5), %s4339_s5, 16, %s351_s12, [#allocation14]  }
  0x77   : > { %s3500_s15 = smov [#allocation16]   ;;  %s3501_s26 = smov [#allocation12]  }
  0x78   : > { %s374_s25 = sshll.u32 %s3500_s15, 4  ;;  %s336_s29 = sshll.u32 %s3501_s26, 4  ;;  %s375_s25 = int_to_ptr.vmem [resolvable:$true] %s374_s25  ;;  %s337_s29 = int_to_ptr.vmem [resolvable:$true] %s336_s29 }
  0x79   : > { %s4340_s7 = sld [smem:[#allocation43_spill]] }
  0x7f   : > { %s3147_s27 = scalar_lea.hbm %s4340_s7, 16 }
  0x80   : > { %p3148_p1 = scmp.ne.s32.totalorder %s4340_s7, %s3147_s27  ;;  %p3154_p12 = scmp.lt.u32.totalorder %s3147_s27, %s4340_s7 }
  0x82   : > { %p3150_p3 = pnand %p3148_p1, %p3666_p7 }
  0x84   : > { %p3151_p11 = pneg %p3150_p3 }
  0x86   : > { %p3156_p13 = pnand %p3154_p12, %p3151_p11 }
  0x88   : > { %3159 = shalt.err (!%p3156_p13)
}
  0x89   : > { %s3160_s12 = scalar_lea.vmem %s375_s25, 16  ;;  %s3167_s14 = scalar_lea.vmem %s375_s25, 32 }
  0x8a   : > { %p3161_p0 = scmp.ne.s32.totalorder %s375_s25, %s3160_s12  ;;  %p3168_p6 = scmp.lt.s32.totalorder %s375_s25, %s375_s25 }
  0x8b   : > { %p3169_p8 = scmp.lt.s32.totalorder %s3167_s14, %s3160_s12 }
  0x8c   : > { %p3163_p2 = pnand %p3161_p0, %p3666_p7 }
  0x8d   : > { %p3170_p9 = por %p3169_p8, %p3168_p6 }
  0x8e   : > { %p3164_p4 = pneg %p3163_p2 }
  0x90   : > { %p3171_p10 = pnand %p3170_p9, %p3164_p4 }
  0x92   : > { %3174 = shalt.err (!%p3171_p10)
}
  0x93   : > { %2841 = dma.hbm_to_vmem [thread:$0]  (!%p3650_p5), %s4340_s7, 16, %s375_s25, [#allocation17]  }
  0x94   : > { %s4341_s4 = sld [smem:[#allocation40_spill]] }
  0x9a   : > { %s3175_s10 = scalar_lea.hbm %s4341_s4, 512 }
  0x9b   : > { %p3176_p1 = scmp.ne.s32.totalorder %s4341_s4, %s3175_s10  ;;  %p3182_p12 = scmp.lt.u32.totalorder %s3175_s10, %s4341_s4 }
  0x9d   : > { %p3178_p3 = pnand %p3176_p1, %p3666_p7 }
  0x9f   : > { %p3179_p11 = pneg %p3178_p3 }
  0xa1   : > { %p3184_p13 = pnand %p3182_p12, %p3179_p11 }
  0xa3   : > { %3187 = shalt.err (!%p3184_p13)
}
  0xa4   : > { %s3188_s12 = scalar_lea.vmem %s337_s29, 512  ;;  %p3196_p6 = scmp.lt.s32.totalorder %s337_s29, %s337_s29 }
  0xa5   : > { %p3189_p0 = scmp.ne.s32.totalorder %s337_s29, %s3188_s12  ;;  %p3197_p8 = scmp.lt.s32.totalorder %s3188_s12, %s3188_s12 }
  0xa7   : > { %p3191_p2 = pnand %p3189_p0, %p3666_p7  ;;  %p3198_p9 = por %p3197_p8, %p3196_p6 }
  0xa9   : > { %p3192_p4 = pneg %p3191_p2 }
  0xab   : > { %p3199_p10 = pnand %p3198_p9, %p3192_p4 }
  0xad   : > { %3202 = shalt.err (!%p3199_p10)
}
  0xae   : > { %s4342_s25 = smov 64   ;;  %s3502_s26 = smov [#allocation15]  }
  0xaf   : > { %2832 = dma.hbm_to_vmem [thread:$0]  (!%p3650_p5), %s4341_s4, 512, %s337_s29, [#allocation11], %s4342_s25, %s4342_s25, %s4311_s20  }
  0xb0   : > { %s360_s19 = sshll.u32 %s3502_s26, 4  ;;  %s3503_s11 = smov [#allocation18]   ;;  %s361_s19 = int_to_ptr.vmem [resolvable:$true] %s360_s19 }
  0xb1   : > { %s384_s10 = sshll.u32 %s3503_s11, 4  ;;  %s4343_s6 = sld [smem:[#allocation42_spill]]  ;;  %s385_s10 = int_to_ptr.vmem [resolvable:$true] %s384_s10 }
  0xb7   : > { %s3203_s30 = scalar_lea.hbm %s4343_s6, 512 }
  0xb8   : > { %p3204_p1 = scmp.ne.s32.totalorder %s4343_s6, %s3203_s30  ;;  %p3210_p12 = scmp.lt.u32.totalorder %s3203_s30, %s4343_s6 }
  0xba   : > { %p3206_p3 = pnand %p3204_p1, %p3666_p7 }
  0xbc   : > { %p3207_p11 = pneg %p3206_p3 }
  0xbe   : > { %p3212_p13 = pnand %p3210_p12, %p3207_p11 }
  0xc0   : > { %3215 = shalt.err (!%p3212_p13)
}
  0xc1   : > { %s3216_s29 = scalar_lea.vmem %s361_s19, 512  ;;  %p3224_p6 = scmp.lt.s32.totalorder %s361_s19, %s361_s19 }
  0xc2   : > { %p3217_p0 = scmp.ne.s32.totalorder %s361_s19, %s3216_s29  ;;  %p3225_p8 = scmp.lt.s32.totalorder %s3216_s29, %s3216_s29 }
  0xc4   : > { %p3219_p2 = pnand %p3217_p0, %p3666_p7  ;;  %p3226_p9 = por %p3225_p8, %p3224_p6 }
  0xc6   : > { %p3220_p4 = pneg %p3219_p2 }
  0xc8   : > { %p3227_p10 = pnand %p3226_p9, %p3220_p4 }
  0xca   : > { %3230 = shalt.err (!%p3227_p10)
}
  0xcb   : > { %2838 = dma.hbm_to_vmem [thread:$0]  (!%p3650_p5), %s4343_s6, 512, %s361_s19, [#allocation14], %s4342_s25, %s4342_s25, %s4311_s20  }
  0xcc   : > { %s4344_s8 = sld [smem:[#allocation44_spill]] }
  0xd2   : > { %s3231_s27 = scalar_lea.hbm %s4344_s8, 1024 }
  0xd3   : > { %p3232_p1 = scmp.ne.s32.totalorder %s4344_s8, %s3231_s27  ;;  %p3238_p12 = scmp.lt.u32.totalorder %s3231_s27, %s4344_s8 }
  0xd5   : > { %p3234_p3 = pnand %p3232_p1, %p3666_p7 }
  0xd7   : > { %p3235_p11 = pneg %p3234_p3 }
  0xd9   : > { %p3240_p13 = pnand %p3238_p12, %p3235_p11 }
  0xdb   : > { %3243 = shalt.err (!%p3240_p13)
}
  0xdc   : > { %s3244_s14 = scalar_lea.vmem %s385_s10, 1024  ;;  %p3252_p6 = scmp.lt.s32.totalorder %s385_s10, %s385_s10 }
  0xdd   : > { %p3245_p0 = scmp.ne.s32.totalorder %s385_s10, %s3244_s14  ;;  %p3253_p8 = scmp.lt.s32.totalorder %s3244_s14, %s3244_s14 }
  0xdf   : > { %p3247_p2 = pnand %p3245_p0, %p3666_p7  ;;  %p3254_p9 = por %p3253_p8, %p3252_p6 }
  0xe1   : > { %p3248_p4 = pneg %p3247_p2 }
  0xe3   : > { %p3255_p10 = pnand %p3254_p9, %p3248_p4 }
  0xe5   : > { %3258 = shalt.err (!%p3255_p10)
}
  0xe6   : > { %2844 = dma.hbm_to_vmem [thread:$0]  (!%p3650_p5), %s4344_s8, 1024, %s385_s10, [#allocation17], %s4342_s25, %s4342_s25, %s4311_s20  }
  0xe7   : > { %s3504_s2 = smov [#allocation19]   ;;  %s4345_s9 = sld [smem:[#allocation45_spill]] }
  0xe8   : > { %s398_s15 = sshll.u32 %s3504_s2, 4  ;;  %s399_s15 = int_to_ptr.vmem [resolvable:$true] %s398_s15 }
  0xed   : > { %s3259_s27 = scalar_lea.hbm %s4345_s9, 16 }
  0xee   : > { %p3260_p1 = scmp.ne.s32.totalorder %s4345_s9, %s3259_s27  ;;  %p3266_p12 = scmp.lt.u32.totalorder %s3259_s27, %s4345_s9 }
  0xf0   : > { %p3262_p3 = pnand %p3260_p1, %p3666_p7 }
  0xf2   : > { %p3263_p11 = pneg %p3262_p3 }
  0xf4   : > { %p3268_p13 = pnand %p3266_p12, %p3263_p11 }
  0xf6   : > { %3271 = shalt.err (!%p3268_p13)
}
  0xf7   : > { %s3272_s10 = scalar_lea.vmem %s399_s15, 16  ;;  %s3279_s14 = scalar_lea.vmem %s399_s15, 32 }
  0xf8   : > { %p3273_p0 = scmp.ne.s32.totalorder %s399_s15, %s3272_s10  ;;  %p3280_p6 = scmp.lt.s32.totalorder %s399_s15, %s399_s15 }
  0xf9   : > { %p3281_p8 = scmp.lt.s32.totalorder %s3279_s14, %s3272_s10 }
  0xfa   : > { %p3275_p2 = pnand %p3273_p0, %p3666_p7 }
  0xfb   : > { %p3282_p9 = por %p3281_p8, %p3280_p6 }
  0xfc   : > { %p3276_p4 = pneg %p3275_p2 }
  0xfe   : > { %p3283_p10 = pnand %p3282_p9, %p3276_p4 }
 0x100   : > { %3286 = shalt.err (!%p3283_p10)
}
 0x101   : > { %2847 = dma.hbm_to_vmem [thread:$0]  (!%p3650_p5), %s4345_s9, 16, %s399_s15, [#allocation20]  }
 0x102   : > { %s2542_s1 = sadd.s32 4294967294, %s3493_s23   ;;  %s42_s28 = sadd.s32 1, %s3485_s21 }
 0x103   : > { %p43_p7 = scmp.ge.s32.totalorder %s42_s28, 2  ;;  %s45_s2 = sadd.s32 1, %s3489_s22 }
 0x104   : > { %s54_s26 = sadd.s32 1, %s3473_s18  ;;  %p61_p1 = scmp.ne.s32.totalorder %s3473_s18, %s3469_s17 }
 0x105   : > { %s4397_s28 = smov (%p43_p7, %s42_s28), 0  ;;  %s4399_s2 = smov (!%p43_p7, %s45_s2), %s3489_s22 }
 0x106   : > { %s50_s11 = ssub.s32 %s3485_s21, %s4397_s28  ;;  %p4313_p3 = scmp.eq.s32.totalorder %s3493_s23, 0 }
 0x107   : > { %p47_p11 = scmp.ge.s32.totalorder %s4399_s2, 2  ;;  %p67_p12 = scmp.ne.s32.totalorder %s3469_s17, %s3465_s16 }
 0x108   : > { %p3848_p5 = por %p4313_p3, %p61_p1  ;;  %p287_p13 = scmp.eq.s32.totalorder %s3635_s24, 3 }
 0x109   : > { %s4401_s2 = smov (%p47_p11, %s4399_s2), 0  ;;  %p4347_p0 = scmp.eq.s32.totalorder %s3635_s24, 0 }
 0x10a   : > { %p3861_p4 = por %p287_p13, %p61_p1  ;;  %s3867_s30 = ssub.s32 %s3489_s22, %s4401_s2 }
 0x10b   : > { %p3857_p2 = por %p4347_p0, %p67_p12  ;;  %p293_p6 = scmp.eq.s32.totalorder %s2542_s1, 3 }
 0x10c   : > { %s4349_s13 = scalar_select %p3861_p4, 1, 0 }
 0x10d   : > { %s51_s0 = sor.u32 %s50_s11, %s3867_s30  ;;  %p3871_p10 = por %p293_p6, %p67_p12 }
 0x10e   : > { %p52_p9 = scmp.eq.s32.totalorder %s51_s0, 0  ;;  %p4312_p7 = scmp.lt.s32.totalorder %s3493_s23, 4 }
 0x10f   : > { %s4350_s12 = scalar_select %p3871_p10, 1, 0 }
 0x110   : > { %s409_s10 = sand.u32 1, %s3473_s18   ;;  %s2554_s29 = sshll.u32 %s3485_s21, 1 }
 0x111   : > { %s3878_s14 = scalar_select %p52_p9, %s3473_s18, %s54_s26  }
 0x112   : > { %s2553_s19 = sshll.u32 %s409_s10, 3  ;;  %s2555_s20 = sshll.u32 %s3489_s22, 2 }
 0x113   : > { %s413_s3 = scalar_lea.vmem [#allocation4], %s2553_s19  ;;  %s419_s5 = sadd.s32 %s2555_s20, %s2554_s29 }
 0x114   : > { %s422_s4 = sshll.u32 %s413_s3, 4  ;;  %s2556_s1 = sshll.u32 %s419_s5, 6  ;;  %s3882_s4 = int_to_ptr.vmem [resolvable:$true] %s422_s4 }
 0x115   : > { %p3888_p1 = pnand %p4312_p7, %p3848_p5  ;;  %s4352_s7 = sld [smem:[#allocation36_spill]] }
 0x116   : > { %s3897_s3 = scalar_lea.sflag [#allocation5], %s409_s10 }
 0x117   : > { %p3289_p12 = pneg %p3888_p1 }
 0x11b   : > { %s3895_s26 = scalar_lea.hbm %s4352_s7, %s2556_s1  ;;  %s3292_s15 = scalar_lea.hbm %s4352_s7, 512 }
 0x11c   : > { %s3287_s5 = scalar_lea.hbm %s3895_s26, 128  ;;  %p3293_p0 = scmp.lt.u32.totalorder %s3895_s26, %s4352_s7 }
 0x11d   : > { %p3288_p11 = scmp.ne.s32.totalorder %s3895_s26, %s3287_s5  ;;  %p3294_p6 = scmp.lt.u32.totalorder %s3292_s15, %s3287_s5 }
 0x11e   : > { %p3296_p7 = scmp.lt.u32.totalorder %s3287_s5, %s3895_s26 }
 0x11f   : > { %p3290_p5 = pnand %p3289_p12, %p3288_p11  ;;  %p3295_p9 = por %p3294_p6, %p3293_p0 }
 0x121   : > { %p3291_p13 = pneg %p3290_p5  ;;  %p3297_p3 = por %p3296_p7, %p3295_p9 }
 0x123   : > { %p3298_p8 = pnand %p3297_p3, %p3291_p13 }
 0x125   : > { %3301 = shalt.err (!%p3298_p8)
}
 0x126   : > { %s3302_s10 = scalar_lea.vmem %s3882_s4, 128  ;;  %s3505_s1 = smov [#allocation4]  }
 0x127   : > { %p3303_p11 = scmp.ne.s32.totalorder %s3882_s4, %s3302_s10  ;;  %s3307_s0 = sshll.u32 %s3505_s1, 4  ;;  %s3308_s0 = int_to_ptr.vmem [resolvable:$false] %s3307_s0 }
 0x128   : > { %s3309_s20 = scalar_lea.vmem %s3308_s0, 256  ;;  %p3310_p4 = scmp.lt.s32.totalorder %s3882_s4, %s3308_s0 }
 0x129   : > { %p3305_p5 = pnand %p3303_p11, %p3289_p12  ;;  %p3311_p0 = scmp.lt.s32.totalorder %s3309_s20, %s3302_s10 }
 0x12b   : > { %p3306_p10 = pneg %p3305_p5  ;;  %p3312_p6 = por %p3311_p0, %p3310_p4 }
 0x12d   : > { %p3313_p7 = pnand %p3312_p6, %p3306_p10 }
 0x12f   : > { %3316 = shalt.err (!%p3313_p7)
}
 0x130   : > { %s4353_s5 = smov 4   ;;  %s4354_s6 = sld [smem:[#allocation32_spill]] }
 0x131   : > { %s4355_s15 = sld [smem:[#allocation31_spill]]  ;;  %s4356_s19 = sld [smem:[#allocation30_spill]] }
 0x132   : > { %2851 = dma.hbm_to_vmem [thread:$0]  (!%p3888_p1), %s3895_s26, 128, %s3882_s4, %s3897_s3, %s4342_s25, %s4342_s25, %s4353_s5  }
 0x133   : > { %p4357_p4 = scmp.eq.s32.totalorder %s3867_s30, 0  ;;  %p4358_p8 = scmp.eq.s32.totalorder %s3493_s23, 0 }
 0x134   : > { %s432_s10 = sand.u32 1, %s3493_s23   ;;  %p4359_p13 = scmp.eq.s32.totalorder %s3635_s24, 0 }
 0x135   : > { %s2558_s7 = sshll.u32 %s3489_s22, 6  ;;  %s4361_s4 = sld [smem:[#allocation37_spill]] }
 0x136   : > { %s80_s11 = sadd.s32 1, %s4354_s6  ;;  %s434_s1 = sand.u32 1, %s4354_s6  }
 0x137   : > { %p87_p3 = scmp.ne.s32.totalorder %s4354_s6, %s4355_s15  ;;  %p93_p12 = scmp.ne.s32.totalorder %s4355_s15, %s4356_s19 }
 0x138   : > { %s3934_s29 = scalar_select %p4357_p4, %s4354_s6, %s80_s11  }
 0x139   : > { %p89_p10 = por %p87_p3, %p4358_p8  ;;  %p3944_p9 = por %p93_p12, %p4359_p13 }
 0x13a   : > { %s2557_s20 = sshll.u32 %s434_s1, 2  ;;  %p4362_p1 = scmp.lt.s32.totalorder %s3493_s23, 4 }
 0x13b   : > { %s4360_s0 = scalar_select %p3944_p9, 1, 0 }
 0x13c   : > { %s3952_s25 = scalar_lea.hbm %s4361_s4, %s2558_s7  ;;  %s436_s30 = scalar_lea.vmem [#allocation7], %s2557_s20 }
 0x13d   : > { %s443_s26 = sshll.u32 %s436_s30, 4  ;;  %p3956_p11 = pnand %p4362_p1, %p89_p10  ;;  %s3960_s26 = int_to_ptr.vmem [resolvable:$true] %s443_s26 }
 0x13e   : > { %s433_s5 = scalar_lea.sflag [#allocation8], %s432_s10  ;;  %s3317_s6 = scalar_lea.hbm %s3952_s25, 64 }
 0x13f   : > { %p3318_p5 = scmp.ne.s32.totalorder %s3952_s25, %s3317_s6  ;;  %p3319_p0 = pneg %p3956_p11 }
 0x140   : > { %s3322_s9 = scalar_lea.hbm %s4361_s4, 128  ;;  %p3323_p3 = scmp.lt.u32.totalorder %s3952_s25, %s4361_s4 }
 0x141   : > { %p3320_p6 = pnand %p3319_p0, %p3318_p5  ;;  %p3324_p4 = scmp.lt.u32.totalorder %s3322_s9, %s3317_s6 }
 0x142   : > { %p3326_p10 = scmp.lt.u32.totalorder %s3317_s6, %s3952_s25 }
 0x143   : > { %p3321_p7 = pneg %p3320_p6  ;;  %p3325_p8 = por %p3324_p4, %p3323_p3 }
 0x145   : > { %p3327_p12 = por %p3326_p10, %p3325_p8 }
 0x147   : > { %p3328_p13 = pnand %p3327_p12, %p3321_p7 }
 0x149   : > { %3331 = shalt.err (!%p3328_p13)
}
 0x14a   : > { %s3332_s11 = scalar_lea.vmem %s3960_s26, 64  ;;  %s3506_s10 = smov [#allocation7]  }
 0x14b   : > { %p3333_p1 = scmp.ne.s32.totalorder %s3960_s26, %s3332_s11  ;;  %s3337_s1 = sshll.u32 %s3506_s10, 4  ;;  %s3338_s1 = int_to_ptr.vmem [resolvable:$false] %s3337_s1 }
 0x14c   : > { %s3339_s20 = scalar_lea.vmem %s3338_s1, 128  ;;  %p3340_p9 = scmp.lt.s32.totalorder %s3960_s26, %s3338_s1 }
 0x14d   : > { %p3335_p5 = pnand %p3333_p1, %p3319_p0  ;;  %p3341_p3 = scmp.lt.s32.totalorder %s3339_s20, %s3332_s11 }
 0x14f   : > { %p3336_p6 = pneg %p3335_p5  ;;  %p3342_p4 = por %p3341_p3, %p3340_p9 }
 0x151   : > { %p3343_p8 = pnand %p3342_p4, %p3336_p6 }
 0x153   : > { %3346 = shalt.err (!%p3343_p8)
}
 0x154   : > { %2854 = dma.hbm_to_vmem [thread:$0]  (!%p3956_p11), %s3952_s25, 64, %s3960_s26, %s433_s5  }
 0x155   : > { %s4364_s30 = sld [smem:[#allocation35_spill]] }
 0x15b   : > { %p4365_p7 = scmp.ne.s32.totalorder %s4364_s30, 0 }
 0x15c   : > { %s3990_s6 = sand.u32 (!%p4365_p7), 1, %s3469_s17  }
 0x15d   : > { %452 = sbr.rel (%p4365_p7) target bundleno = 2306 (0x902), region = 60  ;;  %s2560_s7 = sshll.u32 (!%p4365_p7), %s3990_s6, 3 }
 0x15e   : > { %s455_s8 = scalar_lea.sflag (!%p4365_p7), [#allocation5], %s3990_s6  ;;  %s3994_s9 = scalar_lea.vmem (!%p4365_p7), [#allocation4], %s2560_s7 }
 0x164   : > { %3420 = dma.done.wait (%p3857_p2), %s455_s8, 128  }
 0x165   : > { %3422 = vsyncadd (%p3857_p2), %s455_s8, 4294967168  ;;  %s4366_s25 = sld [smem:[#allocation31_spill]]  ;;  %s463_s26 = sand.u32 1, %s3635_s24  }
 0x166   : > { %s464_s15 = scalar_lea.sflag [#allocation8], %s463_s26  ;;  %p4367_p9 = scmp.ne.s32.totalorder %s4360_s0, 0 }
 0x16b   : > { %s465_s3 = sand.u32 1, %s4366_s25  }
 0x16c   : > { %s4002_s5 = sshll.u32 %s465_s3, 2 }
 0x16d   : > { %s467_s19 = scalar_lea.vmem [#allocation7], %s4002_s5 }
 0x16e   : > { %3424 = dma.done.wait (%p4367_p9), %s464_s15, 64  }
 0x16f   : > { %3426 = vsyncadd (%p4367_p9), %s464_s15, 4294967232  ;;  %p4368_p11 = scmp.eq.s32.totalorder %s3635_s24, 0 }
 0x171   : > { %3428 = dma.done.wait (%p4368_p11), [#allocation8], 1024   ;;  %p4369_p2 = pmov %p4368_p11 }
 0x173   : > { %3430 = vsyncadd (%p4369_p2), [#allocation8], 4294966272  ;;  %p4370_p0 = pmov %p4369_p2 }
 0x175   : > { %3432 = dma.done.wait (%p4370_p0), [#allocation11], 528   ;;  %p4371_p10 = pmov %p4370_p0 }
 0x176   : > { %p4372_p12 = pmov %p4370_p0 }
 0x177   : > { %3434 = vsyncadd (%p4371_p10), [#allocation11], 4294966768 }
 0x178   : > { %3436 = dma.done.wait (%p4372_p12), [#allocation14], 528   ;;  %p4373_p13 = pmov %p4370_p0 }
 0x179   : > { %p4374_p1 = pmov %p4370_p0 }
 0x17a   : > { %3438 = vsyncadd (%p4373_p13), [#allocation14], 4294966768 }
 0x17b   : > { %3440 = dma.done.wait (%p4374_p1), [#allocation17], 1040   ;;  %p4375_p5 = pmov %p4370_p0 }
 0x17c   : > { %p4376_p6 = pmov %p4370_p0 }
 0x17d   : > { %3442 = vsyncadd (%p4375_p5), [#allocation17], 4294966256 }
 0x17e   : > { %3444 = dma.done.wait (%p4376_p6), [#allocation20], 16   ;;  %p4377_p3 = pmov %p4370_p0 }
 0x17f   : > { %s2570_s27 = sshll.u32 %s3990_s6, 4  ;;  %s4378_s11 = sld [smem:[#allocation33_spill]] }
 0x180   : > { %3446 = vsyncadd (%p4377_p3), [#allocation20], 4294967280  ;;  %s4030_s0 = scalar_lea.vmem [#allocation21], %s2570_s27 }
 0x185   : > { %p2571_p4 = scmp.ne.s32.totalorder %s4378_s11, 0 }
 0x186   : > { %v2991_v0 = vld [vmem:[#allocation12] sm:$0xff] (!%p2571_p4)   ;;  %v3507_v1 = vmov (!%p2571_p4), 0.0   ;;  %v2993_v3 = vld [vmem:[#allocation12 + $0x8] sm:$0xff] (!%p2571_p4)   ;;  %vm3508_vm0 = vmmov (!%p2571_p4), 0   ;;  %v2995_v5 = vld [vmem:[#allocation12 + $0x10] sm:$0xff] (!%p2571_p4)   ;;  %vm588_vm1 = vcmask (!%p2571_p4), 523264   ;;  %v726_v24 = vlaneseq (!%p2571_p4) }
 0x187   : > { %547 = sbr.rel (%p2571_p4) target bundleno = 767 (0x2ff), region = 104  ;;  %2673 = vmatprep.subr.bf16.mxu0 (!%p2571_p4), %v3507_v1  ;;  %2685 = vmatprep.subr.bf16.mxu1 (!%p2571_p4), %v3507_v1  ;;  %v2992_v2 = vld [vmem:[#allocation15] sm:$0xff] (!%p2571_p4)   ;;  %v2994_v4 = vld [vmem:[#allocation15 + $0x8] sm:$0xff] (!%p2571_p4)   ;;  %v2996_v6 = vld [vmem:[#allocation15 + $0x10] sm:$0xff] (!%p2571_p4)   ;;  %s3509_s24 = smov (!%p2571_p4), 32   ;;  %vm861_vm2 = vcmask (!%p2571_p4), 257024  }
 0x188   : > { %2674 = vmatpush3.bf16.msra.mxu0 (!%p2571_p4), %v2991_v0  ;;  %2681 = vmatprep.mubr.msk.bf16.mxu0 (!%p2571_p4), %vm3508_vm0, %v3507_v1  ;;  %v2997_v7 = vld [vmem:[#allocation12 + $0x18] sm:$0xff] (!%p2571_p4)   ;;  %v2572_v10 = vld [vmem:[#allocation13] ss:$0 sm:$0xff] (!%p2571_p4)  ;;  %v2578_v12 = vld [vmem:[#allocation16] ss:$0 sm:$0xff] (!%p2571_p4)  ;;  %s3510_s10 = smov (!%p2571_p4), 96  }
 0x189   : > { %2686 = vmatpush3.bf16.msra.mxu1 (!%p2571_p4), %v2992_v2  ;;  %2675 = vmatprep.subr.bf16.mxu0 (!%p2571_p4), %v3507_v1  ;;  %v2998_v8 = vld [vmem:[#allocation15 + $0x18] sm:$0xff] (!%p2571_p4)   ;;  %s3511_s1 = smov (!%p2571_p4), 64   ;;  %v3512_v22 = vmov (!%p2571_p4), 1983009808   ;;  %v3513_v25 = vmov (!%p2571_p4), 1934713408  }
 0x18a   : > { %2687 = vmatprep.subr.bf16.mxu1 (!%p2571_p4), %v3507_v1  ;;  %2693 = vmatprep.mubr.msk.bf16.mxu1 (!%p2571_p4), %vm3508_vm0, %v3507_v1  ;;  %v548_v9 = vld [vmem:[%s467_s19] sm:$0xf] (!%p2571_p4)  ;;  %v724_v23 = vunpack.c.l.s4 (!%p2571_p4), %v3512_v22  ;;  %v756_v26 = vunpack.c.l.s4 (!%p2571_p4), %v3513_v25  ;;  %v727_v28 = vshrl.u32 (!%p2571_p4), %v726_v24, 7 }
 0x18c   : > { %2676 = vmatpush3.bf16.msra.mxu0 (!%p2571_p4), %v2993_v3  ;;  %v725_v27 = vunpack.c.0.s8 (!%p2571_p4), %v724_v23  ;;  %v757_v31 = vunpack.c.0.s8 (!%p2571_p4), %v756_v26 }
 0x18d   : > { %2688 = vmatpush3.bf16.msra.mxu1 (!%p2571_p4), %v2994_v4  ;;  %2677 = vmatprep.subr.bf16.mxu0 (!%p2571_p4), %v3507_v1 }
 0x18e   : > { %2689 = vmatprep.subr.bf16.mxu1 %v3507_v1  ;;  %v728_v32 = vsub.s32 %v725_v27, %v727_v28  ;;  %v4035_v39 = vsub.s32 %v757_v31, %v727_v28 }
 0x190   : > { %2678 = vmatpush3.bf16.msra.mxu0 %v2995_v5 }
 0x191   : > { %2690 = vmatpush3.bf16.msra.mxu1 %v2996_v6  ;;  %2679 = vmatprep.subr.bf16.mxu0 %v3507_v1 }
 0x192   : > { %2691 = vmatprep.subr.bf16.mxu1 %v3507_v1 }
 0x194   : > { %2680 = vmatpush3.bf16.msra.mxu0 %v2997_v7 }
 0x195   : > { %2692 = vmatpush3.bf16.msra.mxu1 %v2998_v8 }
 0x197   : > { %2682 = vmatmul.mubr.msk.bf16.vlgmr.msra.gmra.mrb[0].mxu0 %vm588_vm1, %v548_v9 }
 0x198   : > { %2694 = vmatmul.mubr.msk.bf16.vlgmr.msra.gmra.mrb[0].mxu1 %vm588_vm1, %v548_v9 }
 0x26a   : > { %v626_v11 = vpop.f32.mrb[0].mxu0 }
 0x26b   : > { %v627_v13 = vadd.f32 %v2572_v10, %v626_v11  ;;  %v2683_v14 = vpop.f32.mrb[1].mxu0  ;;  %v705_v15 = vpop.f32.mrb[0].mxu1 }
 0x26c   : > { %v629_v16 = vpop.f32.mrb[2].mxu0  ;;  %v2695_v17 = vpop.f32.mrb[1].mxu1  ;;  %v706_v18 = vadd.f32 %v2578_v12, %v705_v15 }
 0x26d   : > { %v708_v19 = vpop.f32.mrb[2].mxu1  ;;  %718 = vrot.lane.b32.xlu1 %v627_v13, %s3509_s24  ;;  %712 = vrot.lane.b32.xlu0 %v627_v13, %s3510_s10  ;;  %v2684_v20 = vpop.f32.mrb[3].mxu0 }
 0x26e   : > { %v2696_v21 = vpop.f32.mrb[3].mxu1 }
 0x271   : > { %867 = vrot.lane.b32.xlu1 %v706_v18, %s3510_s10  ;;  %715 = vrot.lane.b32.xlu0 %v627_v13, %s3511_s1 }
 0x275   : > { %873 = vrot.lane.b32.xlu1 %v706_v18, %s3509_s24  ;;  %870 = vrot.lane.b32.xlu0 %v706_v18, %s3511_s1 }
 0x2df   : > { %v719_v29 = vpop.permute.xlu1 %718  ;;  %v713_v30 = vpop.permute.xlu0 %712 }
 0x2e0   : > { %v737_v33 = vcombine.low %v713_v30, %v719_v29  ;;  %v738_v34 = vcombine.high %v713_v30, %v719_v29 }
 0x2e2   : > { %v745_v40 = vrot.slane %v737_v33, %v728_v32  ;;  %v752_v41 = vrot.slane %v738_v34, %v728_v32 }
 0x2e3   : > { %v868_v35 = vpop.permute.xlu1 %867  ;;  %v716_v36 = vpop.permute.xlu0 %715 }
 0x2e4   : > { %v721_v37 = vcombine.low %v627_v13, %v716_v36  ;;  %v722_v38 = vcombine.high %v627_v13, %v716_v36 }
 0x2e6   : > { %v729_v42 = vrot.slane %v721_v37, %v728_v32  ;;  %v736_v43 = vrot.slane %v722_v38, %v728_v32 }
 0x2e7   : > { %v874_v44 = vpop.permute.xlu1 %873  ;;  %v871_v45 = vpop.permute.xlu0 %870 }
 0x2e8   : > { %v753_v46 = vcombine.low %v729_v42, %v745_v40  ;;  %v754_v47 = vcombine.high %v729_v42, %v745_v40  ;;  %v769_v48 = vcombine.low %v736_v43, %v752_v41  ;;  %v770_v49 = vcombine.high %v736_v43, %v752_v41 }
 0x2e9   : > { %v892_v50 = vcombine.low %v868_v35, %v874_v44  ;;  %v893_v51 = vcombine.high %v868_v35, %v874_v44  ;;  %v876_v52 = vcombine.low %v706_v18, %v871_v45  ;;  %v877_v53 = vcombine.high %v706_v18, %v871_v45 }
 0x2ea   : > { %v761_v54 = vrot.slane %v753_v46, %v4035_v39  ;;  %v768_v55 = vrot.slane %v754_v47, %v4035_v39  ;;  %v777_v56 = vrot.slane %v769_v48, %v4035_v39  ;;  %v784_v57 = vrot.slane %v770_v49, %v4035_v39 }
 0x2eb   : > { %v900_v58 = vrot.slane %v892_v50, %v728_v32  ;;  %v907_v59 = vrot.slane %v893_v51, %v728_v32  ;;  %v884_v60 = vrot.slane %v876_v52, %v728_v32  ;;  %v891_v61 = vrot.slane %v877_v53, %v728_v32 }
 0x2ec   : > { %v789_v62 = vcombine.low %v761_v54, %v768_v55  ;;  %v2584_v63 = vcombine.high %v761_v54, %v768_v55  ;;  %v805_v0 = vcombine.low %v777_v56, %v784_v57  ;;  %v2585_v1 = vcombine.high %v777_v56, %v784_v57 }
 0x2ed   : > { %v908_v2 = vcombine.low %v884_v60, %v900_v58  ;;  %v909_v3 = vcombine.high %v884_v60, %v900_v58  ;;  %v924_v4 = vcombine.low %v891_v61, %v907_v59  ;;  %v925_v5 = vcombine.high %v891_v61, %v907_v59 }
 0x2ee   : > { %v796_v6 = vrot.slane %v789_v62, %v728_v32  ;;  %v804_v7 = vrot.slane %v2584_v63, %v728_v32  ;;  %v812_v8 = vrot.slane %v805_v0, %v728_v32  ;;  %v820_v9 = vrot.slane %v2585_v1, %v728_v32 }
 0x2ef   : > { %v916_v10 = vrot.slane %v908_v2, %v4035_v39  ;;  %v923_v11 = vrot.slane %v909_v3, %v4035_v39  ;;  %v932_v12 = vrot.slane %v924_v4, %v4035_v39  ;;  %v939_v13 = vrot.slane %v925_v5, %v4035_v39 }
 0x2f0   : > { %v821_v14 = vcombine.low %v796_v6, %v804_v7  ;;  %v822_v15 = vcombine.high %v796_v6, %v804_v7  ;;  %v837_v16 = vcombine.low %v812_v8, %v820_v9  ;;  %v838_v17 = vcombine.high %v812_v8, %v820_v9 }
 0x2f1   : > { %v944_v18 = vcombine.low %v916_v10, %v923_v11  ;;  %v2586_v19 = vcombine.high %v916_v10, %v923_v11  ;;  %v960_v20 = vcombine.low %v932_v12, %v939_v13  ;;  %v2587_v21 = vcombine.high %v932_v12, %v939_v13 }
 0x2f2   : > { %v829_v22 = vrot.slane %v821_v14, %v4035_v39  ;;  %v836_v23 = vrot.slane %v822_v15, %v4035_v39  ;;  %v845_v24 = vrot.slane %v837_v16, %v4035_v39  ;;  %v852_v25 = vrot.slane %v838_v17, %v4035_v39 }
 0x2f3   : > { %v951_v26 = vrot.slane %v944_v18, %v728_v32  ;;  %v959_v27 = vrot.slane %v2586_v19, %v728_v32  ;;  %v967_v28 = vrot.slane %v960_v20, %v728_v32  ;;  %v975_v29 = vrot.slane %v2587_v21, %v728_v32 }
 0x2f4   : > { %v853_v30 = vcombine.low %v829_v22, %v845_v24  ;;  %v854_v31 = vcombine.high %v829_v22, %v845_v24  ;;  %v855_v33 = vcombine.low %v836_v23, %v852_v25  ;;  %v856_v34 = vcombine.high %v836_v23, %v852_v25 }
 0x2f5   : > { %v976_v35 = vcombine.low %v951_v26, %v959_v27  ;;  %v977_v36 = vcombine.high %v951_v26, %v959_v27  ;;  %v992_v37 = vcombine.low %v967_v28, %v975_v29  ;;  %v993_v38 = vcombine.high %v967_v28, %v975_v29 }
 0x2f6   : > { %v857_v40 = vpack.c.bf16 %v853_v30, %v853_v30  ;;  %v858_v41 = vpack.c.bf16 %v854_v31, %v854_v31  ;;  %v859_v42 = vpack.c.bf16 %v855_v33, %v855_v33  ;;  %v860_v43 = vpack.c.bf16 %v856_v34, %v856_v34 }
 0x2f7   : > { %v984_v44 = vrot.slane %v976_v35, %v4035_v39  ;;  %v991_v45 = vrot.slane %v977_v36, %v4035_v39  ;;  %v1000_v46 = vrot.slane %v992_v37, %v4035_v39  ;;  %v1007_v32 = vrot.slane %v993_v38, %v4035_v39 }
 0x2f8   : > { %862 = vst.msk [vmem:[#allocation2] sm:$0xf] %vm861_vm2, %v857_v40  ;;  %863 = vst.msk [vmem:[#allocation2 + $0x4] sm:$0xf] %vm861_vm2, %v858_v41 }
 0x2f9   : > { %864 = vst.msk [vmem:[#allocation2 + $0x8] sm:$0xf] %vm861_vm2, %v859_v42  ;;  %865 = vst.msk [vmem:[#allocation2 + $0xc] sm:$0xf] %vm861_vm2, %v860_v43  ;;  %v1008_v47 = vcombine.low %v984_v44, %v1000_v46  ;;  %v1009_v48 = vcombine.high %v984_v44, %v1000_v46  ;;  %v1010_v49 = vcombine.low %v991_v45, %v1007_v32 }
 0x2fa   : > { %v1011_v50 = vcombine.high %v991_v45, %v1007_v32 }
 0x2fb   : > { %v1012_v51 = vpack.c.bf16 %v1008_v47, %v1008_v47  ;;  %v1013_v52 = vpack.c.bf16 %v1009_v48, %v1009_v48  ;;  %v1014_v53 = vpack.c.bf16 %v1010_v49, %v1010_v49 }
 0x2fc   : > { %v1015_v54 = vpack.c.bf16 %v1011_v50, %v1011_v50 }
 0x2fd   : > { %1016 = vst.msk [vmem:[#allocation3] sm:$0xf] %vm861_vm2, %v1012_v51  ;;  %1017 = vst.msk [vmem:[#allocation3 + $0x4] sm:$0xf] %vm861_vm2, %v1013_v52 }
 0x2fe   : > { %1018 = vst.msk [vmem:[#allocation3 + $0x8] sm:$0xf] %vm861_vm2, %v1014_v53  ;;  %1019 = vst.msk [vmem:[#allocation3 + $0xc] sm:$0xf] %vm861_vm2, %v1015_v54 }
 0x2ff PF: > { %v3014_v39 = vld [vmem:[#allocation9] sm:$0xff]   ;;  %v3514_v55 = vmov 0.0   ;;  %v3015_v56 = vld [vmem:[#allocation9 + $0x8] sm:$0xff]   ;;  %vm3515_vm3 = vmmov 0   ;;  %v3016_v57 = vld [vmem:[#allocation9 + $0x10] sm:$0xff]   ;;  %s3516_s20 = smov 64   ;;  %v1167_v13 = vlaneseq }
 0x300   : > { %2697 = vmatprep.subr.bf16.mxu0 %v3514_v55  ;;  %2717 = vmatprep.subr.bf16.mxu1 %v3514_v55  ;;  %v3017_v58 = vld [vmem:[#allocation9 + $0x18] sm:$0xff]   ;;  %v3018_v59 = vld [vmem:[#allocation9 + $0x20] sm:$0xff]   ;;  %v3019_v60 = vld [vmem:[#allocation9 + $0x28] sm:$0xff]   ;;  %s3517_s30 = smov 96   ;;  %vm1446_vm4 = vcmask 261120   ;;  %s3518_s7 = smov 32  }
 0x301   : > { %2698 = vmatpush3.bf16.msra.mxu0 %v3014_v39  ;;  %2713 = vmatprep.mubr.msk.bf16.mxu0 %vm3515_vm3, %v3514_v55  ;;  %v3020_v61 = vld [vmem:[#allocation9 + $0x30] sm:$0xff]   ;;  %v3021_v62 = vld [vmem:[#allocation9 + $0x38] sm:$0xff]   ;;  %v2588_v0 = vld [vmem:[#allocation10] ss:$0 sm:$0xff]  ;;  %v3519_v11 = vmov 1983009808  }
 0x302   : > { %2699 = vmatprep.subr.bf16.mxu0 %v3514_v55  ;;  %2719 = vmatprep.mubr.msk.bf16.mxu1 %vm3515_vm3, %v3514_v55  ;;  %v3022_v63 = vld [vmem:[%s3994_s9] sm:$0xff]   ;;  %v1165_v12 = vunpack.c.l.s4 %v3519_v11  ;;  %v3520_v16 = vmov 1934713408   ;;  %v1168_v19 = vshrl.u32 %v1167_v13, 7  ;;  %vm1635_vm5 = vcmask 64512   ;;  %s4379_s8 = sld [smem:[#allocation33_spill]] }
 0x303   : > { %v1438_v9 = vld [vmem:[#allocation2] sm:$0xf]  ;;  %v1197_v17 = vunpack.c.l.s4 %v3520_v16  ;;  %vm1731_vm6 = vcmask 1043456   ;;  %s4380_s9 = sld [smem:[#allocation34_spill]]  ;;  %vm2215_vm7 = vcmask 523264   ;;  %vm2218_vm8 = vcmask 785408  }
 0x304   : > { %v1451_v10 = vsel %vm1446_vm4, %v1438_v9, 0  ;;  %v1166_v18 = vunpack.c.0.s8 %v1165_v12  ;;  %s2352_s15 = sshll.u32 %s4030_s0, 4  ;;  %s4381_s11 = sld [smem:[#allocation46_spill]]  ;;  %s4225_s15 = int_to_ptr.vmem [resolvable:$true] %s2352_s15 }
 0x305   : > { %2700 = vmatpush3.bf16.msra.mxu0 %v3015_v56  ;;  %2718 = vmatpush3.bf16.xpose.msra.mxu1 %v1451_v10  ;;  %v1198_v24 = vunpack.c.0.s8 %v1197_v17  ;;  %s2337_s10 = scalar_lea.sflag [#allocation6], %s3990_s6  ;;  %s3347_s1 = scalar_lea.vmem %s4225_s15, 256 }
 0x306   : > { %2701 = vmatprep.subr.bf16.mxu0 %v3514_v55  ;;  %2723 = vmatprep.subr.bf16.mxu1 %v3514_v55  ;;  %v4086_v25 = vsub.s32 %v1166_v18, %v1168_v19  ;;  %p3348_p8 = scmp.ne.s32.totalorder %s4225_s15, %s3347_s1  ;;  %p4382_p7 = scmp.ne.s32.totalorder %s4349_s13, 0 }
 0x307   : > { %v4090_v37 = vsub.s32 %v1198_v24, %v1168_v19 }
 0x308   : > { %s2624_s25 = sshll.u32 %s4379_s8, 1  ;;  %p3349_p9 = pnand %p3348_p8, %p4382_p7 }
 0x309   : > { %2702 = vmatpush3.bf16.msra.mxu0 %v3016_v57  ;;  %s2625_s26 = sshll.u32 %s4380_s9, 2 }
 0x30a   : > { %2703 = vmatprep.subr.bf16.mxu0 %v3514_v55  ;;  %s2349_s3 = sadd.s32 %s2625_s26, %s2624_s25  ;;  %p3350_p11 = pneg %p3349_p9 }
 0x30b   : > { %s2626_s5 = sshll.u32 %s2349_s3, 7 }
 0x30c   : > { %s4223_s24 = scalar_lea.hbm %s4381_s11, %s2626_s5 }
 0x30d   : > { %2704 = vmatpush3.bf16.msra.mxu0 %v3017_v58 }
 0x30e   : > { %2705 = vmatprep.subr.bf16.mxu0 %v3514_v55 }
 0x311   : > { %2706 = vmatpush3.bf16.msra.mxu0 %v3018_v59 }
 0x312   : > { %2707 = vmatprep.subr.bf16.mxu0 %v3514_v55 }
 0x315   : > { %2708 = vmatpush3.bf16.msra.mxu0 %v3019_v60 }
 0x316   : > { %2709 = vmatprep.subr.bf16.mxu0 %v3514_v55 }
 0x319   : > { %2710 = vmatpush3.bf16.msra.mxu0 %v3020_v61 }
 0x31a   : > { %2711 = vmatprep.subr.bf16.mxu0 %v3514_v55 }
 0x31d   : > { %2712 = vmatpush3.bf16.msra.mxu0 %v3021_v62 }
 0x31e   : > { %2765 = vmatprep.subr.bf16.mxu0 %v3514_v55 }
 0x320   : > { %2714 = vmatmul.mubr.bf16.vlgmr.msra.gmra.mrb[0].mxu0 %v3022_v63 }
 0x321   : > { %2781 = vmatprep.mubr.msk.bf16.mxu0 %vm3515_vm3, %v3514_v55 }
 0x3f3   : > { %v1133_v1 = vpop.f32.mrb[0].mxu0 }
 0x3f4   : > { %v1134_v2 = vadd.f32 %v2588_v0, %v1133_v1  ;;  %v2715_v3 = vpop.f32.mrb[1].mxu0 }
 0x3f5   : > { %v1136_v4 = vpop.f32.mrb[2].mxu0 }
 0x3f6   : > { %v1140_v5 = vmul.f32 0.17677669, %v1134_v2  ;;  %v1137_v6 = vadd.f32 %v2588_v0, %v1136_v4  ;;  %v2716_v7 = vpop.f32.mrb[3].mxu0 }
 0x3f8   : > { %1150 = vrot.lane.b32.xlu1 %v1140_v5, %s3516_s20  ;;  %1144 = vrot.lane.b32.xlu0 %v1140_v5, %s3517_s30  ;;  %v1141_v8 = vmul.f32 0.17677669, %v1137_v6 }
 0x3fc   : > { %1152 = vrot.lane.b32.xlu1 %v1141_v8, %s3516_s20  ;;  %1146 = vrot.lane.b32.xlu0 %v1141_v8, %s3517_s30 }
 0x400   : > { %1158 = vrot.lane.b32.xlu1 %v1141_v8, %s3518_s7  ;;  %1156 = vrot.lane.b32.xlu0 %v1140_v5, %s3518_s7 }
 0x46a   : > { %v1151_v14 = vpop.permute.xlu1 %1150  ;;  %v1145_v15 = vpop.permute.xlu0 %1144 }
 0x46b   : > { %v1162_v26 = vcombine.low %v1140_v5, %v1151_v14  ;;  %v1163_v27 = vcombine.high %v1140_v5, %v1151_v14 }
 0x46d   : > { %v1170_v43 = vrot.slane %v1162_v26, %v4086_v25  ;;  %v1177_v44 = vrot.slane %v1163_v27, %v4086_v25 }
 0x46e   : > { %v1153_v20 = vpop.permute.xlu1 %1152  ;;  %v1147_v21 = vpop.permute.xlu0 %1146 }
 0x46f   : > { %v1230_v22 = vcombine.low %v1141_v8, %v1153_v20  ;;  %v1231_v23 = vcombine.high %v1141_v8, %v1153_v20 }
 0x471   : > { %v1238_v35 = vrot.slane %v1230_v22, %v4086_v25  ;;  %v1245_v36 = vrot.slane %v1231_v23, %v4086_v25 }
 0x472   : > { %v1159_v28 = vpop.permute.xlu1 %1158  ;;  %v1157_v29 = vpop.permute.xlu0 %1156 }
 0x473   : > { %v1246_v30 = vcombine.low %v1147_v21, %v1159_v28  ;;  %v1247_v31 = vcombine.high %v1147_v21, %v1159_v28  ;;  %v1178_v33 = vcombine.low %v1145_v15, %v1157_v29  ;;  %v1179_v34 = vcombine.high %v1145_v15, %v1157_v29  ;;  %v1439_v21 = vld [vmem:[#allocation2 + $0x4] sm:$0xf] }
 0x474   : > { %v1498_v24 = vsel %vm1446_vm4, %v1439_v21, 0 }
 0x475   : > { %v1254_v38 = vrot.slane %v1246_v30, %v4086_v25  ;;  %v1261_v40 = vrot.slane %v1247_v31, %v4086_v25  ;;  %v1186_v41 = vrot.slane %v1178_v33, %v4086_v25  ;;  %v1193_v42 = vrot.slane %v1179_v34, %v4086_v25  ;;  %v1440_v33 = vld [vmem:[#allocation2 + $0x8] sm:$0xf] }
 0x477   : > { %v1262_v45 = vcombine.low %v1238_v35, %v1254_v38  ;;  %v1263_v46 = vcombine.high %v1238_v35, %v1254_v38  ;;  %v1278_v32 = vcombine.low %v1245_v36, %v1261_v40  ;;  %v1279_v47 = vcombine.high %v1245_v36, %v1261_v40 }
 0x478   : > { %v1194_v48 = vcombine.low %v1170_v43, %v1186_v41  ;;  %v1195_v49 = vcombine.high %v1170_v43, %v1186_v41  ;;  %v1210_v50 = vcombine.low %v1177_v44, %v1193_v42  ;;  %v1211_v51 = vcombine.high %v1177_v44, %v1193_v42  ;;  %v1441_v44 = vld [vmem:[#allocation2 + $0xc] sm:$0xf] }
 0x479   : > { %v1270_v52 = vrot.slane %v1262_v45, %v4090_v37  ;;  %v1277_v53 = vrot.slane %v1263_v46, %v4090_v37  ;;  %v1286_v54 = vrot.slane %v1278_v32, %v4090_v37  ;;  %v1293_v39 = vrot.slane %v1279_v47, %v4090_v37 }
 0x47a   : > { %v1202_v56 = vrot.slane %v1194_v48, %v4090_v37  ;;  %v1209_v57 = vrot.slane %v1195_v49, %v4090_v37  ;;  %v1218_v58 = vrot.slane %v1210_v50, %v4090_v37  ;;  %v1225_v59 = vrot.slane %v1211_v51, %v4090_v37 }
 0x47b   : > { %v1366_v60 = vcombine.low %v1270_v52, %v1277_v53  ;;  %v2600_v61 = vcombine.high %v1270_v52, %v1277_v53  ;;  %v1382_v62 = vcombine.low %v1286_v54, %v1293_v39  ;;  %v2601_v63 = vcombine.high %v1286_v54, %v1293_v39 }
 0x47c   : > { %v1298_v0 = vcombine.low %v1202_v56, %v1209_v57  ;;  %v2598_v1 = vcombine.high %v1202_v56, %v1209_v57  ;;  %v1314_v2 = vcombine.low %v1218_v58, %v1225_v59  ;;  %v2599_v3 = vcombine.high %v1218_v58, %v1225_v59 }
 0x47d   : > { %v1373_v4 = vrot.slane %v1366_v60, %v4086_v25  ;;  %v1381_v5 = vrot.slane %v2600_v61, %v4086_v25  ;;  %v1389_v6 = vrot.slane %v1382_v62, %v4086_v25  ;;  %v1397_v7 = vrot.slane %v2601_v63, %v4086_v25 }
 0x47e   : > { %v1305_v8 = vrot.slane %v1298_v0, %v4086_v25  ;;  %v1313_v9 = vrot.slane %v2598_v1, %v4086_v25  ;;  %v1321_v10 = vrot.slane %v1314_v2, %v4086_v25  ;;  %v1329_v11 = vrot.slane %v2599_v3, %v4086_v25 }
 0x47f   : > { %v1398_v12 = vcombine.low %v1373_v4, %v1381_v5  ;;  %v1414_v13 = vcombine.low %v1389_v6, %v1397_v7  ;;  %v1399_v26 = vcombine.high %v1373_v4, %v1381_v5  ;;  %v1415_v27 = vcombine.high %v1389_v6, %v1397_v7 }
 0x480   : > { %v1330_v14 = vcombine.low %v1305_v8, %v1313_v9  ;;  %v1346_v15 = vcombine.low %v1321_v10, %v1329_v11  ;;  %v1331_v28 = vcombine.high %v1305_v8, %v1313_v9  ;;  %v1347_v29 = vcombine.high %v1321_v10, %v1329_v11 }
 0x481   : > { %v1406_v16 = vrot.slane %v1398_v12, %v4090_v37  ;;  %v1422_v17 = vrot.slane %v1414_v13, %v4090_v37  ;;  %v1413_v34 = vrot.slane %v1399_v26, %v4090_v37  ;;  %v1545_v35 = vsel %vm1446_vm4, %v1440_v33, 0 }
 0x482   : > { %v1338_v18 = vrot.slane %v1330_v14, %v4090_v37  ;;  %v1354_v19 = vrot.slane %v1346_v15, %v4090_v37  ;;  %v1429_v36 = vrot.slane %v1415_v27, %v4090_v37  ;;  %v1345_v38 = vrot.slane %v1331_v28, %v4090_v37 }
 0x483   : > { %v1430_v20 = vcombine.low %v1406_v16, %v1422_v17  ;;  %v1431_v31 = vcombine.high %v1406_v16, %v1422_v17  ;;  %v1361_v40 = vrot.slane %v1347_v29, %v4090_v37  ;;  %v1592_v46 = vsel %vm1446_vm4, %v1441_v44, 0 }
 0x484   : > { %v1362_v22 = vcombine.low %v1338_v18, %v1354_v19  ;;  %v1363_v30 = vcombine.high %v1338_v18, %v1354_v19  ;;  %v1432_v43 = vcombine.low %v1413_v34, %v1429_v36  ;;  %v1433_v47 = vcombine.high %v1413_v34, %v1429_v36 }
 0x485   : > { %v1364_v42 = vcombine.low %v1345_v38, %v1361_v40  ;;  %v1365_v32 = vcombine.high %v1345_v38, %v1361_v40 }
 0x486   : > { %v1434_v23 = vpack.c.bf16 %v1430_v20, %v1362_v22  ;;  %v1435_v41 = vpack.c.bf16 %v1431_v31, %v1363_v30 }
 0x487   : > { %v1436_v45 = vpack.c.bf16 %v1432_v43, %v1364_v42  ;;  %v1437_v48 = vpack.c.bf16 %v1433_v47, %v1365_v32 }
 0x488   : > { %2720 = vmatmul.mubr.msk.bf16.vlgmr.msra.gmra.mrb[0].mxu1 %vm1446_vm4, %v1434_v23 }
 0x489   : > { %2724 = vmatpush3.bf16.xpose.msra.mxu1 %v1498_v24  ;;  %2725 = vmatprep.mubr.msk.bf16.mxu1 %vm3515_vm3, %v3514_v55 }
 0x48a   : > { %2729 = vmatprep.subr.bf16.mxu1 %v3514_v55 }
 0x490   : > { %2726 = vmatmul.mubr.msk.bf16.vlgmr.msra.gmra.mrb[4].mxu1 %vm1446_vm4, %v1435_v41 }
 0x491   : > { %2730 = vmatpush3.bf16.xpose.msra.mxu1 %v1545_v35  ;;  %2731 = vmatprep.mubr.msk.bf16.mxu1 %vm3515_vm3, %v3514_v55 }
 0x492   : > { %2735 = vmatprep.subr.bf16.mxu1 %v3514_v55 }
 0x498   : > { %2732 = vmatmul.mubr.msk.bf16.vlgmr.msra.gmra.mrb[8].mxu1 %vm1446_vm4, %v1436_v45 }
 0x499   : > { %2736 = vmatpush3.bf16.xpose.msra.mxu1 %v1592_v46  ;;  %2737 = vmatprep.mubr.msk.bf16.mxu1 %vm3515_vm3, %v3514_v55 }
 0x49a   : > { %2741 = vmatprep.subr.bf16.mxu1 %v3514_v55 }
 0x4a0   : > { %2738 = vmatmul.mubr.msk.bf16.vlgmr.msra.gmra.mrb[12].mxu1 %vm1446_vm4, %v1437_v48 }
 0x4a1   : > { %2743 = vmatprep.mubr.msk.bf16.mxu1 %vm3515_vm3, %v3514_v55 }
 0x55b   : > { %v1487_v49 = vpop.f32.mrb[0].mxu1 }
 0x55c   : > { %v2721_v50 = vpop.f32.mrb[1].mxu1  ;;  %v1636_v51 = vsel %vm1635_vm5, %v1487_v49, -inf }
 0x55d   : > { %1637 = vmax.xlane.f32.xlu0 %v1636_v51  ;;  %v1490_v52 = vpop.f32.mrb[2].mxu1 }
 0x55e   : > { %v2722_v53 = vpop.f32.mrb[3].mxu1  ;;  %v1639_v54 = vsel %vm1635_vm5, %v1490_v52, -inf }
 0x55f   : > { %1640 = vmax.xlane.f32.xlu1 %v1639_v54 }
 0x563   : > { %v1534_v39 = vpop.f32.mrb[4].mxu1 }
 0x564   : > { %v2727_v56 = vpop.f32.mrb[5].mxu1  ;;  %v1642_v57 = vsel %vm1635_vm5, %v1534_v39, -inf }
 0x565   : > { %1643 = vmax.xlane.f32.xlu0 %v1642_v57  ;;  %v1537_v58 = vpop.f32.mrb[6].mxu1 }
 0x566   : > { %v2728_v59 = vpop.f32.mrb[7].mxu1  ;;  %v1645_v60 = vsel %vm1635_vm5, %v1537_v58, -inf }
 0x569   : > { %1646 = vmax.xlane.f32.xlu0 %v1645_v60  ;;  %v1443_v60 = vld [vmem:[#allocation3 + $0x4] sm:$0xf] }
 0x56b   : > { %v1581_v61 = vpop.f32.mrb[8].mxu1 }
 0x56c   : > { %v2733_v62 = vpop.f32.mrb[9].mxu1  ;;  %v1648_v63 = vsel %vm1635_vm5, %v1581_v61, -inf }
 0x56d   : > { %1649 = vmax.xlane.f32.xlu1 %v1648_v63  ;;  %v1584_v0 = vpop.f32.mrb[10].mxu1 }
 0x56e   : > { %v2734_v1 = vpop.f32.mrb[11].mxu1  ;;  %v1651_v2 = vsel %vm1635_vm5, %v1584_v0, -inf }
 0x56f   : > { %1652 = vmax.xlane.f32.xlu0 %v1651_v2  ;;  %v1780_v1 = vsel %vm1731_vm6, %v1443_v60, 0 }
 0x573   : > { %v1628_v3 = vpop.f32.mrb[12].mxu1 }
 0x574   : > { %v2739_v4 = vpop.f32.mrb[13].mxu1  ;;  %v1654_v5 = vsel %vm1635_vm5, %v1628_v3, -inf }
 0x575   : > { %1655 = vmax.xlane.f32.xlu1 %v1654_v5  ;;  %v1631_v6 = vpop.f32.mrb[14].mxu1  ;;  %v1444_v5 = vld [vmem:[#allocation3 + $0x8] sm:$0xf] }
 0x576   : > { %v2740_v7 = vpop.f32.mrb[15].mxu1  ;;  %v1657_v8 = vsel %vm1635_vm5, %v1631_v6, -inf }
 0x577   : > { %1658 = vmax.xlane.f32.xlu0 %v1657_v8 }
 0x5ea   : > { %v1638_v9 = vpop.xlane.xlu0 %1637 }
 0x5eb   : > { %v1660_v10 = vsub.f32 %v1487_v49, %v1638_v9 }
 0x5ec   : > { %v1641_v11 = vpop.xlane.xlu1 %1640 }
 0x5ed   : > { %v1668_v12 = vmul.f32 1.442695, %v1660_v10  ;;  %v1661_v13 = vsub.f32 %v1490_v52, %v1641_v11  ;;  %v1442_v52 = vld [vmem:[#allocation3] sm:$0xf]  ;;  %v1827_v11 = vsel %vm1731_vm6, %v1444_v5, 0 }
 0x5ee   : > { %v1733_v53 = vsel %vm1731_vm6, %v1442_v52, 0 }
 0x5ef   : > { %3031 = vpow2.f32 %v1668_v12  ;;  %v1670_v14 = vmul.f32 1.442695, %v1661_v13  ;;  %2742 = vmatpush3.bf16.msra.mxu1 %v1733_v53 }
 0x5f0   : > { %2747 = vmatprep.subr.bf16.mxu1 %v3514_v55 }
 0x5f1   : > { %3033 = vpow2.f32 %v1670_v14 }
 0x5f2   : > { %v1644_v15 = vpop.xlane.xlu0 %1643 }
 0x5f3   : > { %v1662_v16 = vsub.f32 %v1534_v39, %v1644_v15  ;;  %v1445_v15 = vld [vmem:[#allocation3 + $0xc] sm:$0xf] }
 0x5f5   : > { %v1672_v17 = vmul.f32 1.442695, %v1662_v16 }
 0x5f6   : > { %v1647_v18 = vpop.xlane.xlu0 %1646 }
 0x5f7   : > { %3035 = vpow2.f32 %v1672_v17  ;;  %v1663_v19 = vsub.f32 %v1537_v58, %v1647_v18  ;;  %v1874_v18 = vsel %vm1731_vm6, %v1445_v15, 0 }
 0x5f9   : > { %v3032_v20 = vpop.eup %3031  ;;  %v1674_v21 = vmul.f32 1.442695, %v1663_v19 }
 0x5fa   : > { %v1650_v22 = vpop.xlane.xlu1 %1649  ;;  %v1684_v23 = vsel %vm1635_vm5, %v3032_v20, 0.0 }
 0x5fb   : > { %v3034_v24 = vpop.eup %3033  ;;  %3037 = vpow2.f32 %v1674_v21  ;;  %v1664_v26 = vsub.f32 %v1581_v61, %v1650_v22  ;;  %1685 = vadd.xlane.f32.xlu1 %v1684_v23 }
 0x5fc   : > { %v1653_v27 = vpop.xlane.xlu0 %1652  ;;  %v1687_v28 = vsel %vm1635_vm5, %v3034_v24, 0.0 }
 0x5fd   : > { %v1676_v29 = vmul.f32 1.442695, %v1664_v26  ;;  %v1665_v30 = vsub.f32 %v1584_v0, %v1653_v27  ;;  %1688 = vadd.xlane.f32.xlu0 %v1687_v28  ;;  %v3024_v26 = vld [vmem:[#allocation18 + $0x8] sm:$0xff]   ;;  %v3025_v27 = vld [vmem:[#allocation18 + $0x10] sm:$0xff]   ;;  %v3026_v28 = vld [vmem:[#allocation18 + $0x18] sm:$0xff]  }
 0x5ff   : > { %3039 = vpow2.f32 %v1676_v29  ;;  %v1678_v31 = vmul.f32 1.442695, %v1665_v30  ;;  %v3027_v29 = vld [vmem:[#allocation18 + $0x20] sm:$0xff]   ;;  %v3028_v30 = vld [vmem:[#allocation18 + $0x28] sm:$0xff]  }
 0x601   : > { %v3036_v33 = vpop.eup %3035  ;;  %3041 = vpow2.f32 %v1678_v31 }
 0x602   : > { %v1656_v34 = vpop.xlane.xlu1 %1655  ;;  %v1690_v35 = vsel %vm1635_vm5, %v3036_v33, 0.0 }
 0x603   : > { %v1666_v36 = vsub.f32 %v1628_v3, %v1656_v34  ;;  %1691 = vadd.xlane.f32.xlu1 %v1690_v35 }
 0x604   : > { %v1659_v38 = vpop.xlane.xlu0 %1658 }
 0x605   : > { %v3038_v40 = vpop.eup %3037  ;;  %v1680_v41 = vmul.f32 1.442695, %v1666_v36  ;;  %v1667_v42 = vsub.f32 %v1631_v6, %v1659_v38 }
 0x606   : > { %v1693_v43 = vsel %vm1635_vm5, %v3038_v40, 0.0 }
 0x607   : > { %3043 = vpow2.f32 %v1680_v41  ;;  %v1682_v44 = vmul.f32 1.442695, %v1667_v42  ;;  %1694 = vadd.xlane.f32.xlu0 %v1693_v43 }
 0x609   : > { %v3040_v45 = vpop.eup %3039  ;;  %3045 = vpow2.f32 %v1682_v44 }
 0x60a   : > { %v1696_v46 = vsel %vm1635_vm5, %v3040_v45, 0.0 }
 0x60b   : > { %v3042_v32 = vpop.eup %3041  ;;  %1697 = vadd.xlane.f32.xlu1 %v1696_v46 }
 0x60c   : > { %v1699_v47 = vsel %vm1635_vm5, %v3042_v32, 0.0 }
 0x60d   : > { %1700 = vadd.xlane.f32.xlu0 %v1699_v47 }
 0x611   : > { %v3044_v48 = vpop.eup %3043 }
 0x612   : > { %v1702_v49 = vsel %vm1635_vm5, %v3044_v48, 0.0 }
 0x613   : > { %v3046_v50 = vpop.eup %3045  ;;  %1703 = vadd.xlane.f32.xlu1 %v1702_v49 }
 0x614   : > { %v1705_v51 = vsel %vm1635_vm5, %v3046_v50, 0.0 }
 0x615   : > { %1706 = vadd.xlane.f32.xlu0 %v1705_v51 }
 0x688   : > { %v1686_v54 = vpop.xlane.xlu1 %1685 }
 0x689   : > { %3047 = vrcp.f32 %v1686_v54 }
 0x68a   : > { %v1689_v39 = vpop.xlane.xlu0 %1688 }
 0x68b   : > { %3049 = vrcp.f32 %v1689_v39 }
 0x690   : > { %v1692_v56 = vpop.xlane.xlu1 %1691 }
 0x691   : > { %3051 = vrcp.f32 %v1692_v56 }
 0x693   : > { %v3048_v57 = vpop.eup %3047 }
 0x694   : > { %v1695_v58 = vpop.xlane.xlu0 %1694  ;;  %v1716_v61 = vmul.f32 %v3048_v57, %v3032_v20 }
 0x695   : > { %v3050_v59 = vpop.eup %3049  ;;  %3053 = vrcp.f32 %v1695_v58 }
 0x696   : > { %v1717_v62 = vmul.f32 %v3050_v59, %v3034_v24  ;;  %v3023_v24 = vld [vmem:[#allocation18] sm:$0xff]  }
 0x697   : > { %2766 = vmatpush3.bf16.msra.mxu0 %v3023_v24 }
 0x698   : > { %v1698_v63 = vpop.xlane.xlu1 %1697  ;;  %v1724_v0 = vpack.c.bf16 %v1717_v62, %v1716_v61  ;;  %2767 = vmatprep.subr.bf16.mxu0 %v3514_v55 }
 0x699   : > { %3055 = vrcp.f32 %v1698_v63 }
 0x69a   : > { %2744 = vmatmul.mubr.msk.bf16.vlgmr.msra.gmra.mrb[16].mxu1 %vm1635_vm5, %v1724_v0  ;;  %v1701_v2 = vpop.xlane.xlu0 %1700 }
 0x69b   : > { %3057 = vrcp.f32 %v1701_v2  ;;  %2748 = vmatpush3.bf16.msra.mxu1 %v1780_v1  ;;  %2749 = vmatprep.mubr.msk.bf16.mxu1 %vm3515_vm3, %v3514_v55  ;;  %v3052_v3 = vpop.eup %3051 }
 0x69c   : > { %2753 = vmatprep.subr.bf16.mxu1 %v3514_v55  ;;  %v1718_v6 = vmul.f32 %v3052_v3, %v3036_v33  ;;  %2768 = vmatpush3.bf16.msra.mxu0 %v3024_v26  ;;  %v3029_v26 = vld [vmem:[#allocation18 + $0x30] sm:$0xff]  }
 0x69d   : > { %2769 = vmatprep.subr.bf16.mxu0 %v3514_v55 }
 0x69f   : > { %v3054_v4 = vpop.eup %3053 }
 0x6a0   : > { %v1719_v7 = vmul.f32 %v3054_v4, %v3038_v40  ;;  %v1704_v8 = vpop.xlane.xlu1 %1703  ;;  %2770 = vmatpush3.bf16.msra.mxu0 %v3025_v27 }
 0x6a1   : > { %3059 = vrcp.f32 %v1704_v8  ;;  %2771 = vmatprep.subr.bf16.mxu0 %v3514_v55 }
 0x6a2   : > { %v1707_v9 = vpop.xlane.xlu0 %1706  ;;  %v1725_v10 = vpack.c.bf16 %v1719_v7, %v1718_v6 }
 0x6a3   : > { %3061 = vrcp.f32 %v1707_v9  ;;  %v3056_v12 = vpop.eup %3055 }
 0x6a4   : > { %2750 = vmatmul.mubr.msk.bf16.vlgmr.msra.gmra.mrb[20].mxu1 %vm1635_vm5, %v1725_v10  ;;  %v1720_v16 = vmul.f32 %v3056_v12, %v3040_v45  ;;  %2772 = vmatpush3.bf16.msra.mxu0 %v3026_v28 }
 0x6a5   : > { %v3058_v13 = vpop.eup %3057  ;;  %2754 = vmatpush3.bf16.msra.mxu1 %v1827_v11  ;;  %2755 = vmatprep.mubr.msk.bf16.mxu1 %vm3515_vm3, %v3514_v55 }
 0x6a6   : > { %v1721_v14 = vmul.f32 %v3058_v13, %v3042_v32  ;;  %2759 = vmatprep.subr.bf16.mxu1 %v3514_v55  ;;  %2773 = vmatprep.subr.bf16.mxu0 %v3514_v55 }
 0x6a8   : > { %v1726_v17 = vpack.c.bf16 %v1721_v14, %v1720_v16  ;;  %2774 = vmatpush3.bf16.msra.mxu0 %v3027_v29 }
 0x6a9   : > { %2775 = vmatprep.subr.bf16.mxu0 %v3514_v55 }
 0x6ab   : > { %v3060_v19 = vpop.eup %3059 }
 0x6ac   : > { %2756 = vmatmul.mubr.msk.bf16.vlgmr.msra.gmra.mrb[24].mxu1 %vm1635_vm5, %v1726_v17  ;;  %v1722_v22 = vmul.f32 %v3060_v19, %v3044_v48  ;;  %2776 = vmatpush3.bf16.msra.mxu0 %v3028_v30 }
 0x6ad   : > { %v3062_v20 = vpop.eup %3061  ;;  %2760 = vmatpush3.bf16.msra.mxu1 %v1874_v18  ;;  %2761 = vmatprep.mubr.msk.bf16.mxu1 %vm3515_vm3, %v3514_v55 }
 0x6ae   : > { %v1723_v21 = vmul.f32 %v3062_v20, %v3046_v50  ;;  %2777 = vmatprep.subr.bf16.mxu0 %v3514_v55 }
 0x6b0   : > { %v1727_v23 = vpack.c.bf16 %v1723_v21, %v1722_v22  ;;  %2778 = vmatpush3.bf16.msra.mxu0 %v3029_v26 }
 0x6b1   : > { %2779 = vmatprep.subr.bf16.mxu0 %v3514_v55 }
 0x6b4   : > { %2762 = vmatmul.mubr.msk.bf16.vlgmr.msra.gmra.mrb[28].mxu1 %vm1635_vm5, %v1727_v23 }
 0x76d   : > { %v1769_v31 = vpop.f32.mrb[16].mxu1 }
 0x76e   : > { %v2745_v33 = vpop.f32.mrb[17].mxu1 }
 0x76f   : > { %v1772_v34 = vpop.f32.mrb[18].mxu1 }
 0x770   : > { %v2746_v35 = vpop.f32.mrb[19].mxu1 }
 0x777   : > { %v1816_v36 = vpop.f32.mrb[20].mxu1 }
 0x778   : > { %v2751_v38 = vpop.f32.mrb[21].mxu1 }
 0x779   : > { %v1819_v40 = vpop.f32.mrb[22].mxu1 }
 0x77a   : > { %v2752_v41 = vpop.f32.mrb[23].mxu1 }
 0x77f   : > { %v1863_v42 = vpop.f32.mrb[24].mxu1 }
 0x780   : > { %v1917_v43 = vcombine.low %v1769_v31, %v1863_v42  ;;  %v1918_v44 = vcombine.high %v1769_v31, %v1863_v42  ;;  %v2757_v45 = vpop.f32.mrb[25].mxu1 }
 0x781   : > { %v1866_v46 = vpop.f32.mrb[26].mxu1 }
 0x782   : > { %v1985_v32 = vcombine.low %v1772_v34, %v1866_v46  ;;  %v1986_v47 = vcombine.high %v1772_v34, %v1866_v46  ;;  %v2758_v48 = vpop.f32.mrb[27].mxu1  ;;  %v1925_v53 = vrot.slane %v1917_v43, %v4086_v25  ;;  %v1932_v54 = vrot.slane %v1918_v44, %v4086_v25  ;;  %v3030_v46 = vld [vmem:[#allocation18 + $0x38] sm:$0xff]  }
 0x783   : > { %2780 = vmatpush3.bf16.msra.mxu0 %v3030_v46 }
 0x784   : > { %v1993_v1 = vrot.slane %v1985_v32, %v4086_v25  ;;  %v2000_v2 = vrot.slane %v1986_v47, %v4086_v25 }
 0x787   : > { %v1910_v49 = vpop.f32.mrb[28].mxu1 }
 0x788   : > { %v1933_v50 = vcombine.low %v1816_v36, %v1910_v49  ;;  %v1934_v51 = vcombine.high %v1816_v36, %v1910_v49  ;;  %v2763_v52 = vpop.f32.mrb[29].mxu1 }
 0x789   : > { %v1913_v39 = vpop.f32.mrb[30].mxu1 }
 0x78a   : > { %v1941_v56 = vrot.slane %v1933_v50, %v4086_v25  ;;  %v1948_v57 = vrot.slane %v1934_v51, %v4086_v25  ;;  %v2001_v58 = vcombine.low %v1819_v40, %v1913_v39  ;;  %v2002_v59 = vcombine.high %v1819_v40, %v1913_v39  ;;  %v2764_v60 = vpop.f32.mrb[31].mxu1 }
 0x78c   : > { %v1949_v61 = vcombine.low %v1925_v53, %v1941_v56  ;;  %v1950_v62 = vcombine.high %v1925_v53, %v1941_v56  ;;  %v1965_v63 = vcombine.low %v1932_v54, %v1948_v57  ;;  %v1966_v0 = vcombine.high %v1932_v54, %v1948_v57 }
 0x78d   : > { %v2009_v3 = vrot.slane %v2001_v58, %v4086_v25  ;;  %v2016_v4 = vrot.slane %v2002_v59, %v4086_v25 }
 0x78e   : > { %v1957_v5 = vrot.slane %v1949_v61, %v4090_v37  ;;  %v1964_v6 = vrot.slane %v1950_v62, %v4090_v37  ;;  %v1973_v7 = vrot.slane %v1965_v63, %v4090_v37  ;;  %v1980_v8 = vrot.slane %v1966_v0, %v4090_v37 }
 0x78f   : > { %v2017_v9 = vcombine.low %v1993_v1, %v2009_v3  ;;  %v2018_v10 = vcombine.high %v1993_v1, %v2009_v3  ;;  %v2033_v11 = vcombine.low %v2000_v2, %v2016_v4  ;;  %v2034_v12 = vcombine.high %v2000_v2, %v2016_v4 }
 0x790   : > { %v2053_v13 = vcombine.low %v1957_v5, %v1964_v6  ;;  %v2610_v14 = vcombine.high %v1957_v5, %v1964_v6  ;;  %v2069_v15 = vcombine.low %v1973_v7, %v1980_v8  ;;  %v2611_v16 = vcombine.high %v1973_v7, %v1980_v8 }
 0x791   : > { %v2025_v17 = vrot.slane %v2017_v9, %v4090_v37  ;;  %v2032_v18 = vrot.slane %v2018_v10, %v4090_v37  ;;  %v2041_v19 = vrot.slane %v2033_v11, %v4090_v37  ;;  %v2048_v20 = vrot.slane %v2034_v12, %v4090_v37 }
 0x792   : > { %v2060_v21 = vrot.slane %v2053_v13, %v4086_v25  ;;  %v2068_v22 = vrot.slane %v2610_v14, %v4086_v25  ;;  %v2076_v23 = vrot.slane %v2069_v15, %v4086_v25  ;;  %v2084_v24 = vrot.slane %v2611_v16, %v4086_v25  ;;  %v2614_v14 = vld [vmem:[#allocation19] ss:$0 sm:$0xff] }
 0x793   : > { %v2121_v27 = vcombine.low %v2025_v17, %v2032_v18  ;;  %v2612_v28 = vcombine.high %v2025_v17, %v2032_v18  ;;  %v2137_v29 = vcombine.low %v2041_v19, %v2048_v20  ;;  %v2613_v30 = vcombine.high %v2041_v19, %v2048_v20 }
 0x794   : > { %v2086_v31 = vcombine.high %v2060_v21, %v2068_v22  ;;  %v2102_v33 = vcombine.high %v2076_v23, %v2084_v24  ;;  %v2085_v34 = vcombine.low %v2060_v21, %v2068_v22  ;;  %v2101_v35 = vcombine.low %v2076_v23, %v2084_v24 }
 0x795   : > { %v2128_v36 = vrot.slane %v2121_v27, %v4086_v25  ;;  %v2136_v38 = vrot.slane %v2612_v28, %v4086_v25  ;;  %v2144_v40 = vrot.slane %v2137_v29, %v4086_v25  ;;  %v2152_v41 = vrot.slane %v2613_v30, %v4086_v25 }
 0x796   : > { %v2100_v42 = vrot.slane %v2086_v31, %v4090_v37  ;;  %v2116_v43 = vrot.slane %v2102_v33, %v4090_v37  ;;  %v2093_v44 = vrot.slane %v2085_v34, %v4090_v37  ;;  %v2109_v45 = vrot.slane %v2101_v35, %v4090_v37 }
 0x797   : > { %v2154_v32 = vcombine.high %v2128_v36, %v2136_v38  ;;  %v2170_v47 = vcombine.high %v2144_v40, %v2152_v41  ;;  %v2153_v48 = vcombine.low %v2128_v36, %v2136_v38  ;;  %v2169_v49 = vcombine.low %v2144_v40, %v2152_v41 }
 0x798   : > { %v2119_v50 = vcombine.low %v2100_v42, %v2116_v43  ;;  %v2117_v51 = vcombine.low %v2093_v44, %v2109_v45  ;;  %v2118_v52 = vcombine.high %v2093_v44, %v2109_v45  ;;  %v2120_v53 = vcombine.high %v2100_v42, %v2116_v43 }
 0x799   : > { %v2168_v55 = vrot.slane %v2154_v32, %v4090_v37  ;;  %v2184_v25 = vrot.slane %v2170_v47, %v4090_v37  ;;  %v2161_v54 = vrot.slane %v2153_v48, %v4090_v37  ;;  %v2177_v39 = vrot.slane %v2169_v49, %v4090_v37 }
 0x79b   : > { %v2187_v56 = vcombine.low %v2168_v55, %v2184_v25  ;;  %v2186_v57 = vcombine.high %v2161_v54, %v2177_v39  ;;  %v2185_v58 = vcombine.low %v2161_v54, %v2177_v39  ;;  %v2188_v59 = vcombine.high %v2168_v55, %v2184_v25 }
 0x79d   : > { %v3004_v60 = vpack.i.bf16 %v2187_v56, %v2119_v50  ;;  %v2999_v61 = vpack.i.bf16 %v2186_v57, %v2118_v52  ;;  %v3009_v62 = vpack.i.bf16 %v2188_v59, %v2120_v53 }
 0x79f   : > { %3005 = vrot.lane.b32.xlu0 %v3004_v60, %s3516_s20  ;;  %3000 = vrot.lane.b32.xlu1 %v2999_v61, %s3518_s7  ;;  %s3521_s20 = smov [#allocation21]  }
 0x7a3   : > { %3010 = vrot.lane.b32.xlu1 %v3009_v62, %s3517_s30  ;;  %s3351_s30 = sshll.u32 %s3521_s20, 4  ;;  %s3352_s30 = int_to_ptr.vmem [resolvable:$false] %s3351_s30 }
 0x7a4   : > { %s3353_s7 = scalar_lea.vmem %s3352_s30, 512  ;;  %p3354_p2 = scmp.lt.s32.totalorder %s4225_s15, %s3352_s30 }
 0x7a5   : > { %p3355_p0 = scmp.lt.s32.totalorder %s3353_s7, %s3347_s1 }
 0x7a7   : > { %p3356_p10 = por %p3355_p0, %p3354_p2 }
 0x7a9   : > { %p3357_p12 = pnand %p3356_p10, %p3350_p11 }
 0x811   : > { %v3006_v63 = vpop.permute.xlu0 %3005  ;;  %v3001_v0 = vpop.permute.xlu1 %3000 }
 0x812   : > { %v3003_v1 = vunpack.i.h.bf16 %v3001_v0  ;;  %v3002_v2 = vunpack.i.l.bf16 %v3001_v0  ;;  %v3008_v3 = vunpack.i.h.bf16 %v3006_v63  ;;  %v3007_v37 = vunpack.i.l.bf16 %v3006_v63 }
 0x814   : > { %v2213_v4 = vsel %vm1446_vm4, %v2117_v51, %v3002_v2  ;;  %v2214_v5 = vsel %vm1446_vm4, %v2185_v58, %v3003_v1 }
 0x815   : > { %v3011_v6 = vpop.permute.xlu1 %3010  ;;  %v2216_v9 = vsel %vm2215_vm7, %v2213_v4, %v3007_v37  ;;  %v2217_v10 = vsel %vm2215_vm7, %v2214_v5, %v3008_v3 }
 0x816   : > { %v3013_v7 = vunpack.i.h.bf16 %v3011_v6  ;;  %v3012_v8 = vunpack.i.l.bf16 %v3011_v6 }
 0x818   : > { %v2219_v11 = vsel %vm2218_vm8, %v2216_v9, %v3012_v8  ;;  %v2220_v12 = vsel %vm2218_vm8, %v2217_v10, %v3013_v7 }
 0x819   : > { %v2221_v13 = vpack.c.bf16 %v2220_v12, %v2219_v11 }
 0x81b   : > { %2782 = vmatmul.mubr.bf16.vlgmr.msra.gmra.mrb[4].mxu0 %v2221_v13 }
 0x8ee   : > { %v2327_v15 = vpop.f32.mrb[4].mxu0 }
 0x8ef   : > { %v2328_v16 = vadd.f32 %v2614_v14, %v2327_v15  ;;  %v2783_v17 = vpop.f32.mrb[5].mxu0 }
 0x8f0   : > { %v2330_v18 = vpop.f32.mrb[6].mxu0 }
 0x8f1   : > { %2334 = vst [vmem:[%s4030_s0] sm:$0xff] %v2328_v16  ;;  %v2331_v19 = vadd.f32 %v2614_v14, %v2330_v18  ;;  %v2784_v20 = vpop.f32.mrb[7].mxu0 }
 0x8f3   : > { %2335 = vst [vmem:[%s4030_s0 + $0x8] sm:$0xff] %v2331_v19 }
 0x8f4   : > { %3360 = shalt.err (!%p3357_p12)
}
 0x8f5   : > { %s3361_s0 = scalar_lea.hbm %s4223_s24, 256  ;;  %s3365_s25 = scalar_lea.hbm %s4381_s11, 1024 }
 0x8f6   : > { %p3362_p13 = scmp.ne.s32.totalorder %s4223_s24, %s3361_s0  ;;  %p3366_p6 = scmp.lt.u32.totalorder %s4223_s24, %s4381_s11 }
 0x8f7   : > { %p3367_p3 = scmp.lt.u32.totalorder %s3365_s25, %s3361_s0  ;;  %p3369_p8 = scmp.lt.u32.totalorder %s3361_s0, %s4223_s24 }
 0x8f8   : > { %p3363_p1 = pnand %p3362_p13, %p4382_p7 }
 0x8f9   : > { %p3368_p4 = por %p3367_p3, %p3366_p6 }
 0x8fa   : > { %p3364_p5 = pneg %p3363_p1 }
 0x8fb   : > { %p3370_p9 = por %p3369_p8, %p3368_p4 }
 0x8fd   : > { %p3371_p11 = pnand %p3370_p9, %p3364_p5 }
 0x8ff   : > { %3374 = shalt.err (!%p3371_p11)
}
 0x900   : > { %s3522_s5 = smov 128   ;;  %s3523_s19 = smov 8  }
 0x901   : > { %2821 = dma.vmem_to_hbm [thread:$0]  (%p4382_p7), %s4225_s15, 256, %s4223_s24, %s2337_s10, %s3522_s5, %s3522_s5, %s3523_s19  }
 0x902 PF: > { %p2876_p2 = scmp.ge.s32.totalorder %s3493_s23, 2  ;;  %s2367_s27 = sand.u32 1, %s3465_s16  }
 0x903   : > { %p4383_p0 = scmp.ne.s32.totalorder %s4350_s12, 0  ;;  %s2368_s1 = scalar_lea.sflag [#allocation6], %s2367_s27 }
 0x905   : > { %p2856_p10 = pnand %p2876_p2, %p4383_p0 }
 0x907   : > { %3448 = dma.done.wait (!%p2856_p10), %s2368_s1, 256  }
 0x908   : > { %3450 = vsyncadd (!%p2856_p10), %s2368_s1, 4294967040  ;;  %s33_s23 = sadd.s32 1, %s3493_s23   ;;  %s4384_s13 = sld [smem:[#allocation31_spill]] }
 0x909   : > { %p30_p12 = scmp.ge.s32.totalorder %s33_s23, 6   ;;  %s4385_s20 = sld [smem:[#allocation32_spill]] }
 0x90a   : > { %s4386_s6 = smov %s3878_s14  ;;  %s4388_s15 = smov %s3934_s29 }
 0x90b   : > { %s4389_s16 = smov %s3469_s17  ;;  %s4390_s17 = smov %s3473_s18 }
 0x90c   : > { %s4391_s18 = smov %s4386_s6  ;;  %s4392_s19 = smov %s3485_s21 }
 0x90d   : > { %s4394_s21 = smov %s4397_s28  ;;  %32 = sbr.rel (!%p30_p12) target bundleno = 27 (0x1b), region = 154 }
 0x90f   : > { %s4387_s14 = smov %s4385_s20  ;;  %s4393_s20 = smov %s3489_s22 }
 0x910   : > { %s4395_s22 = smov %s4401_s2 }
 0x914   :  { %2373 = vsyncpa [#allocation5], 1 }
 0x915   :  { %2375 = vsyncpa [#allocation5 + $0x1], 1 }
 0x916   :  { %2376 = vsyncpa [#allocation8], 1 }
 0x917   :  { %2378 = vsyncpa [#allocation8 + $0x1], 1 }
 0x918   :  { %2379 = vsyncpa [#allocation11], 1 }
 0x919   :  { %2380 = vsyncpa [#allocation14], 1 }
 0x91a   :  { %2381 = vsyncpa [#allocation17], 1 }
 0x91b   :  { %2382 = vsyncpa [#allocation20], 1 }
 0x91c   :  { %2383 = vsyncpa [#allocation6], 1 }
 0x91d   :  { %2385 = vsyncpa [#allocation6 + $0x1], 1 }

// kernel: magnet_forward.4
= control target key start
LH: loop header
LB: loop body
LE: loop exit
PB: predicated region body
PF: predicated region fallthrough
CT: control target
= control target key end

     0   :  { %s5731_s0 = inlined_call_operand.hbm [shape: bf16[2,32,128], index: 0, kind: input, shape index: {}, may-alias: {0,1}]   ;;  %s5732_s1 = inlined_call_operand.hbm [shape: bf16[2,32,128], index: 1, kind: input, shape index: {}, may-alias: {0,1}]   ;;  %s5733_s2 = inlined_call_operand.hbm [shape: bf16[128,128], index: 2, kind: input, shape index: {}]   ;;  %s5734_s3 = inlined_call_operand.hbm [shape: f32[1,128], index: 3, kind: input, shape index: {}]   ;;  %s5735_s4 = inlined_call_operand.hbm [shape: bf16[128,128], index: 4, kind: input, shape index: {}]   ;;  %s5736_s5 = inlined_call_operand.hbm [shape: f32[1,128], index: 5, kind: input, shape index: {}]   ;;  %s5737_s6 = inlined_call_operand.hbm [shape: bf16[128,128], index: 6, kind: input, shape index: {}]   ;;  %s5738_s7 = inlined_call_operand.hbm [shape: f32[1,128], index: 7, kind: input, shape index: {}]   ;;  %s5739_s8 = inlined_call_operand.hbm [shape: bf16[128,128], index: 8, kind: input, shape index: {}]   ;;  %s5740_s9 = inlined_call_operand.hbm [shape: f32[1,128], index: 9, kind: input, shape index: {}]   ;;  %s5741_s10 = inlined_call_operand.hbm [shape: f32[2,32,128], index: 10, kind: output, shape index: {}]  }
   0x1   :  { %5760 = sst [smem:[#allocation36_spill]] %s5731_s0 }
   0x2   :  { %5761 = sst [smem:[#allocation37_spill]] %s5732_s1 }
   0x3   :  { %5762 = sst [smem:[#allocation38_spill]] %s5733_s2 }
   0x4   :  { %5763 = sst [smem:[#allocation39_spill]] %s5734_s3 }
   0x5   :  { %5764 = sst [smem:[#allocation40_spill]] %s5735_s4 }
   0x6   :  { %5765 = sst [smem:[#allocation41_spill]] %s5736_s5 }
   0x7   :  { %5766 = sst [smem:[#allocation42_spill]] %s5737_s6 }
   0x8   :  { %5767 = sst [smem:[#allocation43_spill]] %s5738_s7 }
   0x9   :  { %5768 = sst [smem:[#allocation44_spill]] %s5739_s8 }
   0xa   :  { %5769 = sst [smem:[#allocation45_spill]] %s5740_s9 }
   0xb   :  { %5770 = sst [smem:[#allocation46_spill]] %s5741_s10 }
   0xc   :  { %15 = vsyncpa [#allocation5], 0 }
   0xd   :  { %17 = vsyncpa [#allocation5 + $0x1], 0 }
   0xe   :  { %18 = vsyncpa [#allocation8], 0 }
   0xf   :  { %20 = vsyncpa [#allocation8 + $0x1], 0 }
  0x10   :  { %21 = vsyncpa [#allocation11], 0 }
  0x11   :  { %22 = vsyncpa [#allocation14], 0 }
  0x12   :  { %23 = vsyncpa [#allocation17], 0 }
  0x13   :  { %24 = vsyncpa [#allocation20], 0 }
  0x14   :  { %25 = vsyncpa [#allocation6], 0 }
  0x15   :  { %27 = vsyncpa [#allocation6 + $0x1], 0  ;;  %s4681_s13 = smov 0   ;;  %s4683_s14 = smov 0  }
  0x16   :  { %s4685_s15 = smov 0   ;;  %s4687_s16 = smov 0  }
  0x17   :  { %s4689_s17 = smov 0   ;;  %s4691_s18 = smov 0  }
  0x18   :  { %s4693_s19 = smov 0   ;;  %s4695_s20 = smov 0  }
  0x19   :  { %s4697_s21 = smov 0   ;;  %s4699_s22 = smov 0  }
  0x1a   :  { %s4701_s23 = smov 0  }
  0x1b LB: > { %5771 = sst [smem:[#allocation30_spill]] %s4557_s13  ;;  %s4737_s24 = sadd.s32 4294967295, %s4597_s23   ;;  %s4597_s23 = sphi %s4701_s23, %s33_s23   ;;  %s4593_s22 = sphi %s4699_s22, %s5842_s22   ;;  %s4589_s21 = sphi %s4697_s21, %s5841_s21   ;;  %s4585_s20 = sphi %s4695_s20, %s5840_s20   ;;  %s4581_s19 = sphi %s4693_s19, %s5839_s19   ;;  %s4577_s18 = sphi %s4691_s18, %s5838_s18   ;;  %s4573_s17 = sphi %s4689_s17, %s5837_s17   ;;  %s4569_s16 = sphi %s4687_s16, %s5836_s16   ;;  %s4565_s15 = sphi %s4685_s15, %s5835_s15   ;;  %s4561_s14 = sphi %s4683_s14, %s5834_s14   ;;  %s4557_s13 = sphi %s4681_s13, %s5831_s13  }
  0x1c   : > { %5772 = sst [smem:[#allocation31_spill]] %s4561_s14  ;;  %p3566_p0 = scmp.ge.s32.totalorder %s4597_s23, 1 }
  0x1d   : > { %5773 = sst [smem:[#allocation32_spill]] %s4565_s15  ;;  %p5749_p1 = scmp.eq.s32.totalorder %s4737_s24, 0 }
  0x1e   : > { %5774 = sst [smem:[#allocation33_spill]] %s4581_s19  ;;  %p300_p2 = scmp.lt.s32.totalorder %s4597_s23, 5 }
  0x1f   : > { %5775 = sst [smem:[#allocation34_spill]] %s4585_s20  ;;  %s4599_s26 = smov [#allocation9]  }
  0x20   : > { %p4742_p3 = pnand %p3566_p0, %p300_p2  ;;  %s312_s27 = sshll.u32 %s4599_s26, 4  ;;  %s4746_s27 = int_to_ptr.vmem [resolvable:$true] %s312_s27 }
  0x21   : > { %s4600_s29 = smov [#allocation10]   ;;  %s4601_s11 = smov [#allocation13]  }
  0x22   : > { %s5776_s25 = scalar_select %p4742_p3, 1, 0 }
  0x23   : > { %p3919_p4 = pneg %p4742_p3  ;;  %s326_s30 = sshll.u32 %s4600_s29, 4  ;;  %s4756_s30 = int_to_ptr.vmem [resolvable:$true] %s326_s30 }
  0x24   : > { %5777 = sst [smem:[#allocation35_spill]] %s5776_s25  ;;  %s4758_s12 = sshll.u32 %s4601_s11, 4  ;;  %s351_s12 = int_to_ptr.vmem [resolvable:$true] %s4758_s12 }
  0x25   : > { %p4752_p5 = pnand %p3919_p4, %p5749_p1  ;;  %s5779_s2 = sld [smem:[#allocation38_spill]] }
  0x27   : > { %p4768_p7 = pneg %p4752_p5 }
  0x2b   : > { %s4167_s26 = scalar_lea.hbm %s5779_s2, 1024 }
  0x2c   : > { %p4168_p6 = scmp.ne.s32.totalorder %s5779_s2, %s4167_s26  ;;  %p4174_p10 = scmp.lt.u32.totalorder %s4167_s26, %s5779_s2 }
  0x2e   : > { %p4170_p8 = pnand %p4768_p7, %p4168_p6 }
  0x30   : > { %p4171_p9 = pneg %p4170_p8 }
  0x32   : > { %p4176_p11 = pnand %p4174_p10, %p4171_p9 }
  0x34   : > { %4179 = shalt.err (!%p4176_p11)
}
  0x35   : > { %s4180_s10 = scalar_lea.vmem %s4746_s27, 1024  ;;  %p4188_p2 = scmp.lt.s32.totalorder %s4746_s27, %s4746_s27 }
  0x36   : > { %p4181_p12 = scmp.ne.s32.totalorder %s4746_s27, %s4180_s10  ;;  %p4189_p4 = scmp.lt.s32.totalorder %s4180_s10, %s4180_s10 }
  0x38   : > { %p4183_p13 = pnand %p4181_p12, %p4768_p7  ;;  %p4190_p6 = por %p4189_p4, %p4188_p2 }
  0x3a   : > { %p4184_p0 = pneg %p4183_p13 }
  0x3c   : > { %p4191_p8 = pnand %p4190_p6, %p4184_p0 }
  0x3e   : > { %4194 = shalt.err (!%p4191_p8)
}
  0x3f   : > { %s5751_s19 = smov 64   ;;  %s5753_s20 = smov 4  }
  0x40   : > { %3922 = dma.hbm_to_vmem [thread:$0]  (!%p4752_p5), %s5779_s2, 1024, %s4746_s27, [#allocation8], %s5751_s19, %s5751_s19, %s5753_s20  }
  0x41   : > { %s5781_s3 = sld [smem:[#allocation39_spill]] }
  0x47   : > { %s4195_s10 = scalar_lea.hbm %s5781_s3, 16 }
  0x48   : > { %p4196_p9 = scmp.ne.s32.totalorder %s5781_s3, %s4195_s10  ;;  %p4202_p12 = scmp.lt.u32.totalorder %s4195_s10, %s5781_s3 }
  0x4a   : > { %p4198_p10 = pnand %p4196_p9, %p4768_p7 }
  0x4c   : > { %p4199_p11 = pneg %p4198_p10 }
  0x4e   : > { %p4204_p13 = pnand %p4202_p12, %p4199_p11 }
  0x50   : > { %4207 = shalt.err (!%p4204_p13)
}
  0x51   : > { %s4208_s27 = scalar_lea.vmem %s4756_s30, 16  ;;  %s4215_s13 = scalar_lea.vmem %s4756_s30, 32 }
  0x52   : > { %p4209_p0 = scmp.ne.s32.totalorder %s4756_s30, %s4208_s27  ;;  %p4216_p6 = scmp.lt.s32.totalorder %s4756_s30, %s4756_s30 }
  0x53   : > { %p4217_p8 = scmp.lt.s32.totalorder %s4215_s13, %s4208_s27 }
  0x54   : > { %p4211_p2 = pnand %p4209_p0, %p4768_p7 }
  0x55   : > { %p4218_p9 = por %p4217_p8, %p4216_p6 }
  0x56   : > { %p4212_p4 = pneg %p4211_p2 }
  0x58   : > { %p4219_p10 = pnand %p4218_p9, %p4212_p4 }
  0x5a   : > { %4222 = shalt.err (!%p4219_p10)
}
  0x5b   : > { %3925 = dma.hbm_to_vmem [thread:$0]  (!%p4752_p5), %s5781_s3, 16, %s4756_s30, [#allocation11]  }
  0x5c   : > { %s5782_s5 = sld [smem:[#allocation41_spill]] }
  0x62   : > { %s4223_s26 = scalar_lea.hbm %s5782_s5, 16 }
  0x63   : > { %p4224_p11 = scmp.ne.s32.totalorder %s5782_s5, %s4223_s26  ;;  %p4230_p0 = scmp.lt.u32.totalorder %s4223_s26, %s5782_s5 }
  0x65   : > { %p4226_p12 = pnand %p4224_p11, %p4768_p7 }
  0x67   : > { %p4227_p13 = pneg %p4226_p12 }
  0x69   : > { %p4232_p2 = pnand %p4230_p0, %p4227_p13 }
  0x6b   : > { %4235 = shalt.err (!%p4232_p2)
}
  0x6c   : > { %s4236_s13 = scalar_lea.vmem %s351_s12, 16  ;;  %s4243_s30 = scalar_lea.vmem %s351_s12, 32 }
  0x6d   : > { %p4237_p4 = scmp.ne.s32.totalorder %s351_s12, %s4236_s13  ;;  %p4244_p9 = scmp.lt.s32.totalorder %s351_s12, %s351_s12 }
  0x6e   : > { %p4245_p10 = scmp.lt.s32.totalorder %s4243_s30, %s4236_s13 }
  0x6f   : > { %p4239_p6 = pnand %p4237_p4, %p4768_p7 }
  0x70   : > { %p4246_p1 = por %p4245_p10, %p4244_p9 }
  0x71   : > { %p4240_p8 = pneg %p4239_p6 }
  0x73   : > { %p4247_p3 = pnand %p4246_p1, %p4240_p8 }
  0x75   : > { %4250 = shalt.err (!%p4247_p3)
}
  0x76   : > { %3931 = dma.hbm_to_vmem [thread:$0]  (!%p4752_p5), %s5782_s5, 16, %s351_s12, [#allocation14]  }
  0x77   : > { %s4604_s15 = smov [#allocation16]   ;;  %s4605_s26 = smov [#allocation12]  }
  0x78   : > { %s374_s25 = sshll.u32 %s4604_s15, 4  ;;  %s336_s29 = sshll.u32 %s4605_s26, 4  ;;  %s375_s25 = int_to_ptr.vmem [resolvable:$true] %s374_s25  ;;  %s337_s29 = int_to_ptr.vmem [resolvable:$true] %s336_s29 }
  0x79   : > { %s5783_s7 = sld [smem:[#allocation43_spill]] }
  0x7f   : > { %s4251_s27 = scalar_lea.hbm %s5783_s7, 16 }
  0x80   : > { %p4252_p1 = scmp.ne.s32.totalorder %s5783_s7, %s4251_s27  ;;  %p4258_p12 = scmp.lt.u32.totalorder %s4251_s27, %s5783_s7 }
  0x82   : > { %p4254_p3 = pnand %p4252_p1, %p4768_p7 }
  0x84   : > { %p4255_p11 = pneg %p4254_p3 }
  0x86   : > { %p4260_p13 = pnand %p4258_p12, %p4255_p11 }
  0x88   : > { %4263 = shalt.err (!%p4260_p13)
}
  0x89   : > { %s4264_s12 = scalar_lea.vmem %s375_s25, 16  ;;  %s4271_s14 = scalar_lea.vmem %s375_s25, 32 }
  0x8a   : > { %p4265_p0 = scmp.ne.s32.totalorder %s375_s25, %s4264_s12  ;;  %p4272_p6 = scmp.lt.s32.totalorder %s375_s25, %s375_s25 }
  0x8b   : > { %p4273_p8 = scmp.lt.s32.totalorder %s4271_s14, %s4264_s12 }
  0x8c   : > { %p4267_p2 = pnand %p4265_p0, %p4768_p7 }
  0x8d   : > { %p4274_p9 = por %p4273_p8, %p4272_p6 }
  0x8e   : > { %p4268_p4 = pneg %p4267_p2 }
  0x90   : > { %p4275_p10 = pnand %p4274_p9, %p4268_p4 }
  0x92   : > { %4278 = shalt.err (!%p4275_p10)
}
  0x93   : > { %3937 = dma.hbm_to_vmem [thread:$0]  (!%p4752_p5), %s5783_s7, 16, %s375_s25, [#allocation17]  }
  0x94   : > { %s5784_s4 = sld [smem:[#allocation40_spill]] }
  0x9a   : > { %s4279_s10 = scalar_lea.hbm %s5784_s4, 1024 }
  0x9b   : > { %p4280_p1 = scmp.ne.s32.totalorder %s5784_s4, %s4279_s10  ;;  %p4286_p12 = scmp.lt.u32.totalorder %s4279_s10, %s5784_s4 }
  0x9d   : > { %p4282_p3 = pnand %p4280_p1, %p4768_p7 }
  0x9f   : > { %p4283_p11 = pneg %p4282_p3 }
  0xa1   : > { %p4288_p13 = pnand %p4286_p12, %p4283_p11 }
  0xa3   : > { %4291 = shalt.err (!%p4288_p13)
}
  0xa4   : > { %s4292_s12 = scalar_lea.vmem %s337_s29, 1024  ;;  %p4300_p6 = scmp.lt.s32.totalorder %s337_s29, %s337_s29 }
  0xa5   : > { %p4293_p0 = scmp.ne.s32.totalorder %s337_s29, %s4292_s12  ;;  %p4301_p8 = scmp.lt.s32.totalorder %s4292_s12, %s4292_s12 }
  0xa7   : > { %p4295_p2 = pnand %p4293_p0, %p4768_p7  ;;  %p4302_p9 = por %p4301_p8, %p4300_p6 }
  0xa9   : > { %p4296_p4 = pneg %p4295_p2 }
  0xab   : > { %p4303_p10 = pnand %p4302_p9, %p4296_p4 }
  0xad   : > { %4306 = shalt.err (!%p4303_p10)
}
  0xae   : > { %s5785_s25 = smov 64   ;;  %s4606_s26 = smov [#allocation15]  }
  0xaf   : > { %3928 = dma.hbm_to_vmem [thread:$0]  (!%p4752_p5), %s5784_s4, 1024, %s337_s29, [#allocation11], %s5785_s25, %s5785_s25, %s5753_s20  }
  0xb0   : > { %s360_s19 = sshll.u32 %s4606_s26, 4  ;;  %s4607_s11 = smov [#allocation18]   ;;  %s361_s19 = int_to_ptr.vmem [resolvable:$true] %s360_s19 }
  0xb1   : > { %s384_s10 = sshll.u32 %s4607_s11, 4  ;;  %s5786_s6 = sld [smem:[#allocation42_spill]]  ;;  %s385_s10 = int_to_ptr.vmem [resolvable:$true] %s384_s10 }
  0xb7   : > { %s4307_s30 = scalar_lea.hbm %s5786_s6, 1024 }
  0xb8   : > { %p4308_p1 = scmp.ne.s32.totalorder %s5786_s6, %s4307_s30  ;;  %p4314_p12 = scmp.lt.u32.totalorder %s4307_s30, %s5786_s6 }
  0xba   : > { %p4310_p3 = pnand %p4308_p1, %p4768_p7 }
  0xbc   : > { %p4311_p11 = pneg %p4310_p3 }
  0xbe   : > { %p4316_p13 = pnand %p4314_p12, %p4311_p11 }
  0xc0   : > { %4319 = shalt.err (!%p4316_p13)
}
  0xc1   : > { %s4320_s29 = scalar_lea.vmem %s361_s19, 1024  ;;  %p4328_p6 = scmp.lt.s32.totalorder %s361_s19, %s361_s19 }
  0xc2   : > { %p4321_p0 = scmp.ne.s32.totalorder %s361_s19, %s4320_s29  ;;  %p4329_p8 = scmp.lt.s32.totalorder %s4320_s29, %s4320_s29 }
  0xc4   : > { %p4323_p2 = pnand %p4321_p0, %p4768_p7  ;;  %p4330_p9 = por %p4329_p8, %p4328_p6 }
  0xc6   : > { %p4324_p4 = pneg %p4323_p2 }
  0xc8   : > { %p4331_p10 = pnand %p4330_p9, %p4324_p4 }
  0xca   : > { %4334 = shalt.err (!%p4331_p10)
}
  0xcb   : > { %3934 = dma.hbm_to_vmem [thread:$0]  (!%p4752_p5), %s5786_s6, 1024, %s361_s19, [#allocation14], %s5785_s25, %s5785_s25, %s5753_s20  }
  0xcc   : > { %s5787_s8 = sld [smem:[#allocation44_spill]] }
  0xd2   : > { %s4335_s27 = scalar_lea.hbm %s5787_s8, 1024 }
  0xd3   : > { %p4336_p1 = scmp.ne.s32.totalorder %s5787_s8, %s4335_s27  ;;  %p4342_p12 = scmp.lt.u32.totalorder %s4335_s27, %s5787_s8 }
  0xd5   : > { %p4338_p3 = pnand %p4336_p1, %p4768_p7 }
  0xd7   : > { %p4339_p11 = pneg %p4338_p3 }
  0xd9   : > { %p4344_p13 = pnand %p4342_p12, %p4339_p11 }
  0xdb   : > { %4347 = shalt.err (!%p4344_p13)
}
  0xdc   : > { %s4348_s14 = scalar_lea.vmem %s385_s10, 1024  ;;  %p4356_p6 = scmp.lt.s32.totalorder %s385_s10, %s385_s10 }
  0xdd   : > { %p4349_p0 = scmp.ne.s32.totalorder %s385_s10, %s4348_s14  ;;  %p4357_p8 = scmp.lt.s32.totalorder %s4348_s14, %s4348_s14 }
  0xdf   : > { %p4351_p2 = pnand %p4349_p0, %p4768_p7  ;;  %p4358_p9 = por %p4357_p8, %p4356_p6 }
  0xe1   : > { %p4352_p4 = pneg %p4351_p2 }
  0xe3   : > { %p4359_p10 = pnand %p4358_p9, %p4352_p4 }
  0xe5   : > { %4362 = shalt.err (!%p4359_p10)
}
  0xe6   : > { %3940 = dma.hbm_to_vmem [thread:$0]  (!%p4752_p5), %s5787_s8, 1024, %s385_s10, [#allocation17], %s5785_s25, %s5785_s25, %s5753_s20  }
  0xe7   : > { %s4608_s2 = smov [#allocation19]   ;;  %s5788_s9 = sld [smem:[#allocation45_spill]] }
  0xe8   : > { %s398_s15 = sshll.u32 %s4608_s2, 4  ;;  %s399_s15 = int_to_ptr.vmem [resolvable:$true] %s398_s15 }
  0xed   : > { %s4363_s27 = scalar_lea.hbm %s5788_s9, 16 }
  0xee   : > { %p4364_p1 = scmp.ne.s32.totalorder %s5788_s9, %s4363_s27  ;;  %p4370_p12 = scmp.lt.u32.totalorder %s4363_s27, %s5788_s9 }
  0xf0   : > { %p4366_p3 = pnand %p4364_p1, %p4768_p7 }
  0xf2   : > { %p4367_p11 = pneg %p4366_p3 }
  0xf4   : > { %p4372_p13 = pnand %p4370_p12, %p4367_p11 }
  0xf6   : > { %4375 = shalt.err (!%p4372_p13)
}
  0xf7   : > { %s4376_s10 = scalar_lea.vmem %s399_s15, 16  ;;  %s4383_s14 = scalar_lea.vmem %s399_s15, 32 }
  0xf8   : > { %p4377_p0 = scmp.ne.s32.totalorder %s399_s15, %s4376_s10  ;;  %p4384_p6 = scmp.lt.s32.totalorder %s399_s15, %s399_s15 }
  0xf9   : > { %p4385_p8 = scmp.lt.s32.totalorder %s4383_s14, %s4376_s10 }
  0xfa   : > { %p4379_p2 = pnand %p4377_p0, %p4768_p7 }
  0xfb   : > { %p4386_p9 = por %p4385_p8, %p4384_p6 }
  0xfc   : > { %p4380_p4 = pneg %p4379_p2 }
  0xfe   : > { %p4387_p10 = pnand %p4386_p9, %p4380_p4 }
 0x100   : > { %4390 = shalt.err (!%p4387_p10)
}
 0x101   : > { %3943 = dma.hbm_to_vmem [thread:$0]  (!%p4752_p5), %s5788_s9, 16, %s399_s15, [#allocation20]  }
 0x102   : > { %s3565_s1 = sadd.s32 4294967294, %s4597_s23   ;;  %s42_s28 = sadd.s32 1, %s4589_s21 }
 0x103   : > { %p43_p7 = scmp.ge.s32.totalorder %s42_s28, 2  ;;  %s45_s2 = sadd.s32 1, %s4593_s22 }
 0x104   : > { %s54_s26 = sadd.s32 1, %s4577_s18  ;;  %p61_p1 = scmp.ne.s32.totalorder %s4577_s18, %s4573_s17 }
 0x105   : > { %s5844_s28 = smov (%p43_p7, %s42_s28), 0  ;;  %s5846_s2 = smov (!%p43_p7, %s45_s2), %s4593_s22 }
 0x106   : > { %s50_s11 = ssub.s32 %s4589_s21, %s5844_s28  ;;  %p5756_p3 = scmp.eq.s32.totalorder %s4597_s23, 0 }
 0x107   : > { %p47_p11 = scmp.ge.s32.totalorder %s5846_s2, 2  ;;  %p67_p12 = scmp.ne.s32.totalorder %s4573_s17, %s4569_s16 }
 0x108   : > { %p4950_p5 = por %p5756_p3, %p61_p1  ;;  %p287_p13 = scmp.eq.s32.totalorder %s4737_s24, 3 }
 0x109   : > { %s5848_s2 = smov (%p47_p11, %s5846_s2), 0  ;;  %p5790_p0 = scmp.eq.s32.totalorder %s4737_s24, 0 }
 0x10a   : > { %p4963_p4 = por %p287_p13, %p61_p1  ;;  %s4969_s30 = ssub.s32 %s4593_s22, %s5848_s2 }
 0x10b   : > { %p4959_p2 = por %p5790_p0, %p67_p12  ;;  %p293_p6 = scmp.eq.s32.totalorder %s3565_s1, 3 }
 0x10c   : > { %s5792_s13 = scalar_select %p4963_p4, 1, 0 }
 0x10d   : > { %s51_s0 = sor.u32 %s50_s11, %s4969_s30  ;;  %p4973_p10 = por %p293_p6, %p67_p12 }
 0x10e   : > { %p52_p9 = scmp.eq.s32.totalorder %s51_s0, 0  ;;  %p5755_p7 = scmp.lt.s32.totalorder %s4597_s23, 4 }
 0x10f   : > { %s5793_s12 = scalar_select %p4973_p10, 1, 0 }
 0x110   : > { %s409_s10 = sand.u32 1, %s4577_s18   ;;  %s3577_s29 = sshll.u32 %s4589_s21, 1 }
 0x111   : > { %s4980_s14 = scalar_select %p52_p9, %s4577_s18, %s54_s26  }
 0x112   : > { %s3576_s19 = sshll.u32 %s409_s10, 3  ;;  %s3578_s20 = sshll.u32 %s4593_s22, 2 }
 0x113   : > { %s413_s3 = scalar_lea.vmem [#allocation4], %s3576_s19  ;;  %s419_s5 = sadd.s32 %s3578_s20, %s3577_s29 }
 0x114   : > { %s422_s4 = sshll.u32 %s413_s3, 4  ;;  %s3579_s1 = sshll.u32 %s419_s5, 6  ;;  %s4984_s4 = int_to_ptr.vmem [resolvable:$true] %s422_s4 }
 0x115   : > { %p4990_p1 = pnand %p5755_p7, %p4950_p5  ;;  %s5795_s7 = sld [smem:[#allocation36_spill]] }
 0x116   : > { %s4999_s3 = scalar_lea.sflag [#allocation5], %s409_s10 }
 0x117   : > { %p4393_p12 = pneg %p4990_p1 }
 0x11b   : > { %s4997_s26 = scalar_lea.hbm %s5795_s7, %s3579_s1  ;;  %s4396_s15 = scalar_lea.hbm %s5795_s7, 512 }
 0x11c   : > { %s4391_s5 = scalar_lea.hbm %s4997_s26, 128  ;;  %p4397_p0 = scmp.lt.u32.totalorder %s4997_s26, %s5795_s7 }
 0x11d   : > { %p4392_p11 = scmp.ne.s32.totalorder %s4997_s26, %s4391_s5  ;;  %p4398_p6 = scmp.lt.u32.totalorder %s4396_s15, %s4391_s5 }
 0x11e   : > { %p4400_p7 = scmp.lt.u32.totalorder %s4391_s5, %s4997_s26 }
 0x11f   : > { %p4394_p5 = pnand %p4393_p12, %p4392_p11  ;;  %p4399_p9 = por %p4398_p6, %p4397_p0 }
 0x121   : > { %p4395_p13 = pneg %p4394_p5  ;;  %p4401_p3 = por %p4400_p7, %p4399_p9 }
 0x123   : > { %p4402_p8 = pnand %p4401_p3, %p4395_p13 }
 0x125   : > { %4405 = shalt.err (!%p4402_p8)
}
 0x126   : > { %s4406_s10 = scalar_lea.vmem %s4984_s4, 128  ;;  %s4609_s1 = smov [#allocation4]  }
 0x127   : > { %p4407_p11 = scmp.ne.s32.totalorder %s4984_s4, %s4406_s10  ;;  %s4411_s0 = sshll.u32 %s4609_s1, 4  ;;  %s4412_s0 = int_to_ptr.vmem [resolvable:$false] %s4411_s0 }
 0x128   : > { %s4413_s20 = scalar_lea.vmem %s4412_s0, 256  ;;  %p4414_p4 = scmp.lt.s32.totalorder %s4984_s4, %s4412_s0 }
 0x129   : > { %p4409_p5 = pnand %p4407_p11, %p4393_p12  ;;  %p4415_p0 = scmp.lt.s32.totalorder %s4413_s20, %s4406_s10 }
 0x12b   : > { %p4410_p10 = pneg %p4409_p5  ;;  %p4416_p6 = por %p4415_p0, %p4414_p4 }
 0x12d   : > { %p4417_p7 = pnand %p4416_p6, %p4410_p10 }
 0x12f   : > { %4420 = shalt.err (!%p4417_p7)
}
 0x130   : > { %s5796_s5 = smov 4   ;;  %s5797_s6 = sld [smem:[#allocation32_spill]] }
 0x131   : > { %s5798_s15 = sld [smem:[#allocation31_spill]]  ;;  %s5799_s19 = sld [smem:[#allocation30_spill]] }
 0x132   : > { %3947 = dma.hbm_to_vmem [thread:$0]  (!%p4990_p1), %s4997_s26, 128, %s4984_s4, %s4999_s3, %s5785_s25, %s5785_s25, %s5796_s5  }
 0x133   : > { %p5800_p4 = scmp.eq.s32.totalorder %s4969_s30, 0  ;;  %p5801_p8 = scmp.eq.s32.totalorder %s4597_s23, 0 }
 0x134   : > { %s432_s10 = sand.u32 1, %s4597_s23   ;;  %p5802_p13 = scmp.eq.s32.totalorder %s4737_s24, 0 }
 0x135   : > { %s3674_s7 = sshll.u32 %s4593_s22, 8  ;;  %s5804_s4 = sld [smem:[#allocation37_spill]] }
 0x136   : > { %s80_s11 = sadd.s32 1, %s5797_s6  ;;  %s434_s1 = sand.u32 1, %s5797_s6  }
 0x137   : > { %p87_p3 = scmp.ne.s32.totalorder %s5797_s6, %s5798_s15  ;;  %p93_p12 = scmp.ne.s32.totalorder %s5798_s15, %s5799_s19 }
 0x138   : > { %s5036_s29 = scalar_select %p5800_p4, %s5797_s6, %s80_s11  }
 0x139   : > { %p89_p10 = por %p87_p3, %p5801_p8  ;;  %p5046_p9 = por %p93_p12, %p5802_p13 }
 0x13a   : > { %s3580_s20 = sshll.u32 %s434_s1, 4  ;;  %p5805_p1 = scmp.lt.s32.totalorder %s4597_s23, 4 }
 0x13b   : > { %s5803_s0 = scalar_select %p5046_p9, 1, 0 }
 0x13c   : > { %s5054_s26 = scalar_lea.hbm %s5804_s4, %s3674_s7  ;;  %s436_s30 = scalar_lea.vmem [#allocation7], %s3580_s20 }
 0x13d   : > { %s443_s3 = sshll.u32 %s436_s30, 4  ;;  %p5058_p11 = pnand %p5805_p1, %p89_p10  ;;  %s5062_s3 = int_to_ptr.vmem [resolvable:$true] %s443_s3 }
 0x13e   : > { %s5064_s15 = scalar_lea.sflag [#allocation8], %s432_s10  ;;  %s4421_s8 = scalar_lea.hbm %s5054_s26, 256 }
 0x13f   : > { %p4422_p5 = scmp.ne.s32.totalorder %s5054_s26, %s4421_s8  ;;  %p4423_p0 = pneg %p5058_p11 }
 0x140   : > { %s4426_s19 = scalar_lea.hbm %s5804_s4, 512  ;;  %p4427_p3 = scmp.lt.u32.totalorder %s5054_s26, %s5804_s4 }
 0x141   : > { %p4424_p6 = pnand %p4423_p0, %p4422_p5  ;;  %p4428_p4 = scmp.lt.u32.totalorder %s4426_s19, %s4421_s8 }
 0x142   : > { %p4430_p10 = scmp.lt.u32.totalorder %s4421_s8, %s5054_s26 }
 0x143   : > { %p4425_p7 = pneg %p4424_p6  ;;  %p4429_p8 = por %p4428_p4, %p4427_p3 }
 0x145   : > { %p4431_p12 = por %p4430_p10, %p4429_p8 }
 0x147   : > { %p4432_p13 = pnand %p4431_p12, %p4425_p7 }
 0x149   : > { %4435 = shalt.err (!%p4432_p13)
}
 0x14a   : > { %s4436_s10 = scalar_lea.vmem %s5062_s3, 256  ;;  %s4610_s20 = smov [#allocation7]  }
 0x14b   : > { %p4437_p1 = scmp.ne.s32.totalorder %s5062_s3, %s4436_s10  ;;  %s4441_s30 = sshll.u32 %s4610_s20, 4  ;;  %s4442_s30 = int_to_ptr.vmem [resolvable:$false] %s4441_s30 }
 0x14c   : > { %s4443_s7 = scalar_lea.vmem %s4442_s30, 512  ;;  %p4444_p9 = scmp.lt.s32.totalorder %s5062_s3, %s4442_s30 }
 0x14d   : > { %p4439_p5 = pnand %p4437_p1, %p4423_p0  ;;  %p4445_p3 = scmp.lt.s32.totalorder %s4443_s7, %s4436_s10 }
 0x14f   : > { %p4440_p6 = pneg %p4439_p5  ;;  %p4446_p4 = por %p4445_p3, %p4444_p9 }
 0x151   : > { %p4447_p8 = pnand %p4446_p4, %p4440_p6 }
 0x153   : > { %4450 = shalt.err (!%p4447_p8)
}
 0x154   : > { %3950 = dma.hbm_to_vmem [thread:$0]  (!%p5058_p11), %s5054_s26, 256, %s5062_s3, %s5064_s15, %s5785_s25, %s5785_s25, %s5796_s5  }
 0x155   : > { %s5807_s8 = sld [smem:[#allocation35_spill]] }
 0x15b   : > { %p5808_p0 = scmp.ne.s32.totalorder %s5807_s8, 0 }
 0x15c   : > { %s5098_s9 = sand.u32 (!%p5808_p0), 1, %s4573_s17  }
 0x15d   : > { %455 = sbr.rel (%p5808_p0) target bundleno = 2404 (0x964), region = 60  ;;  %s3584_s19 = sshll.u32 (!%p5808_p0), %s5098_s9, 3 }
 0x15e   : > { %s458_s11 = scalar_lea.sflag (!%p5808_p0), [#allocation5], %s5098_s9  ;;  %s5102_s1 = scalar_lea.vmem (!%p5808_p0), [#allocation4], %s3584_s19 }
 0x164   : > { %4524 = dma.done.wait (%p4959_p2), %s458_s11, 128  }
 0x165   : > { %4526 = vsyncadd (%p4959_p2), %s458_s11, 4294967168  ;;  %s5809_s25 = sld [smem:[#allocation31_spill]]  ;;  %s466_s5 = sand.u32 1, %s4737_s24  }
 0x166   : > { %s467_s6 = scalar_lea.sflag [#allocation8], %s466_s5  ;;  %p5810_p9 = scmp.ne.s32.totalorder %s5803_s0, 0 }
 0x16b   : > { %s468_s26 = sand.u32 1, %s5809_s25  }
 0x16c   : > { %s5110_s3 = sshll.u32 %s468_s26, 4 }
 0x16d   : > { %s470_s15 = scalar_lea.vmem [#allocation7], %s5110_s3 }
 0x16e   : > { %4528 = dma.done.wait (%p5810_p9), %s467_s6, 256  }
 0x16f   : > { %4530 = vsyncadd (%p5810_p9), %s467_s6, 4294967040  ;;  %p5811_p11 = scmp.eq.s32.totalorder %s4737_s24, 0 }
 0x171   : > { %4532 = dma.done.wait (%p5811_p11), [#allocation8], 1024   ;;  %p5812_p2 = pmov %p5811_p11 }
 0x173   : > { %4534 = vsyncadd (%p5812_p2), [#allocation8], 4294966272  ;;  %p5813_p7 = pmov %p5812_p2 }
 0x174   : > { %p5814_p10 = pmov %p5812_p2 }
 0x175   : > { %4536 = dma.done.wait (%p5813_p7), [#allocation11], 1040  }
 0x176   : > { %4538 = vsyncadd (%p5814_p10), [#allocation11], 4294966256  ;;  %p5815_p12 = pmov %p5812_p2 }
 0x177   : > { %p5816_p13 = pmov %p5812_p2 }
 0x178   : > { %4540 = dma.done.wait (%p5815_p12), [#allocation14], 1040  }
 0x179   : > { %4542 = vsyncadd (%p5816_p13), [#allocation14], 4294966256  ;;  %p5817_p1 = pmov %p5812_p2 }
 0x17b   : > { %4544 = dma.done.wait (%p5817_p1), [#allocation17], 1040   ;;  %p5818_p5 = pmov %p5817_p1 }
 0x17c   : > { %p5819_p6 = pmov %p5817_p1 }
 0x17d   : > { %4546 = vsyncadd (%p5818_p5), [#allocation17], 4294966256 }
 0x17e   : > { %4548 = dma.done.wait (%p5819_p6), [#allocation20], 16   ;;  %p5820_p3 = pmov %p5817_p1 }
 0x17f   : > { %s3594_s27 = sshll.u32 %s5098_s9, 4  ;;  %s5821_s10 = sld [smem:[#allocation33_spill]] }
 0x180   : > { %4550 = vsyncadd (%p5820_p3), [#allocation20], 4294967280  ;;  %s5138_s0 = scalar_lea.vmem [#allocation21], %s3594_s27 }
 0x185   : > { %p3595_p4 = scmp.ne.s32.totalorder %s5821_s10, 0 }
 0x186   : > { %v4085_v0 = vld [vmem:[#allocation12] sm:$0xff] (!%p3595_p4)   ;;  %v4086_v1 = vld [vmem:[#allocation12 + $0x8] sm:$0xff] (!%p3595_p4)   ;;  %v4088_v3 = vld [vmem:[#allocation12 + $0x10] sm:$0xff] (!%p3595_p4)   ;;  %s4611_s24 = smov (!%p3595_p4), 64   ;;  %s4612_s20 = smov (!%p3595_p4), 96   ;;  %v852_v38 = vlaneseq (!%p3595_p4)  ;;  %vm1399_vm0 = vcmask (!%p3595_p4), 261120  }
 0x187   : > { %550 = sbr.rel (%p3595_p4) target bundleno = 842 (0x34a), region = 104  ;;  %3737 = vmatprep.subr.bf16.mxu0 (!%p3595_p4), %v4085_v0  ;;  %v4087_v2 = vld [vmem:[#allocation15] sm:$0xff] (!%p3595_p4)   ;;  %v4089_v4 = vld [vmem:[#allocation15 + $0x8] sm:$0xff] (!%p3595_p4)   ;;  %v4091_v5 = vld [vmem:[#allocation15 + $0x10] sm:$0xff] (!%p3595_p4)   ;;  %s4613_s30 = smov (!%p3595_p4), 32  }
 0x188   : > { %3738 = vmatpush3.bf16.msra.mxu0 (!%p3595_p4), %v4085_v0  ;;  %3757 = vmatprep.subr.bf16.mxu1 (!%p3595_p4), %v4087_v2  ;;  %v4090_v6 = vld [vmem:[#allocation12 + $0x18] sm:$0xff] (!%p3595_p4)   ;;  %v4092_v8 = vld [vmem:[#allocation12 + $0x20] sm:$0xff] (!%p3595_p4)   ;;  %v4094_v11 = vld [vmem:[#allocation12 + $0x28] sm:$0xff] (!%p3595_p4)   ;;  %v4614_v36 = vmov (!%p3595_p4), 1983009808   ;;  %v853_v42 = vshrl.u32 (!%p3595_p4), %v852_v38, 7 }
 0x189   : > { %3739 = vmatprep.subr.bf16.mxu0 (!%p3595_p4), %v4086_v1  ;;  %3758 = vmatpush3.bf16.msra.mxu1 (!%p3595_p4), %v4087_v2  ;;  %v4093_v7 = vld [vmem:[#allocation15 + $0x18] sm:$0xff] (!%p3595_p4)   ;;  %v4095_v9 = vld [vmem:[#allocation15 + $0x20] sm:$0xff] (!%p3595_p4)   ;;  %v4097_v12 = vld [vmem:[#allocation15 + $0x28] sm:$0xff] (!%p3595_p4)   ;;  %v850_v37 = vunpack.c.l.s4 (!%p3595_p4), %v4614_v36  ;;  %v4615_v39 = vmov (!%p3595_p4), 1934713408  }
 0x18a   : > { %3759 = vmatprep.subr.bf16.mxu1 (!%p3595_p4), %v4089_v4  ;;  %v4100_v10 = vld [vmem:[%s470_s15] sm:$0xff] (!%p3595_p4)   ;;  %v4101_v17 = vld [vmem:[%s470_s15 + $0x8] sm:$0xff] (!%p3595_p4)   ;;  %v882_v40 = vunpack.c.l.s4 (!%p3595_p4), %v4615_v39 }
 0x18b   : > { %3753 = vmatprep.mubr.bf16.mxu0 (!%p3595_p4), %v4100_v10  ;;  %3773 = vmatprep.mubr.bf16.mxu1 (!%p3595_p4), %v4100_v10  ;;  %v4096_v13 = vld [vmem:[#allocation12 + $0x30] sm:$0xff] (!%p3595_p4)   ;;  %v4098_v15 = vld [vmem:[#allocation12 + $0x38] sm:$0xff] (!%p3595_p4)   ;;  %v3596_v18 = vld [vmem:[#allocation13] ss:$0 sm:$0xff] (!%p3595_p4)  ;;  %v851_v41 = vunpack.c.0.s8 (!%p3595_p4), %v850_v37 }
 0x18c   : > { %3740 = vmatpush3.bf16.msra.mxu0 (!%p3595_p4), %v4086_v1  ;;  %v4099_v14 = vld [vmem:[#allocation15 + $0x30] sm:$0xff] (!%p3595_p4)   ;;  %v4102_v16 = vld [vmem:[#allocation15 + $0x38] sm:$0xff] (!%p3595_p4)   ;;  %v3607_v26 = vld [vmem:[#allocation16] ss:$0 sm:$0xff] (!%p3595_p4)  ;;  %v883_v45 = vunpack.c.0.s8 (!%p3595_p4), %v882_v40 }
 0x18d   : > { %3741 = vmatprep.subr.bf16.mxu0 (!%p3595_p4), %v4088_v3  ;;  %3760 = vmatpush3.bf16.msra.mxu1 (!%p3595_p4), %v4089_v4  ;;  %v5201_v46 = vsub.s32 (!%p3595_p4), %v851_v41, %v853_v42 }
 0x18e   : > { %3761 = vmatprep.subr.bf16.mxu1 %v4091_v5  ;;  %v5205_v53 = vsub.s32 %v883_v45, %v853_v42 }
 0x190   : > { %3742 = vmatpush3.bf16.msra.mxu0 %v4088_v3 }
 0x191   : > { %3743 = vmatprep.subr.bf16.mxu0 %v4090_v6  ;;  %3762 = vmatpush3.bf16.msra.mxu1 %v4091_v5 }
 0x192   : > { %3763 = vmatprep.subr.bf16.mxu1 %v4093_v7 }
 0x194   : > { %3744 = vmatpush3.bf16.msra.mxu0 %v4090_v6 }
 0x195   : > { %3745 = vmatprep.subr.bf16.mxu0 %v4092_v8  ;;  %3764 = vmatpush3.bf16.msra.mxu1 %v4093_v7 }
 0x196   : > { %3765 = vmatprep.subr.bf16.mxu1 %v4095_v9 }
 0x198   : > { %3746 = vmatpush3.bf16.msra.mxu0 %v4092_v8 }
 0x199   : > { %3747 = vmatprep.subr.bf16.mxu0 %v4094_v11  ;;  %3766 = vmatpush3.bf16.msra.mxu1 %v4095_v9 }
 0x19a   : > { %3767 = vmatprep.subr.bf16.mxu1 %v4097_v12 }
 0x19c   : > { %3748 = vmatpush3.bf16.msra.mxu0 %v4094_v11 }
 0x19d   : > { %3749 = vmatprep.subr.bf16.mxu0 %v4096_v13  ;;  %3768 = vmatpush3.bf16.msra.mxu1 %v4097_v12 }
 0x19e   : > { %3769 = vmatprep.subr.bf16.mxu1 %v4099_v14 }
 0x1a0   : > { %3750 = vmatpush3.bf16.msra.mxu0 %v4096_v13 }
 0x1a1   : > { %3751 = vmatprep.subr.bf16.mxu0 %v4098_v15  ;;  %3770 = vmatpush3.bf16.msra.mxu1 %v4099_v14 }
 0x1a2   : > { %3771 = vmatprep.subr.bf16.mxu1 %v4102_v16 }
 0x1a4   : > { %3752 = vmatpush3.bf16.msra.mxu0 %v4098_v15 }
 0x1a5   : > { %3772 = vmatpush3.bf16.msra.mxu1 %v4102_v16 }
 0x1a7   : > { %3754 = vmatmul.mubr.bf16.vlgmr.msra.gmra.mrb[0].mxu0 %v4101_v17 }
 0x1a8   : > { %3774 = vmatmul.mubr.bf16.vlgmr.msra.gmra.mrb[0].mxu1 %v4101_v17 }
 0x27a   : > { %v3755_v19 = vpop.f32.mrb[0].mxu0 }
 0x27b   : > { %v5145_v20 = vadd.f32 %v3755_v19, %v3596_v18  ;;  %v672_v21 = vpop.f32.mrb[1].mxu0  ;;  %v3775_v23 = vpop.f32.mrb[0].mxu1 }
 0x27c   : > { %v3756_v22 = vpop.f32.mrb[2].mxu0  ;;  %v792_v25 = vpop.f32.mrb[1].mxu1  ;;  %v5153_v30 = vadd.f32 %v3775_v23, %v3607_v26  ;;  %v5165_v31 = vadd.f32 %v3596_v18, %v672_v21 }
 0x27d   : > { %827 = vrot.lane.b32.xlu0 %v5145_v20, %s4611_s24  ;;  %815 = vrot.lane.b32.xlu1 %v5145_v20, %s4612_s20  ;;  %v675_v24 = vpop.f32.mrb[3].mxu0  ;;  %v3776_v27 = vpop.f32.mrb[2].mxu1  ;;  %v5151_v28 = vadd.f32 %v3756_v22, %v3596_v18  ;;  %v5182_v34 = vadd.f32 %v3607_v26, %v792_v25 }
 0x27e   : > { %v795_v29 = vpop.f32.mrb[3].mxu1  ;;  %v5167_v32 = vadd.f32 %v3776_v27, %v3607_v26  ;;  %v5177_v33 = vadd.f32 %v3596_v18, %v675_v24 }
 0x27f   : > { %v5187_v35 = vadd.f32 %v3607_v26, %v795_v29 }
 0x281   : > { %839 = vrot.lane.b32.xlu0 %v5145_v20, %s4613_s30  ;;  %817 = vrot.lane.b32.xlu1 %v5151_v28, %s4612_s20 }
 0x285   : > { %1416 = vrot.lane.b32.xlu0 %v5153_v30, %s4612_s20  ;;  %829 = vrot.lane.b32.xlu1 %v5151_v28, %s4611_s24 }
 0x289   : > { %1428 = vrot.lane.b32.xlu0 %v5153_v30, %s4611_s24  ;;  %841 = vrot.lane.b32.xlu1 %v5151_v28, %s4613_s30 }
 0x28d   : > { %1418 = vrot.lane.b32.xlu1 %v5167_v32, %s4612_s20  ;;  %811 = vrot.lane.b32.xlu0 %v5165_v31, %s4612_s20 }
 0x291   : > { %1430 = vrot.lane.b32.xlu1 %v5167_v32, %s4611_s24  ;;  %823 = vrot.lane.b32.xlu0 %v5165_v31, %s4611_s24 }
 0x295   : > { %825 = vrot.lane.b32.xlu1 %v5177_v33, %s4611_s24  ;;  %835 = vrot.lane.b32.xlu0 %v5165_v31, %s4613_s30 }
 0x299   : > { %837 = vrot.lane.b32.xlu1 %v5177_v33, %s4613_s30  ;;  %1412 = vrot.lane.b32.xlu0 %v5182_v34, %s4612_s20 }
 0x29d   : > { %1414 = vrot.lane.b32.xlu1 %v5187_v35, %s4612_s20  ;;  %1424 = vrot.lane.b32.xlu0 %v5182_v34, %s4611_s24 }
 0x2a1   : > { %1426 = vrot.lane.b32.xlu1 %v5187_v35, %s4611_s24  ;;  %1436 = vrot.lane.b32.xlu0 %v5182_v34, %s4613_s30 }
 0x2a5   : > { %1438 = vrot.lane.b32.xlu1 %v5187_v35, %s4613_s30  ;;  %813 = vrot.lane.b32.xlu0 %v5177_v33, %s4612_s20 }
 0x2a9   : > { %1442 = vrot.lane.b32.xlu1 %v5167_v32, %s4613_s30  ;;  %1440 = vrot.lane.b32.xlu0 %v5153_v30, %s4613_s30 }
 0x2ef   : > { %v828_v43 = vpop.permute.xlu0 %827  ;;  %v816_v44 = vpop.permute.xlu1 %815 }
 0x2f0   : > { %v983_v47 = vcombine.low %v5145_v20, %v828_v43  ;;  %v984_v48 = vcombine.high %v5145_v20, %v828_v43 }
 0x2f2   : > { %v991_v54 = vrot.slane %v983_v47, %v5201_v46  ;;  %v998_v55 = vrot.slane %v984_v48, %v5201_v46 }
 0x2f3   : > { %v840_v49 = vpop.permute.xlu0 %839  ;;  %v818_v50 = vpop.permute.xlu1 %817 }
 0x2f4   : > { %v999_v51 = vcombine.low %v816_v44, %v840_v49  ;;  %v1000_v52 = vcombine.high %v816_v44, %v840_v49 }
 0x2f6   : > { %v1007_v56 = vrot.slane %v999_v51, %v5201_v46  ;;  %v1014_v57 = vrot.slane %v1000_v52, %v5201_v46 }
 0x2f7   : > { %v5211_v58 = vpop.permute.xlu0 %1416  ;;  %v830_v59 = vpop.permute.xlu1 %829 }
 0x2f8   : > { %v1015_v60 = vcombine.low %v991_v54, %v1007_v56  ;;  %v1016_v61 = vcombine.high %v991_v54, %v1007_v56  ;;  %v1031_v62 = vcombine.low %v998_v55, %v1014_v57  ;;  %v1032_v63 = vcombine.high %v998_v55, %v1014_v57 }
 0x2f9   : > { %v1051_v0 = vcombine.low %v5151_v28, %v830_v59  ;;  %v1052_v1 = vcombine.high %v5151_v28, %v830_v59 }
 0x2fa   : > { %v1023_v2 = vrot.slane %v1015_v60, %v5205_v53  ;;  %v1030_v3 = vrot.slane %v1016_v61, %v5205_v53  ;;  %v1039_v4 = vrot.slane %v1031_v62, %v5205_v53  ;;  %v1046_v5 = vrot.slane %v1032_v63, %v5205_v53 }
 0x2fb   : > { %v1429_v6 = vpop.permute.xlu0 %1428  ;;  %v842_v7 = vpop.permute.xlu1 %841  ;;  %v1059_v12 = vrot.slane %v1051_v0, %v5201_v46  ;;  %v1066_v13 = vrot.slane %v1052_v1, %v5201_v46 }
 0x2fc   : > { %v1255_v8 = vcombine.low %v1023_v2, %v1030_v3  ;;  %v3620_v9 = vcombine.high %v1023_v2, %v1030_v3  ;;  %v1271_v10 = vcombine.low %v1039_v4, %v1046_v5  ;;  %v3621_v11 = vcombine.high %v1039_v4, %v1046_v5 }
 0x2fd   : > { %v1067_v14 = vcombine.low %v818_v50, %v842_v7  ;;  %v1068_v15 = vcombine.high %v818_v50, %v842_v7  ;;  %v1584_v20 = vcombine.low %v5153_v30, %v1429_v6  ;;  %v1585_v21 = vcombine.high %v5153_v30, %v1429_v6 }
 0x2fe   : > { %v1262_v16 = vrot.slane %v1255_v8, %v5201_v46  ;;  %v1270_v17 = vrot.slane %v3620_v9, %v5201_v46  ;;  %v1278_v18 = vrot.slane %v1271_v10, %v5201_v46  ;;  %v1286_v19 = vrot.slane %v3621_v11, %v5201_v46 }
 0x2ff   : > { %v1075_v22 = vrot.slane %v1067_v14, %v5201_v46  ;;  %v1082_v23 = vrot.slane %v1068_v15, %v5201_v46  ;;  %v5229_v24 = vpop.permute.xlu1 %1418  ;;  %v812_v25 = vpop.permute.xlu0 %811  ;;  %v5242_v50 = vrot.slane %v1584_v20, %v5201_v46  ;;  %v5245_v51 = vrot.slane %v1585_v21, %v5201_v46 }
 0x300   : > { %v1287_v26 = vcombine.low %v1262_v16, %v1270_v17  ;;  %v1288_v27 = vcombine.high %v1262_v16, %v1270_v17  ;;  %v1303_v28 = vcombine.low %v1278_v18, %v1286_v19  ;;  %v1304_v29 = vcombine.high %v1278_v18, %v1286_v19 }
 0x301   : > { %v1083_v36 = vcombine.low %v1059_v12, %v1075_v22  ;;  %v1084_v37 = vcombine.high %v1059_v12, %v1075_v22  ;;  %v1099_v38 = vcombine.low %v1066_v13, %v1082_v23  ;;  %v1100_v39 = vcombine.high %v1066_v13, %v1082_v23 }
 0x302   : > { %v1295_v40 = vrot.slane %v1287_v26, %v5205_v53  ;;  %v1311_v41 = vrot.slane %v1303_v28, %v5205_v53  ;;  %v1302_v48 = vrot.slane %v1288_v27, %v5205_v53  ;;  %v1318_v49 = vrot.slane %v1304_v29, %v5205_v53 }
 0x303   : > { %v1091_v30 = vrot.slane %v1083_v36, %v5205_v53  ;;  %v1098_v42 = vrot.slane %v1084_v37, %v5205_v53  ;;  %v1107_v43 = vrot.slane %v1099_v38, %v5205_v53  ;;  %v1114_v44 = vrot.slane %v1100_v39, %v5205_v53  ;;  %v5237_v45 = vpop.permute.xlu1 %1430  ;;  %v824_v47 = vpop.permute.xlu0 %823 }
 0x304   : > { %v1319_v57 = vcombine.low %v1295_v40, %v1311_v41  ;;  %v1320_v59 = vcombine.high %v1295_v40, %v1311_v41  ;;  %v847_v60 = vcombine.low %v5165_v31, %v824_v47  ;;  %v848_v61 = vcombine.high %v5165_v31, %v824_v47 }
 0x305   : > { %v1323_v52 = vcombine.low %v1091_v30, %v1098_v42  ;;  %v3622_v54 = vcombine.high %v1091_v30, %v1098_v42  ;;  %v1339_v55 = vcombine.low %v1107_v43, %v1114_v44  ;;  %v3623_v56 = vcombine.high %v1107_v43, %v1114_v44 }
 0x306   : > { %v1321_v4 = vcombine.low %v1302_v48, %v1318_v49  ;;  %v1322_v5 = vcombine.high %v1302_v48, %v1318_v49  ;;  %v1652_v6 = vcombine.low %v5167_v32, %v5237_v45  ;;  %v1653_v7 = vcombine.high %v5167_v32, %v5237_v45 }
 0x307   : > { %v1330_v62 = vrot.slane %v1323_v52, %v5201_v46  ;;  %v1338_v63 = vrot.slane %v3622_v54, %v5201_v46  ;;  %v1346_v0 = vrot.slane %v1339_v55, %v5201_v46  ;;  %v1354_v1 = vrot.slane %v3623_v56, %v5201_v46  ;;  %v826_v2 = vpop.permute.xlu1 %825  ;;  %v836_v3 = vpop.permute.xlu0 %835 }
 0x308   : > { %v855_v11 = vrot.slane %v847_v60, %v5201_v46  ;;  %v862_v12 = vrot.slane %v848_v61, %v5201_v46  ;;  %v863_v13 = vcombine.low %v812_v25, %v836_v3  ;;  %v864_v14 = vcombine.high %v812_v25, %v836_v3 }
 0x309   : > { %v1355_v8 = vcombine.low %v1330_v62, %v1338_v63  ;;  %v1356_v31 = vcombine.high %v1330_v62, %v1338_v63  ;;  %v1371_v9 = vcombine.low %v1346_v0, %v1354_v1  ;;  %v1372_v10 = vcombine.high %v1346_v0, %v1354_v1 }
 0x30a   : > { %v915_v20 = vcombine.low %v5177_v33, %v826_v2  ;;  %v916_v21 = vcombine.high %v5177_v33, %v826_v2  ;;  %v871_v22 = vrot.slane %v863_v13, %v5201_v46  ;;  %v878_v23 = vrot.slane %v864_v14, %v5201_v46 }
 0x30b   : > { %v1363_v15 = vrot.slane %v1355_v8, %v5205_v53  ;;  %v1370_v16 = vrot.slane %v1356_v31, %v5205_v53  ;;  %v1379_v17 = vrot.slane %v1371_v9, %v5205_v53  ;;  %v1386_v18 = vrot.slane %v1372_v10, %v5205_v53  ;;  %v5263_v19 = vpop.permute.xlu1 %837  ;;  %v1413_v32 = vpop.permute.xlu0 %1412 }
 0x30c   : > { %v879_v29 = vcombine.low %v855_v11, %v871_v22  ;;  %v880_v36 = vcombine.high %v855_v11, %v871_v22  ;;  %v895_v37 = vcombine.low %v862_v12, %v878_v23  ;;  %v896_v38 = vcombine.high %v862_v12, %v878_v23 }
 0x30d   : > { %v1387_v25 = vcombine.low %v1363_v15, %v1379_v17  ;;  %v1388_v26 = vcombine.high %v1363_v15, %v1379_v17  ;;  %v1389_v27 = vcombine.low %v1370_v16, %v1386_v18  ;;  %v1390_v28 = vcombine.high %v1370_v16, %v1386_v18 }
 0x30e   : > { %v887_v33 = vrot.slane %v879_v29, %v5205_v53  ;;  %v894_v44 = vrot.slane %v880_v36, %v5205_v53  ;;  %v903_v45 = vrot.slane %v895_v37, %v5205_v53  ;;  %v910_v47 = vrot.slane %v896_v38, %v5205_v53 }
 0x30f   : > { %v1392_v39 = vpack.c.bf16 %v1387_v25, %v1319_v57  ;;  %v1394_v40 = vpack.c.bf16 %v1388_v26, %v1320_v59  ;;  %v1396_v41 = vpack.c.bf16 %v1389_v27, %v1321_v4  ;;  %v1398_v30 = vpack.c.bf16 %v1390_v28, %v1322_v5  ;;  %v5269_v42 = vpop.permute.xlu1 %1414  ;;  %v1425_v43 = vpop.permute.xlu0 %1424 }
 0x310   : > { %v5280_v48 = vrot.slane %v1652_v6, %v5201_v46  ;;  %v5283_v49 = vrot.slane %v1653_v7, %v5201_v46  ;;  %v1448_v52 = vcombine.low %v5182_v34, %v1425_v43  ;;  %v1449_v54 = vcombine.high %v5182_v34, %v1425_v43 }
 0x311   : > { %1401 = vst.msk [vmem:[#allocation2 + $0x8] sm:$0xff] %vm1399_vm0, %v1392_v39  ;;  %1403 = vst.msk [vmem:[#allocation2 + $0x18] sm:$0xff] %vm1399_vm0, %v1394_v40  ;;  %v1119_v55 = vcombine.low %v887_v33, %v894_v44  ;;  %v3616_v56 = vcombine.high %v887_v33, %v894_v44  ;;  %v1135_v57 = vcombine.low %v903_v45, %v910_v47 }
 0x312   : > { %1405 = vst.msk [vmem:[#allocation2 + $0x28] sm:$0xff] %vm1399_vm0, %v1396_v41  ;;  %1407 = vst.msk [vmem:[#allocation2 + $0x38] sm:$0xff] %vm1399_vm0, %v1398_v30  ;;  %v3617_v59 = vcombine.high %v903_v45, %v910_v47  ;;  %v5288_v60 = vrot.slane %v915_v20, %v5201_v46  ;;  %v5291_v61 = vrot.slane %v916_v21, %v5201_v46 }
 0x313   : > { %v1456_v62 = vrot.slane %v1448_v52, %v5201_v46  ;;  %v1463_v63 = vrot.slane %v1449_v54, %v5201_v46  ;;  %v1427_v0 = vpop.permute.xlu1 %1426  ;;  %v1437_v1 = vpop.permute.xlu0 %1436  ;;  %v1126_v2 = vrot.slane %v1119_v55, %v5201_v46  ;;  %v1134_v34 = vrot.slane %v3616_v56, %v5201_v46 }
 0x314   : > { %v1142_v3 = vrot.slane %v1135_v57, %v5201_v46  ;;  %v1150_v4 = vrot.slane %v3617_v59, %v5201_v46  ;;  %v1516_v5 = vcombine.low %v5187_v35, %v1427_v0  ;;  %v1517_v6 = vcombine.high %v5187_v35, %v1427_v0 }
 0x315   : > { %v1464_v7 = vcombine.low %v1413_v32, %v1437_v1  ;;  %v1465_v8 = vcombine.high %v1413_v32, %v1437_v1  ;;  %v1151_v31 = vcombine.low %v1126_v2, %v1134_v34  ;;  %v1152_v9 = vcombine.high %v1126_v2, %v1134_v34 }
 0x316   : > { %v1167_v10 = vcombine.low %v1142_v3, %v1150_v4  ;;  %v1168_v11 = vcombine.high %v1142_v3, %v1150_v4  ;;  %v1524_v12 = vrot.slane %v1516_v5, %v5201_v46  ;;  %v1531_v13 = vrot.slane %v1517_v6, %v5201_v46 }
 0x317   : > { %v1472_v14 = vrot.slane %v1464_v7, %v5201_v46  ;;  %v1479_v15 = vrot.slane %v1465_v8, %v5201_v46  ;;  %v5306_v16 = vrot.slane %v1151_v31, %v5205_v53  ;;  %v5309_v17 = vrot.slane %v1152_v9, %v5205_v53  ;;  %v1439_v23 = vpop.permute.xlu1 %1438  ;;  %v814_v25 = vpop.permute.xlu0 %813 }
 0x318   : > { %v5312_v35 = vrot.slane %v1167_v10, %v5205_v53  ;;  %v5315_v18 = vrot.slane %v1168_v11, %v5205_v53  ;;  %v1532_v40 = vcombine.low %v5269_v42, %v1439_v23  ;;  %v1533_v41 = vcombine.high %v5269_v42, %v1439_v23 }
 0x319   : > { %v1480_v32 = vcombine.low %v1456_v62, %v1472_v14  ;;  %v1481_v20 = vcombine.high %v1456_v62, %v1472_v14  ;;  %v1496_v21 = vcombine.low %v1463_v63, %v1479_v15  ;;  %v1497_v22 = vcombine.high %v1463_v63, %v1479_v15 }
 0x31a   : > { %v1183_v26 = vcombine.low %v5306_v16, %v5312_v35  ;;  %v1184_v27 = vcombine.high %v5306_v16, %v5312_v35  ;;  %v1185_v28 = vcombine.low %v5309_v17, %v5315_v18  ;;  %v1186_v29 = vcombine.high %v5309_v17, %v5315_v18 }
 0x31b   : > { %v1488_v36 = vrot.slane %v1480_v32, %v5205_v53  ;;  %v1495_v37 = vrot.slane %v1481_v20, %v5205_v53  ;;  %v1504_v38 = vrot.slane %v1496_v21, %v5205_v53  ;;  %v1511_v39 = vrot.slane %v1497_v22, %v5205_v53 }
 0x31c   : > { %v931_v30 = vcombine.low %v814_v25, %v5263_v19  ;;  %v932_v43 = vcombine.high %v814_v25, %v5263_v19  ;;  %v1540_v52 = vrot.slane %v1532_v40, %v5201_v46  ;;  %v1547_v54 = vrot.slane %v1533_v41, %v5201_v46 }
 0x31d   : > { %v1720_v33 = vcombine.low %v1488_v36, %v1495_v37  ;;  %v3624_v44 = vcombine.high %v1488_v36, %v1495_v37  ;;  %v1736_v45 = vcombine.low %v1504_v38, %v1511_v39  ;;  %v3625_v47 = vcombine.high %v1504_v38, %v1511_v39 }
 0x31e   : > { %v939_v55 = vrot.slane %v931_v30, %v5201_v46  ;;  %v946_v56 = vrot.slane %v932_v43, %v5201_v46  ;;  %v1548_v62 = vcombine.low %v1524_v12, %v1540_v52  ;;  %v1549_v63 = vcombine.high %v1524_v12, %v1540_v52 }
 0x31f   : > { %v1727_v57 = vrot.slane %v1720_v33, %v5201_v46  ;;  %v1735_v42 = vrot.slane %v3624_v44, %v5201_v46  ;;  %v1743_v59 = vrot.slane %v1736_v45, %v5201_v46  ;;  %v1751_v19 = vrot.slane %v3625_v47, %v5201_v46 }
 0x320   : > { %v1564_v0 = vcombine.low %v1531_v13, %v1547_v54  ;;  %v1565_v1 = vcombine.high %v1531_v13, %v1547_v54  ;;  %v1556_v5 = vrot.slane %v1548_v62, %v5205_v53  ;;  %v1563_v6 = vrot.slane %v1549_v63, %v5205_v53 }
 0x321   : > { %v1752_v2 = vcombine.low %v1727_v57, %v1735_v42  ;;  %v1753_v34 = vcombine.high %v1727_v57, %v1735_v42  ;;  %v1768_v3 = vcombine.low %v1743_v59, %v1751_v19  ;;  %v1769_v4 = vcombine.high %v1743_v59, %v1751_v19 }
 0x322   : > { %v1572_v7 = vrot.slane %v1564_v0, %v5205_v53  ;;  %v1579_v8 = vrot.slane %v1565_v1, %v5205_v53  ;;  %v1788_v12 = vcombine.low %v1556_v5, %v1563_v6  ;;  %v3626_v13 = vcombine.high %v1556_v5, %v1563_v6  ;;  %v1443_v5 = vpop.permute.xlu1 %1442  ;;  %v1441_v6 = vpop.permute.xlu0 %1440 }
 0x323   : > { %v1760_v31 = vrot.slane %v1752_v2, %v5205_v53  ;;  %v1767_v9 = vrot.slane %v1753_v34, %v5205_v53  ;;  %v1776_v10 = vrot.slane %v1768_v3, %v5205_v53  ;;  %v1783_v11 = vrot.slane %v1769_v4, %v5205_v53 }
 0x324   : > { %v1804_v14 = vcombine.low %v1572_v7, %v1579_v8  ;;  %v3627_v15 = vcombine.high %v1572_v7, %v1579_v8  ;;  %v1795_v23 = vrot.slane %v1788_v12, %v5201_v46  ;;  %v1803_v25 = vrot.slane %v3626_v13, %v5201_v46 }
 0x325   : > { %v1784_v32 = vcombine.low %v1760_v31, %v1776_v10  ;;  %v1785_v20 = vcombine.high %v1760_v31, %v1776_v10  ;;  %v1786_v21 = vcombine.low %v1767_v9, %v1783_v11  ;;  %v1787_v22 = vcombine.high %v1767_v9, %v1783_v11 }
 0x326   : > { %v1811_v36 = vrot.slane %v1804_v14, %v5201_v46  ;;  %v1819_v37 = vrot.slane %v3627_v15, %v5201_v46  ;;  %v947_v38 = vcombine.low %v5288_v60, %v939_v55  ;;  %v948_v39 = vcombine.high %v5288_v60, %v939_v55 }
 0x327   : > { %v963_v40 = vcombine.low %v5291_v61, %v946_v56  ;;  %v964_v41 = vcombine.high %v5291_v61, %v946_v56  ;;  %v1820_v30 = vcombine.low %v1795_v23, %v1803_v25  ;;  %v1821_v43 = vcombine.high %v1795_v23, %v1803_v25 }
 0x328   : > { %v1836_v33 = vcombine.low %v1811_v36, %v1819_v37  ;;  %v1837_v44 = vcombine.high %v1811_v36, %v1819_v37  ;;  %v955_v45 = vrot.slane %v947_v38, %v5205_v53  ;;  %v962_v47 = vrot.slane %v948_v39, %v5205_v53 }
 0x329   : > { %v971_v52 = vrot.slane %v963_v40, %v5205_v53  ;;  %v978_v54 = vrot.slane %v964_v41, %v5205_v53  ;;  %v1828_v57 = vrot.slane %v1820_v30, %v5205_v53  ;;  %v1835_v60 = vrot.slane %v1821_v43, %v5205_v53 }
 0x32a   : > { %v1844_v55 = vrot.slane %v1836_v33, %v5205_v53  ;;  %v1851_v61 = vrot.slane %v1837_v44, %v5205_v53  ;;  %v1187_v56 = vcombine.low %v955_v45, %v962_v47  ;;  %v3618_v42 = vcombine.high %v955_v45, %v962_v47 }
 0x32b   : > { %v1203_v59 = vcombine.low %v971_v52, %v978_v54  ;;  %v3619_v19 = vcombine.high %v971_v52, %v978_v54  ;;  %v1668_v14 = vcombine.low %v5229_v24, %v1443_v5  ;;  %v1669_v15 = vcombine.high %v5229_v24, %v1443_v5 }
 0x32c   : > { %v1852_v62 = vcombine.low %v1828_v57, %v1844_v55  ;;  %v1853_v63 = vcombine.high %v1828_v57, %v1844_v55  ;;  %v1854_v0 = vcombine.low %v1835_v60, %v1851_v61  ;;  %v1855_v1 = vcombine.high %v1835_v60, %v1851_v61 }
 0x32d   : > { %v1194_v2 = vrot.slane %v1187_v56, %v5201_v46  ;;  %v1202_v34 = vrot.slane %v3618_v42, %v5201_v46  ;;  %v1210_v3 = vrot.slane %v1203_v59, %v5201_v46  ;;  %v1218_v4 = vrot.slane %v3619_v19, %v5201_v46 }
 0x32e   : > { %v1992_v7 = vpack.c.bf16 %v1852_v62, %v1784_v32  ;;  %v1994_v8 = vpack.c.bf16 %v1853_v63, %v1785_v20  ;;  %v1996_v31 = vpack.c.bf16 %v1854_v0, %v1786_v21  ;;  %v1998_v9 = vpack.c.bf16 %v1855_v1, %v1787_v22 }
 0x32f   : > { %v1219_v10 = vcombine.low %v1194_v2, %v1202_v34  ;;  %v1220_v11 = vcombine.high %v1194_v2, %v1202_v34  ;;  %v1235_v12 = vcombine.low %v1210_v3, %v1218_v4  ;;  %v1236_v13 = vcombine.high %v1210_v3, %v1218_v4 }
 0x330   : > { %2000 = vst.msk [vmem:[#allocation3] sm:$0xff] %vm1399_vm0, %v1992_v7  ;;  %2002 = vst.msk [vmem:[#allocation3 + $0x10] sm:$0xff] %vm1399_vm0, %v1994_v8  ;;  %v1600_v32 = vcombine.low %v5211_v58, %v1441_v6  ;;  %v1601_v20 = vcombine.high %v5211_v58, %v1441_v6  ;;  %v1676_v36 = vrot.slane %v1668_v14, %v5201_v46 }
 0x331   : > { %2004 = vst.msk [vmem:[#allocation3 + $0x20] sm:$0xff] %vm1399_vm0, %v1996_v31  ;;  %2006 = vst.msk [vmem:[#allocation3 + $0x30] sm:$0xff] %vm1399_vm0, %v1998_v9  ;;  %v1227_v21 = vrot.slane %v1219_v10, %v5205_v53  ;;  %v1234_v22 = vrot.slane %v1220_v11, %v5205_v53  ;;  %v1243_v23 = vrot.slane %v1235_v12, %v5205_v53 }
 0x332   : > { %v1250_v25 = vrot.slane %v1236_v13, %v5205_v53  ;;  %v1683_v37 = vrot.slane %v1669_v15, %v5201_v46  ;;  %v1608_v38 = vrot.slane %v1600_v32, %v5201_v46  ;;  %v1615_v24 = vrot.slane %v1601_v20, %v5201_v46 }
 0x333   : > { %v1251_v39 = vcombine.low %v1227_v21, %v1243_v23  ;;  %v1252_v40 = vcombine.high %v1227_v21, %v1243_v23  ;;  %v1684_v30 = vcombine.low %v5280_v48, %v1676_v36  ;;  %v1685_v43 = vcombine.high %v5280_v48, %v1676_v36 }
 0x334   : > { %v1253_v41 = vcombine.low %v1234_v22, %v1250_v25  ;;  %v1254_v58 = vcombine.high %v1234_v22, %v1250_v25  ;;  %v1700_v33 = vcombine.low %v5283_v49, %v1683_v37  ;;  %v1701_v44 = vcombine.high %v5283_v49, %v1683_v37 }
 0x335   : > { %v1391_v45 = vpack.c.bf16 %v1251_v39, %v1183_v26  ;;  %v1393_v47 = vpack.c.bf16 %v1252_v40, %v1184_v27  ;;  %v1692_v54 = vrot.slane %v1684_v30, %v5205_v53  ;;  %v1699_v49 = vrot.slane %v1685_v43, %v5205_v53 }
 0x336   : > { %v1395_v52 = vpack.c.bf16 %v1253_v41, %v1185_v28  ;;  %v1397_v48 = vpack.c.bf16 %v1254_v58, %v1186_v29  ;;  %v1708_v57 = vrot.slane %v1700_v33, %v5205_v53  ;;  %v1715_v26 = vrot.slane %v1701_v44, %v5205_v53 }
 0x337   : > { %1400 = vst.msk [vmem:[#allocation2] sm:$0xff] %vm1399_vm0, %v1391_v45  ;;  %1402 = vst.msk [vmem:[#allocation2 + $0x10] sm:$0xff] %vm1399_vm0, %v1393_v47  ;;  %v1616_v16 = vcombine.low %v5242_v50, %v1608_v38  ;;  %v1617_v17 = vcombine.high %v5242_v50, %v1608_v38  ;;  %v1632_v35 = vcombine.low %v5245_v51, %v1615_v24 }
 0x338   : > { %1404 = vst.msk [vmem:[#allocation2 + $0x20] sm:$0xff] %vm1399_vm0, %v1395_v52  ;;  %1406 = vst.msk [vmem:[#allocation2 + $0x30] sm:$0xff] %vm1399_vm0, %v1397_v48  ;;  %v1633_v18 = vcombine.high %v5245_v51, %v1615_v24  ;;  %v1924_v27 = vcombine.low %v1692_v54, %v1699_v49  ;;  %v3630_v28 = vcombine.high %v1692_v54, %v1699_v49 }
 0x339   : > { %v1940_v29 = vcombine.low %v1708_v57, %v1715_v26  ;;  %v3631_v60 = vcombine.high %v1708_v57, %v1715_v26  ;;  %v1624_v55 = vrot.slane %v1616_v16, %v5205_v53  ;;  %v1631_v61 = vrot.slane %v1617_v17, %v5205_v53 }
 0x33a   : > { %v1640_v56 = vrot.slane %v1632_v35, %v5205_v53  ;;  %v1647_v42 = vrot.slane %v1633_v18, %v5205_v53  ;;  %v1931_v59 = vrot.slane %v1924_v27, %v5201_v46  ;;  %v1939_v50 = vrot.slane %v3630_v28, %v5201_v46 }
 0x33b   : > { %v1947_v19 = vrot.slane %v1940_v29, %v5201_v46  ;;  %v1955_v51 = vrot.slane %v3631_v60, %v5201_v46  ;;  %v1856_v62 = vcombine.low %v1624_v55, %v1631_v61  ;;  %v3628_v63 = vcombine.high %v1624_v55, %v1631_v61 }
 0x33c   : > { %v1872_v0 = vcombine.low %v1640_v56, %v1647_v42  ;;  %v3629_v1 = vcombine.high %v1640_v56, %v1647_v42  ;;  %v1956_v2 = vcombine.low %v1931_v59, %v1939_v50  ;;  %v1957_v34 = vcombine.high %v1931_v59, %v1939_v50 }
 0x33d   : > { %v1972_v3 = vcombine.low %v1947_v19, %v1955_v51  ;;  %v1973_v4 = vcombine.high %v1947_v19, %v1955_v51  ;;  %v1863_v5 = vrot.slane %v1856_v62, %v5201_v46  ;;  %v1871_v6 = vrot.slane %v3628_v63, %v5201_v46 }
 0x33e   : > { %v1879_v7 = vrot.slane %v1872_v0, %v5201_v46  ;;  %v1887_v8 = vrot.slane %v3629_v1, %v5201_v46  ;;  %v1964_v31 = vrot.slane %v1956_v2, %v5205_v53  ;;  %v1971_v9 = vrot.slane %v1957_v34, %v5205_v53 }
 0x33f   : > { %v1980_v10 = vrot.slane %v1972_v3, %v5205_v53  ;;  %v1987_v11 = vrot.slane %v1973_v4, %v5205_v53  ;;  %v1888_v12 = vcombine.low %v1863_v5, %v1871_v6  ;;  %v1889_v13 = vcombine.high %v1863_v5, %v1871_v6 }
 0x340   : > { %v1904_v14 = vcombine.low %v1879_v7, %v1887_v8  ;;  %v1905_v15 = vcombine.high %v1879_v7, %v1887_v8 }
 0x341   : > { %v1988_v32 = vcombine.low %v1964_v31, %v1980_v10  ;;  %v1989_v20 = vcombine.high %v1964_v31, %v1980_v10  ;;  %v1990_v21 = vcombine.low %v1971_v9, %v1987_v11  ;;  %v1991_v22 = vcombine.high %v1971_v9, %v1987_v11 }
 0x342   : > { %v1896_v23 = vrot.slane %v1888_v12, %v5205_v53  ;;  %v1903_v46 = vrot.slane %v1889_v13, %v5205_v53  ;;  %v1912_v25 = vrot.slane %v1904_v14, %v5205_v53  ;;  %v1919_v36 = vrot.slane %v1905_v15, %v5205_v53 }
 0x344   : > { %v1920_v37 = vcombine.low %v1896_v23, %v1912_v25  ;;  %v1921_v38 = vcombine.high %v1896_v23, %v1912_v25  ;;  %v1922_v24 = vcombine.low %v1903_v46, %v1919_v36  ;;  %v1923_v39 = vcombine.high %v1903_v46, %v1919_v36 }
 0x346   : > { %v1993_v40 = vpack.c.bf16 %v1988_v32, %v1920_v37  ;;  %v1995_v41 = vpack.c.bf16 %v1989_v20, %v1921_v38  ;;  %v1997_v58 = vpack.c.bf16 %v1990_v21, %v1922_v24  ;;  %v1999_v30 = vpack.c.bf16 %v1991_v22, %v1923_v39 }
 0x348   : > { %2001 = vst.msk [vmem:[#allocation3 + $0x8] sm:$0xff] %vm1399_vm0, %v1993_v40  ;;  %2003 = vst.msk [vmem:[#allocation3 + $0x18] sm:$0xff] %vm1399_vm0, %v1995_v41 }
 0x349   : > { %2005 = vst.msk [vmem:[#allocation3 + $0x28] sm:$0xff] %vm1399_vm0, %v1997_v58  ;;  %2007 = vst.msk [vmem:[#allocation3 + $0x38] sm:$0xff] %vm1399_vm0, %v1999_v30 }
 0x34a PF: > { %v4118_v43 = vld [vmem:[#allocation9] sm:$0xff]   ;;  %v4616_v33 = vmov 0.0   ;;  %v4119_v53 = vld [vmem:[#allocation9 + $0x8] sm:$0xff]   ;;  %vm4617_vm1 = vmmov 0   ;;  %v4120_v44 = vld [vmem:[#allocation9 + $0x10] sm:$0xff]   ;;  %vm2442_vm2 = vcmask 261120   ;;  %v2155_v50 = vlaneseq }
 0x34b   : > { %3777 = vmatprep.subr.bf16.mxu0 %v4616_v33  ;;  %3797 = vmatprep.subr.bf16.mxu1 %v4616_v33  ;;  %v4121_v45 = vld [vmem:[#allocation9 + $0x18] sm:$0xff]   ;;  %v4122_v47 = vld [vmem:[#allocation9 + $0x20] sm:$0xff]   ;;  %v4123_v52 = vld [vmem:[#allocation9 + $0x28] sm:$0xff]   ;;  %s4618_s7 = smov 64   ;;  %s4619_s8 = smov 96   ;;  %vm3238_vm9 = vcmask 523264  }
 0x34c   : > { %3778 = vmatpush3.bf16.msra.mxu0 %v4118_v43  ;;  %3793 = vmatprep.mubr.msk.bf16.mxu0 %vm4617_vm1, %v4616_v33  ;;  %v4124_v48 = vld [vmem:[#allocation9 + $0x30] sm:$0xff]   ;;  %v4125_v54 = vld [vmem:[#allocation9 + $0x38] sm:$0xff]   ;;  %v3632_v57 = vld [vmem:[#allocation10] ss:$0 sm:$0xff]  ;;  %s4620_s19 = smov 32   ;;  %v5465_v1 = vshrl.u32 %v2155_v50, 7 }
 0x34d   : > { %3779 = vmatprep.subr.bf16.mxu0 %v4616_v33  ;;  %3801 = vmatprep.mubr.msk.bf16.mxu1 %vm4617_vm1, %v4616_v33  ;;  %v4126_v49 = vld [vmem:[%s5102_s1] sm:$0xff]   ;;  %v4621_v42 = vmov 1983009808   ;;  %v4622_v62 = vmov 1934713408   ;;  %s5822_s11 = sld [smem:[#allocation33_spill]] }
 0x34e   : > { %v2426_v29 = vld [vmem:[#allocation2] sm:$0xff]  ;;  %v2427_v61 = vld [vmem:[#allocation2 + $0x8] sm:$0xff]  ;;  %v2153_v59 = vunpack.c.l.s4 %v4621_v42  ;;  %v2185_v63 = vunpack.c.l.s4 %v4622_v62  ;;  %s5827_s25 = sld [smem:[#allocation34_spill]]  ;;  %vm3241_vm10 = vcmask 785408   ;;  %s3375_s15 = sshll.u32 %s5138_s0, 4  ;;  %s5666_s15 = int_to_ptr.vmem [resolvable:$true] %s3375_s15 }
 0x34f   : > { %v2447_v60 = vsel %vm2442_vm2, %v2426_v29, 0  ;;  %v2450_v56 = vsel %vm2442_vm2, %v2427_v61, 0  ;;  %s5828_s24 = sld [smem:[#allocation46_spill]]  ;;  %s3360_s30 = scalar_lea.sflag [#allocation6], %s5098_s9 }
 0x350   : > { %3780 = vmatpush3.bf16.msra.mxu0 %v4119_v53  ;;  %3798 = vmatpush3.bf16.xpose.msra.mxu1 %v2447_v60  ;;  %v2154_v0 = vunpack.c.0.s8 %v2153_v59  ;;  %v2186_v5 = vunpack.c.0.s8 %v2185_v63  ;;  %p5829_p0 = scmp.ne.s32.totalorder %s5792_s13, 0 }
 0x351   : > { %3781 = vmatprep.subr.bf16.mxu0 %v4616_v33  ;;  %3799 = vmatprep.subr.bf16.mxu1 %v4616_v33 }
 0x352   : > { %v5468_v6 = vsub.s32 %v2154_v0, %v5465_v1  ;;  %v5473_v32 = vsub.s32 %v2186_v5, %v5465_v1 }
 0x353   : > { %s3650_s1 = sshll.u32 %s5822_s11, 4  ;;  %s3669_s5 = sshll.u32 %s5822_s11, 1 }
 0x354   : > { %3782 = vmatpush3.bf16.msra.mxu0 %v4120_v44  ;;  %s3670_s26 = sshll.u32 %s5827_s25, 2 }
 0x355   : > { %3783 = vmatprep.subr.bf16.mxu0 %v4616_v33  ;;  %s3372_s3 = sadd.s32 %s3670_s26, %s3669_s5 }
 0x356   : > { %s3671_s6 = sshll.u32 %s3372_s3, 7 }
 0x357   : > { %s5664_s20 = scalar_lea.hbm %s5828_s24, %s3671_s6 }
 0x358   : > { %3784 = vmatpush3.bf16.msra.mxu0 %v4121_v45  ;;  %3800 = vmatpush3.bf16.xpose.msra.mxu1 %v2450_v56 }
 0x359   : > { %3785 = vmatprep.subr.bf16.mxu0 %v4616_v33  ;;  %3805 = vmatprep.subr.bf16.mxu1 %v4616_v33 }
 0x35c   : > { %3786 = vmatpush3.bf16.msra.mxu0 %v4122_v47 }
 0x35d   : > { %3787 = vmatprep.subr.bf16.mxu0 %v4616_v33 }
 0x360   : > { %3788 = vmatpush3.bf16.msra.mxu0 %v4123_v52 }
 0x361   : > { %3789 = vmatprep.subr.bf16.mxu0 %v4616_v33 }
 0x364   : > { %3790 = vmatpush3.bf16.msra.mxu0 %v4124_v48 }
 0x365   : > { %3791 = vmatprep.subr.bf16.mxu0 %v4616_v33 }
 0x368   : > { %3792 = vmatpush3.bf16.msra.mxu0 %v4125_v54 }
 0x369   : > { %3829 = vmatprep.subr.bf16.mxu0 %v4616_v33 }
 0x36b   : > { %3794 = vmatmul.mubr.bf16.vlgmr.msra.gmra.mrb[0].mxu0 %v4126_v49 }
 0x36c   : > { %3833 = vmatprep.mubr.msk.bf16.mxu0 %vm4617_vm1, %v4616_v33 }
 0x43e   : > { %v2121_v26 = vpop.f32.mrb[0].mxu0 }
 0x43f   : > { %v2122_v16 = vadd.f32 %v3632_v57, %v2121_v26  ;;  %v3795_v17 = vpop.f32.mrb[1].mxu0 }
 0x440   : > { %v2124_v35 = vpop.f32.mrb[2].mxu0 }
 0x441   : > { %v2128_v18 = vmul.f32 0.17677669, %v2122_v16  ;;  %v2125_v27 = vadd.f32 %v3632_v57, %v2124_v35  ;;  %v3796_v28 = vpop.f32.mrb[3].mxu0 }
 0x443   : > { %2138 = vrot.lane.b32.xlu1 %v2128_v18, %s4618_s7  ;;  %2132 = vrot.lane.b32.xlu0 %v2128_v18, %s4619_s8  ;;  %v2129_v55 = vmul.f32 0.17677669, %v2125_v27 }
 0x447   : > { %2140 = vrot.lane.b32.xlu1 %v2129_v55, %s4618_s7  ;;  %2134 = vrot.lane.b32.xlu0 %v2129_v55, %s4619_s8 }
 0x44b   : > { %2146 = vrot.lane.b32.xlu1 %v2129_v55, %s4620_s19  ;;  %2144 = vrot.lane.b32.xlu0 %v2128_v18, %s4620_s19 }
 0x4b5   : > { %v2139_v19 = vpop.permute.xlu1 %2138  ;;  %v2133_v51 = vpop.permute.xlu0 %2132 }
 0x4b6   : > { %v2150_v7 = vcombine.low %v2128_v18, %v2139_v19  ;;  %v2151_v8 = vcombine.high %v2128_v18, %v2139_v19 }
 0x4b8   : > { %v2158_v46 = vrot.slane %v2150_v7, %v5468_v6  ;;  %v2165_v25 = vrot.slane %v2151_v8, %v5468_v6 }
 0x4b9   : > { %v2141_v2 = vpop.permute.xlu1 %2140  ;;  %v2135_v34 = vpop.permute.xlu0 %2134 }
 0x4ba   : > { %v2218_v3 = vcombine.low %v2129_v55, %v2141_v2  ;;  %v2219_v4 = vcombine.high %v2129_v55, %v2141_v2 }
 0x4bc   : > { %v2226_v14 = vrot.slane %v2218_v3, %v5468_v6  ;;  %v2233_v15 = vrot.slane %v2219_v4, %v5468_v6  ;;  %v2428_v4 = vld [vmem:[#allocation2 + $0x10] sm:$0xff] }
 0x4bd   : > { %v2147_v31 = vpop.permute.xlu1 %2146  ;;  %v2145_v9 = vpop.permute.xlu0 %2144  ;;  %v2497_v8 = vsel %vm2442_vm2, %v2428_v4, 0 }
 0x4be   : > { %v2234_v10 = vcombine.low %v2135_v34, %v2147_v31  ;;  %v2235_v11 = vcombine.high %v2135_v34, %v2147_v31  ;;  %v2166_v12 = vcombine.low %v2133_v51, %v2145_v9  ;;  %v2167_v13 = vcombine.high %v2133_v51, %v2145_v9  ;;  %v2429_v31 = vld [vmem:[#allocation2 + $0x18] sm:$0xff] }
 0x4bf   : > { %v2500_v9 = vsel %vm2442_vm2, %v2429_v31, 0 }
 0x4c0   : > { %v2242_v20 = vrot.slane %v2234_v10, %v5468_v6  ;;  %v2249_v21 = vrot.slane %v2235_v11, %v5468_v6  ;;  %v2174_v22 = vrot.slane %v2166_v12, %v5468_v6  ;;  %v2181_v23 = vrot.slane %v2167_v13, %v5468_v6  ;;  %v2430_v12 = vld [vmem:[#allocation2 + $0x20] sm:$0xff] }
 0x4c2   : > { %v2250_v36 = vcombine.low %v2226_v14, %v2242_v20  ;;  %v2251_v37 = vcombine.high %v2226_v14, %v2242_v20  ;;  %v2266_v38 = vcombine.low %v2233_v15, %v2249_v21  ;;  %v2267_v24 = vcombine.high %v2233_v15, %v2249_v21 }
 0x4c3   : > { %v2182_v39 = vcombine.low %v2158_v46, %v2174_v22  ;;  %v2183_v40 = vcombine.high %v2158_v46, %v2174_v22  ;;  %v2198_v41 = vcombine.low %v2165_v25, %v2181_v23  ;;  %v2199_v58 = vcombine.high %v2165_v25, %v2181_v23  ;;  %v2431_v23 = vld [vmem:[#allocation2 + $0x28] sm:$0xff] }
 0x4c4   : > { %v2258_v30 = vrot.slane %v2250_v36, %v5473_v32  ;;  %v2265_v43 = vrot.slane %v2251_v37, %v5473_v32  ;;  %v2274_v53 = vrot.slane %v2266_v38, %v5473_v32  ;;  %v2281_v44 = vrot.slane %v2267_v24, %v5473_v32 }
 0x4c5   : > { %v2190_v45 = vrot.slane %v2182_v39, %v5473_v32  ;;  %v2197_v47 = vrot.slane %v2183_v40, %v5473_v32  ;;  %v2206_v52 = vrot.slane %v2198_v41, %v5473_v32  ;;  %v2213_v48 = vrot.slane %v2199_v58, %v5473_v32  ;;  %v2432_v40 = vld [vmem:[#allocation2 + $0x30] sm:$0xff] }
 0x4c6   : > { %v2354_v54 = vcombine.low %v2258_v30, %v2265_v43  ;;  %v3644_v49 = vcombine.high %v2258_v30, %v2265_v43  ;;  %v2370_v57 = vcombine.low %v2274_v53, %v2281_v44  ;;  %v3645_v26 = vcombine.high %v2274_v53, %v2281_v44  ;;  %v2433_v30 = vld [vmem:[#allocation2 + $0x38] sm:$0xff] }
 0x4c7   : > { %v2286_v16 = vcombine.low %v2190_v45, %v2197_v47  ;;  %v3642_v17 = vcombine.high %v2190_v45, %v2197_v47  ;;  %v2302_v35 = vcombine.low %v2206_v52, %v2213_v48  ;;  %v3643_v18 = vcombine.high %v2206_v52, %v2213_v48 }
 0x4c8   : > { %v2361_v27 = vrot.slane %v2354_v54, %v5468_v6  ;;  %v2369_v28 = vrot.slane %v3644_v49, %v5468_v6  ;;  %v2377_v29 = vrot.slane %v2370_v57, %v5468_v6  ;;  %v2385_v60 = vrot.slane %v3645_v26, %v5468_v6 }
 0x4c9   : > { %v2293_v55 = vrot.slane %v2286_v16, %v5468_v6  ;;  %v2301_v61 = vrot.slane %v3642_v17, %v5468_v6  ;;  %v2309_v56 = vrot.slane %v2302_v35, %v5468_v6  ;;  %v2317_v42 = vrot.slane %v3643_v18, %v5468_v6  ;;  %v2435_v16 = vld [vmem:[#allocation3 + $0x8] sm:$0xff] }
 0x4ca   : > { %v2386_v59 = vcombine.low %v2361_v27, %v2369_v28  ;;  %v2402_v19 = vcombine.low %v2377_v29, %v2385_v60  ;;  %v2547_v14 = vsel %vm2442_vm2, %v2430_v12, 0  ;;  %v2387_v15 = vcombine.high %v2361_v27, %v2369_v28 }
 0x4cb   : > { %v2318_v51 = vcombine.low %v2293_v55, %v2301_v61  ;;  %v2334_v62 = vcombine.low %v2309_v56, %v2317_v42  ;;  %v2403_v20 = vcombine.high %v2377_v29, %v2385_v60  ;;  %v2319_v21 = vcombine.high %v2293_v55, %v2301_v61 }
 0x4cc   : > { %v2394_v63 = vrot.slane %v2386_v59, %v5473_v32  ;;  %v2410_v0 = vrot.slane %v2402_v19, %v5473_v32  ;;  %v2335_v22 = vcombine.high %v2309_v56, %v2317_v42  ;;  %v2550_v46 = vsel %vm2442_vm2, %v2431_v23, 0 }
 0x4cd   : > { %v2326_v2 = vrot.slane %v2318_v51, %v5473_v32  ;;  %v2342_v34 = vrot.slane %v2334_v62, %v5473_v32  ;;  %v2401_v25 = vrot.slane %v2387_v15, %v5473_v32  ;;  %v2417_v36 = vrot.slane %v2403_v20, %v5473_v32 }
 0x4ce   : > { %v2418_v3 = vcombine.low %v2394_v63, %v2410_v0  ;;  %v2419_v11 = vcombine.high %v2394_v63, %v2410_v0  ;;  %v2333_v37 = vrot.slane %v2319_v21, %v5473_v32  ;;  %v2349_v38 = vrot.slane %v2335_v22, %v5473_v32 }
 0x4cf   : > { %v2350_v5 = vcombine.low %v2326_v2, %v2342_v34  ;;  %v2351_v10 = vcombine.high %v2326_v2, %v2342_v34  ;;  %v2420_v39 = vcombine.low %v2401_v25, %v2417_v36  ;;  %v2597_v58 = vsel %vm2442_vm2, %v2432_v40, 0 }
 0x4d0   : > { %v2352_v24 = vcombine.low %v2333_v37, %v2349_v38  ;;  %v2600_v43 = vsel %vm2442_vm2, %v2433_v30, 0  ;;  %v2353_v53 = vcombine.high %v2333_v37, %v2349_v38  ;;  %v2421_v44 = vcombine.high %v2401_v25, %v2417_v36 }
 0x4d1   : > { %v2422_v7 = vpack.c.bf16 %v2418_v3, %v2350_v5  ;;  %v2423_v13 = vpack.c.bf16 %v2419_v11, %v2351_v10  ;;  %v2647_v47 = vstv %s3650_s1  ;;  %v2645_v52 = vadd.s32 8, %v5465_v1 }
 0x4d2   : > { %v2424_v41 = vpack.c.bf16 %v2420_v39, %v2352_v24  ;;  %v2425_v45 = vpack.c.bf16 %v2421_v44, %v2353_v53  ;;  %v2648_v48 = vadd.s32 %v2647_v47, %v5465_v1  ;;  %v2651_v54 = vand.u32 127, %v2155_v50 }
 0x4d3   : > { %3802 = vmatmul.mubr.msk.bf16.vlgmr.msra.gmra.mrb[0].mxu1 %vm2442_vm2, %v2422_v7  ;;  %v2649_v49 = vadd.s32 %v2647_v47, %v2645_v52 }
 0x4d4   : > { %3806 = vmatpush3.bf16.xpose.msra.mxu1 %v2497_v8  ;;  %3809 = vmatprep.mubr.msk.bf16.mxu1 %vm4617_vm1, %v4616_v33  ;;  %v2652_v57 = vsub.s32 %v2651_v54, %v2648_v48 }
 0x4d5   : > { %3807 = vmatprep.subr.bf16.mxu1 %v4616_v33  ;;  %v2653_v26 = vsub.s32 %v2651_v54, %v2649_v49 }
 0x4d6   : > { %vm2654_vm3 = vcmp.ge.s32.totalorder %v2652_v57, 4294967291  ;;  %vm2656_vm4 = vcmp.le.s32.totalorder %v2652_v57, 5 }
 0x4d7   : > { %vm2655_vm5 = vcmp.ge.s32.totalorder %v2653_v26, 4294967291  ;;  %vm2657_vm6 = vcmp.le.s32.totalorder %v2653_v26, 5  ;;  %vm5533_vm7 = vmand %vm2654_vm3, %vm2656_vm4  ;;  %v2434_v26 = vld [vmem:[#allocation3] sm:$0xff] }
 0x4d8   : > { %vm5537_vm8 = vmand %vm2655_vm5, %vm2657_vm6  ;;  %3830 = vmatpush3.bf16.msra.mxu0 %v2434_v26 }
 0x4d9   : > { %3831 = vmatprep.subr.bf16.mxu0 %v4616_v33 }
 0x4dc   : > { %3808 = vmatpush3.bf16.xpose.msra.mxu1 %v2500_v9  ;;  %3832 = vmatpush3.bf16.msra.mxu0 %v2435_v16 }
 0x4dd   : > { %3813 = vmatprep.subr.bf16.mxu1 %v4616_v33  ;;  %3845 = vmatprep.subr.bf16.mxu0 %v4616_v33 }
 0x4e3   : > { %3810 = vmatmul.mubr.msk.bf16.vlgmr.msra.gmra.mrb[4].mxu1 %vm2442_vm2, %v2423_v13 }
 0x4e4   : > { %3814 = vmatpush3.bf16.xpose.msra.mxu1 %v2547_v14  ;;  %3817 = vmatprep.mubr.msk.bf16.mxu1 %vm4617_vm1, %v4616_v33 }
 0x4e5   : > { %3815 = vmatprep.subr.bf16.mxu1 %v4616_v33 }
 0x4ec   : > { %3816 = vmatpush3.bf16.xpose.msra.mxu1 %v2550_v46 }
 0x4ed   : > { %3821 = vmatprep.subr.bf16.mxu1 %v4616_v33 }
 0x4f3   : > { %3818 = vmatmul.mubr.msk.bf16.vlgmr.msra.gmra.mrb[8].mxu1 %vm2442_vm2, %v2424_v41 }
 0x4f4   : > { %3822 = vmatpush3.bf16.xpose.msra.mxu1 %v2597_v58  ;;  %3825 = vmatprep.mubr.msk.bf16.mxu1 %vm4617_vm1, %v4616_v33 }
 0x4f5   : > { %3823 = vmatprep.subr.bf16.mxu1 %v4616_v33 }
 0x4fc   : > { %3824 = vmatpush3.bf16.xpose.msra.mxu1 %v2600_v43 }
 0x4fd   : > { %3837 = vmatprep.subr.bf16.mxu1 %v4616_v33 }
 0x503   : > { %3826 = vmatmul.mubr.msk.bf16.vlgmr.msra.gmra.mrb[12].mxu1 %vm2442_vm2, %v2425_v45 }
 0x504   : > { %3841 = vmatprep.mubr.msk.bf16.mxu1 %vm4617_vm1, %v4616_v33 }
 0x5a6   : > { %v2486_v17 = vpop.f32.mrb[0].mxu1 }
 0x5a7   : > { %v2664_v1 = vsel %vm5533_vm7, %v2486_v17, -inf  ;;  %v3803_v50 = vpop.f32.mrb[1].mxu1 }
 0x5a8   : > { %v2489_v18 = vpop.f32.mrb[2].mxu1  ;;  %v2672_v27 = vsel %vm2442_vm2, %v2664_v1, -inf }
 0x5a9   : > { %v2665_v28 = vsel %vm5537_vm8, %v2489_v18, -inf  ;;  %2673 = vmax.xlane.f32.xlu0 %v2672_v27  ;;  %v3804_v29 = vpop.f32.mrb[3].mxu1 }
 0x5aa   : > { %v2675_v60 = vsel %vm2442_vm2, %v2665_v28, -inf }
 0x5ab   : > { %2676 = vmax.xlane.f32.xlu1 %v2675_v60 }
 0x5b6   : > { %v2536_v55 = vpop.f32.mrb[4].mxu1 }
 0x5b7   : > { %v2666_v61 = vsel %vm5533_vm7, %v2536_v55, -inf  ;;  %v3811_v56 = vpop.f32.mrb[5].mxu1 }
 0x5b8   : > { %v2539_v42 = vpop.f32.mrb[6].mxu1  ;;  %v2678_v59 = vsel %vm2442_vm2, %v2666_v61, -inf  ;;  %v2437_v56 = vld [vmem:[#allocation3 + $0x18] sm:$0xff] }
 0x5b9   : > { %v2667_v19 = vsel %vm5537_vm8, %v2539_v42, -inf  ;;  %2679 = vmax.xlane.f32.xlu0 %v2678_v59  ;;  %v3812_v51 = vpop.f32.mrb[7].mxu1 }
 0x5ba   : > { %v2681_v62 = vsel %vm2442_vm2, %v2667_v19, -inf }
 0x5bd   : > { %2682 = vmax.xlane.f32.xlu0 %v2681_v62 }
 0x5c6   : > { %v2586_v63 = vpop.f32.mrb[8].mxu1 }
 0x5c7   : > { %v2668_v0 = vsel %vm5533_vm7, %v2586_v63, -inf  ;;  %v3819_v2 = vpop.f32.mrb[9].mxu1 }
 0x5c8   : > { %v2589_v34 = vpop.f32.mrb[10].mxu1  ;;  %v2684_v3 = vsel %vm2442_vm2, %v2668_v0, -inf }
 0x5c9   : > { %v2669_v4 = vsel %vm5537_vm8, %v2589_v34, -inf  ;;  %2685 = vmax.xlane.f32.xlu1 %v2684_v3  ;;  %v3820_v5 = vpop.f32.mrb[11].mxu1 }
 0x5ca   : > { %v2687_v7 = vsel %vm2442_vm2, %v2669_v4, -inf }
 0x5cb   : > { %2688 = vmax.xlane.f32.xlu0 %v2687_v7  ;;  %v2438_v7 = vld [vmem:[#allocation3 + $0x20] sm:$0xff] }
 0x5d6   : > { %v2636_v8 = vpop.f32.mrb[12].mxu1 }
 0x5d7   : > { %v2670_v31 = vsel %vm5533_vm7, %v2636_v8, -inf  ;;  %v3827_v9 = vpop.f32.mrb[13].mxu1 }
 0x5d8   : > { %v2639_v10 = vpop.f32.mrb[14].mxu1  ;;  %v2690_v11 = vsel %vm2442_vm2, %v2670_v31, -inf }
 0x5d9   : > { %v2671_v12 = vsel %vm5537_vm8, %v2639_v10, -inf  ;;  %2691 = vmax.xlane.f32.xlu1 %v2690_v11  ;;  %v3828_v13 = vpop.f32.mrb[15].mxu1 }
 0x5da   : > { %v2693_v14 = vsel %vm2442_vm2, %v2671_v12, -inf }
 0x5db   : > { %2694 = vmax.xlane.f32.xlu0 %v2693_v14 }
 0x636   : > { %v2674_v15 = vpop.xlane.xlu0 %2673 }
 0x637   : > { %v2696_v20 = vsub.f32 %v2664_v1, %v2674_v15 }
 0x638   : > { %v2677_v21 = vpop.xlane.xlu1 %2676 }
 0x639   : > { %v2704_v22 = vmul.f32 1.442695, %v2696_v20  ;;  %v2697_v23 = vsub.f32 %v2665_v28, %v2677_v21  ;;  %v2440_v20 = vld [vmem:[#allocation3 + $0x30] sm:$0xff]  ;;  %v2441_v21 = vld [vmem:[#allocation3 + $0x38] sm:$0xff] }
 0x63b   : > { %4135 = vpow2.f32 %v2704_v22  ;;  %v2706_v46 = vmul.f32 1.442695, %v2697_v23 }
 0x63d   : > { %4137 = vpow2.f32 %v2706_v46 }
 0x645   : > { %v5565_v25 = vpop.eup %4135 }
 0x646   : > { %v2680_v36 = vpop.xlane.xlu0 %2679  ;;  %v2720_v37 = vsel %vm2442_vm2, %v5565_v25, 0.0 }
 0x647   : > { %v5569_v38 = vpop.eup %4137  ;;  %v2698_v24 = vsub.f32 %v2666_v61, %v2680_v36  ;;  %2721 = vadd.xlane.f32.xlu1 %v2720_v37  ;;  %v2436_v61 = vld [vmem:[#allocation3 + $0x10] sm:$0xff] }
 0x648   : > { %v2723_v39 = vsel %vm2442_vm2, %v5569_v38, 0.0  ;;  %3838 = vmatpush3.bf16.msra.mxu1 %v2436_v61 }
 0x649   : > { %v2708_v40 = vmul.f32 1.442695, %v2698_v24  ;;  %2724 = vadd.xlane.f32.xlu0 %v2723_v39  ;;  %3839 = vmatprep.subr.bf16.mxu1 %v4616_v33 }
 0x64a   : > { %v2683_v41 = vpop.xlane.xlu0 %2682 }
 0x64b   : > { %4139 = vpow2.f32 %v2708_v40  ;;  %v2699_v58 = vsub.f32 %v2667_v19, %v2683_v41 }
 0x64c   : > { %3840 = vmatpush3.bf16.msra.mxu1 %v2437_v56 }
 0x64d   : > { %v2710_v30 = vmul.f32 1.442695, %v2699_v58  ;;  %3853 = vmatprep.subr.bf16.mxu1 %v4616_v33 }
 0x64f   : > { %4141 = vpow2.f32 %v2710_v30  ;;  %v4127_v30 = vld [vmem:[#allocation18] sm:$0xff]  }
 0x655   : > { %v5573_v43 = vpop.eup %4139 }
 0x656   : > { %v2686_v53 = vpop.xlane.xlu1 %2685  ;;  %v2726_v44 = vsel %vm2442_vm2, %v5573_v43, 0.0 }
 0x657   : > { %v2700_v45 = vsub.f32 %v2668_v0, %v2686_v53  ;;  %2727 = vadd.xlane.f32.xlu1 %v2726_v44  ;;  %v4129_v53 = vld [vmem:[#allocation18 + $0x10] sm:$0xff]   ;;  %v4130_v44 = vld [vmem:[#allocation18 + $0x18] sm:$0xff]  }
 0x658   : > { %v2689_v47 = vpop.xlane.xlu0 %2688 }
 0x659   : > { %v5577_v52 = vpop.eup %4141  ;;  %v2712_v48 = vmul.f32 1.442695, %v2700_v45  ;;  %v2701_v54 = vsub.f32 %v2669_v4, %v2689_v47  ;;  %v4131_v45 = vld [vmem:[#allocation18 + $0x20] sm:$0xff]   ;;  %v4132_v47 = vld [vmem:[#allocation18 + $0x28] sm:$0xff]  }
 0x65a   : > { %v2729_v49 = vsel %vm2442_vm2, %v5577_v52, 0.0 }
 0x65b   : > { %4143 = vpow2.f32 %v2712_v48  ;;  %v2714_v57 = vmul.f32 1.442695, %v2701_v54  ;;  %2730 = vadd.xlane.f32.xlu0 %v2729_v49 }
 0x65d   : > { %4145 = vpow2.f32 %v2714_v57 }
 0x665   : > { %v5582_v17 = vpop.eup %4143 }
 0x666   : > { %v2692_v35 = vpop.xlane.xlu1 %2691  ;;  %v2732_v1 = vsel %vm2442_vm2, %v5582_v17, 0.0 }
 0x667   : > { %v5587_v50 = vpop.eup %4145  ;;  %v2702_v18 = vsub.f32 %v2670_v31, %v2692_v35  ;;  %2733 = vadd.xlane.f32.xlu1 %v2732_v1  ;;  %v2439_v31 = vld [vmem:[#allocation3 + $0x28] sm:$0xff] }
 0x668   : > { %v2695_v27 = vpop.xlane.xlu0 %2694  ;;  %v2735_v28 = vsel %vm2442_vm2, %v5587_v50, 0.0 }
 0x669   : > { %v2716_v29 = vmul.f32 1.442695, %v2702_v18  ;;  %v2703_v60 = vsub.f32 %v2671_v12, %v2695_v27  ;;  %2736 = vadd.xlane.f32.xlu0 %v2735_v28 }
 0x66b   : > { %4147 = vpow2.f32 %v2716_v29  ;;  %v2718_v55 = vmul.f32 1.442695, %v2703_v60 }
 0x66d   : > { %4149 = vpow2.f32 %v2718_v55 }
 0x675   : > { %v4148_v42 = vpop.eup %4147 }
 0x676   : > { %v2738_v59 = vsel %vm2442_vm2, %v4148_v42, 0.0 }
 0x677   : > { %v4150_v19 = vpop.eup %4149  ;;  %2739 = vadd.xlane.f32.xlu1 %v2738_v59 }
 0x678   : > { %v2741_v51 = vsel %vm2442_vm2, %v4150_v19, 0.0 }
 0x679   : > { %2742 = vadd.xlane.f32.xlu0 %v2741_v51 }
 0x6d4   : > { %v2722_v62 = vpop.xlane.xlu1 %2721 }
 0x6d5   : > { %4151 = vrcp.f32 %v2722_v62 }
 0x6d6   : > { %v2725_v63 = vpop.xlane.xlu0 %2724 }
 0x6d7   : > { %4153 = vrcp.f32 %v2725_v63 }
 0x6df   : > { %v4152_v0 = vpop.eup %4151 }
 0x6e0   : > { %v2752_v34 = vmul.f32 %v4152_v0, %v5565_v25 }
 0x6e1   : > { %v4154_v2 = vpop.eup %4153 }
 0x6e2   : > { %v2753_v3 = vmul.f32 %v4154_v2, %v5569_v38 }
 0x6e4   : > { %v2728_v4 = vpop.xlane.xlu1 %2727  ;;  %v2760_v5 = vpack.c.bf16 %v2753_v3, %v2752_v34 }
 0x6e5   : > { %4155 = vrcp.f32 %v2728_v4 }
 0x6e6   : > { %3834 = vmatmul.mubr.msk.bf16.vlgmr.msra.gmra.mrb[4].mxu0 %vm2442_vm2, %v2760_v5 }
 0x6e7   : > { %3846 = vmatpush3.bf16.msra.mxu0 %v2438_v7  ;;  %3849 = vmatprep.mubr.msk.bf16.mxu0 %vm4617_vm1, %v4616_v33 }
 0x6e8   : > { %v2731_v8 = vpop.xlane.xlu0 %2730  ;;  %3847 = vmatprep.subr.bf16.mxu0 %v4616_v33 }
 0x6e9   : > { %4157 = vrcp.f32 %v2731_v8 }
 0x6eb   : > { %3848 = vmatpush3.bf16.msra.mxu0 %v2439_v31 }
 0x6ec   : > { %3861 = vmatprep.subr.bf16.mxu0 %v4616_v33 }
 0x6ef   : > { %v4156_v9 = vpop.eup %4155 }
 0x6f0   : > { %v2754_v11 = vmul.f32 %v4156_v9, %v5573_v43  ;;  %v4128_v43 = vld [vmem:[#allocation18 + $0x8] sm:$0xff]  }
 0x6f3   : > { %v4158_v10 = vpop.eup %4157 }
 0x6f4   : > { %v2755_v12 = vmul.f32 %v4158_v10, %v5577_v52  ;;  %v2734_v13 = vpop.xlane.xlu1 %2733 }
 0x6f5   : > { %4159 = vrcp.f32 %v2734_v13 }
 0x6f6   : > { %v2737_v14 = vpop.xlane.xlu0 %2736  ;;  %v2761_v15 = vpack.c.bf16 %v2755_v12, %v2754_v11 }
 0x6f7   : > { %4161 = vrcp.f32 %v2737_v14 }
 0x6f8   : > { %3842 = vmatmul.mubr.msk.bf16.vlgmr.msra.gmra.mrb[16].mxu1 %vm2442_vm2, %v2761_v15 }
 0x6f9   : > { %3854 = vmatpush3.bf16.msra.mxu1 %v2440_v20  ;;  %3857 = vmatprep.mubr.msk.bf16.mxu1 %vm4617_vm1, %v4616_v33 }
 0x6fa   : > { %3855 = vmatprep.subr.bf16.mxu1 %v4616_v33 }
 0x6fd   : > { %3856 = vmatpush3.bf16.msra.mxu1 %v2441_v21 }
 0x6ff   : > { %v4160_v22 = vpop.eup %4159 }
 0x700   : > { %v2756_v46 = vmul.f32 %v4160_v22, %v5582_v17 }
 0x701   : > { %v4162_v23 = vpop.eup %4161 }
 0x702   : > { %v2757_v25 = vmul.f32 %v4162_v23, %v5587_v50 }
 0x704   : > { %v2740_v36 = vpop.xlane.xlu1 %2739  ;;  %v2762_v37 = vpack.c.bf16 %v2757_v25, %v2756_v46 }
 0x705   : > { %4163 = vrcp.f32 %v2740_v36 }
 0x706   : > { %3850 = vmatmul.mubr.msk.bf16.vlgmr.msra.gmra.mrb[8].mxu0 %vm2442_vm2, %v2762_v37  ;;  %v2743_v38 = vpop.xlane.xlu0 %2742 }
 0x707   : > { %4165 = vrcp.f32 %v2743_v38  ;;  %3877 = vmatprep.mubr.msk.bf16.mxu0 %vm4617_vm1, %v4616_v33  ;;  %3862 = vmatpush3.bf16.msra.mxu0 %v4127_v30 }
 0x708   : > { %3863 = vmatprep.subr.bf16.mxu0 %v4616_v33 }
 0x70b   : > { %3864 = vmatpush3.bf16.msra.mxu0 %v4128_v43  ;;  %v4133_v43 = vld [vmem:[#allocation18 + $0x30] sm:$0xff]  }
 0x70c   : > { %3865 = vmatprep.subr.bf16.mxu0 %v4616_v33 }
 0x70f   : > { %v4164_v24 = vpop.eup %4163  ;;  %3866 = vmatpush3.bf16.msra.mxu0 %v4129_v53 }
 0x710   : > { %v2758_v40 = vmul.f32 %v4164_v24, %v4148_v42  ;;  %3867 = vmatprep.subr.bf16.mxu0 %v4616_v33 }
 0x711   : > { %v4166_v39 = vpop.eup %4165 }
 0x712   : > { %v2759_v41 = vmul.f32 %v4166_v39, %v4150_v19 }
 0x713   : > { %3868 = vmatpush3.bf16.msra.mxu0 %v4130_v44 }
 0x714   : > { %v2763_v58 = vpack.c.bf16 %v2759_v41, %v2758_v40  ;;  %3869 = vmatprep.subr.bf16.mxu0 %v4616_v33 }
 0x716   : > { %3858 = vmatmul.mubr.msk.bf16.vlgmr.msra.gmra.mrb[20].mxu1 %vm2442_vm2, %v2763_v58 }
 0x717   : > { %3870 = vmatpush3.bf16.msra.mxu0 %v4131_v45 }
 0x718   : > { %3871 = vmatprep.subr.bf16.mxu0 %v4616_v33 }
 0x71b   : > { %3872 = vmatpush3.bf16.msra.mxu0 %v4132_v47 }
 0x71c   : > { %3873 = vmatprep.subr.bf16.mxu0 %v4616_v33 }
 0x71f   : > { %3874 = vmatpush3.bf16.msra.mxu0 %v4133_v43 }
 0x720   : > { %3875 = vmatprep.subr.bf16.mxu0 %v4616_v33 }
 0x7b9   : > { %v2801_v52 = vpop.f32.mrb[4].mxu0 }
 0x7ba   : > { %v3835_v48 = vpop.f32.mrb[5].mxu0 }
 0x7bb   : > { %v2804_v54 = vpop.f32.mrb[6].mxu0 }
 0x7bc   : > { %v3836_v49 = vpop.f32.mrb[7].mxu0 }
 0x7cb   : > { %v2845_v57 = vpop.f32.mrb[16].mxu1 }
 0x7cc   : > { %v3843_v26 = vpop.f32.mrb[17].mxu1 }
 0x7cd   : > { %v2848_v16 = vpop.f32.mrb[18].mxu1 }
 0x7ce   : > { %v3844_v17 = vpop.f32.mrb[19].mxu1 }
 0x7d9   : > { %v2889_v35 = vpop.f32.mrb[8].mxu0 }
 0x7da   : > { %v2940_v1 = vcombine.low %v2801_v52, %v2889_v35  ;;  %v2941_v50 = vcombine.high %v2801_v52, %v2889_v35  ;;  %v3851_v18 = vpop.f32.mrb[9].mxu0 }
 0x7db   : > { %v2892_v27 = vpop.f32.mrb[10].mxu0 }
 0x7dc   : > { %v3008_v28 = vcombine.low %v2804_v54, %v2892_v27  ;;  %v3009_v29 = vcombine.high %v2804_v54, %v2892_v27  ;;  %v3852_v60 = vpop.f32.mrb[11].mxu0  ;;  %v2948_v59 = vrot.slane %v2940_v1, %v5468_v6  ;;  %v2955_v19 = vrot.slane %v2941_v50, %v5468_v6  ;;  %v4134_v27 = vld [vmem:[#allocation18 + $0x38] sm:$0xff]  }
 0x7dd   : > { %3876 = vmatpush3.bf16.msra.mxu0 %v4134_v27 }
 0x7de   : > { %v3016_v8 = vrot.slane %v3008_v28, %v5468_v6  ;;  %v3023_v31 = vrot.slane %v3009_v29, %v5468_v6 }
 0x7e9   : > { %v2933_v55 = vpop.f32.mrb[20].mxu1 }
 0x7ea   : > { %v2956_v61 = vcombine.low %v2845_v57, %v2933_v55  ;;  %v2957_v56 = vcombine.high %v2845_v57, %v2933_v55  ;;  %v3859_v42 = vpop.f32.mrb[21].mxu1 }
 0x7eb   : > { %v2936_v51 = vpop.f32.mrb[22].mxu1 }
 0x7ec   : > { %v2964_v62 = vrot.slane %v2956_v61, %v5468_v6  ;;  %v2971_v63 = vrot.slane %v2957_v56, %v5468_v6  ;;  %v3024_v0 = vcombine.low %v2848_v16, %v2936_v51  ;;  %v3025_v2 = vcombine.high %v2848_v16, %v2936_v51  ;;  %v3860_v34 = vpop.f32.mrb[23].mxu1 }
 0x7ee   : > { %v2972_v3 = vcombine.low %v2948_v59, %v2964_v62  ;;  %v2973_v4 = vcombine.high %v2948_v59, %v2964_v62  ;;  %v2988_v5 = vcombine.low %v2955_v19, %v2971_v63  ;;  %v2989_v7 = vcombine.high %v2955_v19, %v2971_v63 }
 0x7ef   : > { %v3032_v9 = vrot.slane %v3024_v0, %v5468_v6  ;;  %v3039_v10 = vrot.slane %v3025_v2, %v5468_v6 }
 0x7f0   : > { %v2980_v11 = vrot.slane %v2972_v3, %v5473_v32  ;;  %v2987_v12 = vrot.slane %v2973_v4, %v5473_v32  ;;  %v2996_v13 = vrot.slane %v2988_v5, %v5473_v32  ;;  %v3003_v14 = vrot.slane %v2989_v7, %v5473_v32 }
 0x7f1   : > { %v3040_v15 = vcombine.low %v3016_v8, %v3032_v9  ;;  %v3041_v20 = vcombine.high %v3016_v8, %v3032_v9  ;;  %v3056_v21 = vcombine.low %v3023_v31, %v3039_v10  ;;  %v3057_v22 = vcombine.high %v3023_v31, %v3039_v10 }
 0x7f2   : > { %v3076_v23 = vcombine.low %v2980_v11, %v2987_v12  ;;  %v3655_v46 = vcombine.high %v2980_v11, %v2987_v12  ;;  %v3092_v25 = vcombine.low %v2996_v13, %v3003_v14  ;;  %v3656_v36 = vcombine.high %v2996_v13, %v3003_v14 }
 0x7f3   : > { %v3048_v37 = vrot.slane %v3040_v15, %v5473_v32  ;;  %v3055_v38 = vrot.slane %v3041_v20, %v5473_v32  ;;  %v3064_v24 = vrot.slane %v3056_v21, %v5473_v32  ;;  %v3071_v39 = vrot.slane %v3057_v22, %v5473_v32 }
 0x7f4   : > { %v3083_v40 = vrot.slane %v3076_v23, %v5468_v6  ;;  %v3091_v41 = vrot.slane %v3655_v46, %v5468_v6  ;;  %v3099_v58 = vrot.slane %v3092_v25, %v5468_v6  ;;  %v3107_v30 = vrot.slane %v3656_v36, %v5468_v6  ;;  %v3659_v46 = vld [vmem:[#allocation19] ss:$0 sm:$0xff] }
 0x7f5   : > { %v3144_v53 = vcombine.low %v3048_v37, %v3055_v38  ;;  %v3657_v44 = vcombine.high %v3048_v37, %v3055_v38  ;;  %v3160_v45 = vcombine.low %v3064_v24, %v3071_v39  ;;  %v3658_v47 = vcombine.high %v3064_v24, %v3071_v39 }
 0x7f6   : > { %v3109_v52 = vcombine.high %v3083_v40, %v3091_v41  ;;  %v3125_v48 = vcombine.high %v3099_v58, %v3107_v30  ;;  %v3108_v54 = vcombine.low %v3083_v40, %v3091_v41  ;;  %v3124_v49 = vcombine.low %v3099_v58, %v3107_v30 }
 0x7f7   : > { %v3151_v57 = vrot.slane %v3144_v53, %v5468_v6  ;;  %v3159_v26 = vrot.slane %v3657_v44, %v5468_v6  ;;  %v3167_v16 = vrot.slane %v3160_v45, %v5468_v6  ;;  %v3175_v17 = vrot.slane %v3658_v47, %v5468_v6 }
 0x7f8   : > { %v3123_v35 = vrot.slane %v3109_v52, %v5473_v32  ;;  %v3139_v1 = vrot.slane %v3125_v48, %v5473_v32  ;;  %v3116_v50 = vrot.slane %v3108_v54, %v5473_v32  ;;  %v3132_v18 = vrot.slane %v3124_v49, %v5473_v32 }
 0x7f9   : > { %v3177_v28 = vcombine.high %v3151_v57, %v3159_v26  ;;  %v3193_v29 = vcombine.high %v3167_v16, %v3175_v17  ;;  %v3176_v60 = vcombine.low %v3151_v57, %v3159_v26  ;;  %v3192_v55 = vcombine.low %v3167_v16, %v3175_v17 }
 0x7fa   : > { %v3142_v61 = vcombine.low %v3123_v35, %v3139_v1  ;;  %v3140_v56 = vcombine.low %v3116_v50, %v3132_v18  ;;  %v3141_v42 = vcombine.high %v3116_v50, %v3132_v18  ;;  %v3143_v59 = vcombine.high %v3123_v35, %v3139_v1 }
 0x7fb   : > { %v3191_v33 = vrot.slane %v3177_v28, %v5473_v32  ;;  %v3207_v6 = vrot.slane %v3193_v29, %v5473_v32  ;;  %v3184_v19 = vrot.slane %v3176_v60, %v5473_v32  ;;  %v3200_v51 = vrot.slane %v3192_v55, %v5473_v32 }
 0x7fd   : > { %v3210_v62 = vcombine.low %v3191_v33, %v3207_v6  ;;  %v3209_v63 = vcombine.high %v3184_v19, %v3200_v51  ;;  %v3208_v0 = vcombine.low %v3184_v19, %v3200_v51  ;;  %v3211_v2 = vcombine.high %v3191_v33, %v3207_v6 }
 0x7ff   : > { %v4108_v34 = vpack.i.bf16 %v3210_v62, %v3142_v61  ;;  %v4103_v3 = vpack.i.bf16 %v3209_v63, %v3141_v42  ;;  %v4113_v4 = vpack.i.bf16 %v3211_v2, %v3143_v59 }
 0x801   : > { %4109 = vrot.lane.b32.xlu0 %v4108_v34, %s4618_s7  ;;  %4104 = vrot.lane.b32.xlu1 %v4103_v3, %s4620_s19  ;;  %s4451_s7 = scalar_lea.vmem %s5666_s15, 256 }
 0x802   : > { %p4452_p8 = scmp.ne.s32.totalorder %s5666_s15, %s4451_s7 }
 0x804   : > { %p4453_p9 = pnand %p4452_p8, %p5829_p0 }
 0x805   : > { %4114 = vrot.lane.b32.xlu1 %v4113_v4, %s4619_s8  ;;  %s4623_s8 = smov [#allocation21]  }
 0x806   : > { %p4454_p11 = pneg %p4453_p9  ;;  %s4455_s19 = sshll.u32 %s4623_s8, 4  ;;  %s4456_s19 = int_to_ptr.vmem [resolvable:$false] %s4455_s19 }
 0x807   : > { %s4457_s11 = scalar_lea.vmem %s4456_s19, 512  ;;  %p4458_p2 = scmp.lt.s32.totalorder %s5666_s15, %s4456_s19 }
 0x808   : > { %p4459_p7 = scmp.lt.s32.totalorder %s4457_s11, %s4451_s7 }
 0x80a   : > { %p4460_p10 = por %p4459_p7, %p4458_p2 }
 0x80c   : > { %p4461_p12 = pnand %p4460_p10, %p4454_p11 }
 0x873   : > { %v4110_v5 = vpop.permute.xlu0 %4109  ;;  %v4105_v7 = vpop.permute.xlu1 %4104 }
 0x874   : > { %v4107_v8 = vunpack.i.h.bf16 %v4105_v7  ;;  %v4106_v31 = vunpack.i.l.bf16 %v4105_v7  ;;  %v4112_v9 = vunpack.i.h.bf16 %v4110_v5  ;;  %v4111_v32 = vunpack.i.l.bf16 %v4110_v5 }
 0x876   : > { %v3236_v10 = vsel %vm2442_vm2, %v3140_v56, %v4106_v31  ;;  %v3237_v11 = vsel %vm2442_vm2, %v3208_v0, %v4107_v8 }
 0x877   : > { %v4115_v12 = vpop.permute.xlu1 %4114  ;;  %v3239_v15 = vsel %vm3238_vm9, %v3236_v10, %v4111_v32  ;;  %v3240_v20 = vsel %vm3238_vm9, %v3237_v11, %v4112_v9 }
 0x878   : > { %v4117_v13 = vunpack.i.h.bf16 %v4115_v12  ;;  %v4116_v14 = vunpack.i.l.bf16 %v4115_v12 }
 0x87a   : > { %v3242_v21 = vsel %vm3241_vm10, %v3239_v15, %v4116_v14  ;;  %v3243_v22 = vsel %vm3241_vm10, %v3240_v20, %v4117_v13 }
 0x87b   : > { %v3244_v23 = vpack.c.bf16 %v3243_v22, %v3242_v21 }
 0x87d   : > { %3878 = vmatmul.mubr.bf16.vlgmr.msra.gmra.mrb[12].mxu0 %v3244_v23 }
 0x950   : > { %v3350_v25 = vpop.f32.mrb[12].mxu0 }
 0x951   : > { %v3351_v36 = vadd.f32 %v3659_v46, %v3350_v25  ;;  %v3879_v37 = vpop.f32.mrb[13].mxu0 }
 0x952   : > { %v3353_v38 = vpop.f32.mrb[14].mxu0 }
 0x953   : > { %3357 = vst [vmem:[%s5138_s0] sm:$0xff] %v3351_v36  ;;  %v3354_v24 = vadd.f32 %v3659_v46, %v3353_v38  ;;  %v3880_v39 = vpop.f32.mrb[15].mxu0 }
 0x955   : > { %3358 = vst [vmem:[%s5138_s0 + $0x8] sm:$0xff] %v3354_v24 }
 0x956   : > { %4464 = shalt.err (!%p4461_p12)
}
 0x957   : > { %s4465_s0 = scalar_lea.hbm %s5664_s20, 256  ;;  %s4469_s5 = scalar_lea.hbm %s5828_s24, 1024 }
 0x958   : > { %p4466_p13 = scmp.ne.s32.totalorder %s5664_s20, %s4465_s0  ;;  %p4470_p6 = scmp.lt.u32.totalorder %s5664_s20, %s5828_s24 }
 0x959   : > { %p4471_p3 = scmp.lt.u32.totalorder %s4469_s5, %s4465_s0  ;;  %p4473_p8 = scmp.lt.u32.totalorder %s4465_s0, %s5664_s20 }
 0x95a   : > { %p4467_p1 = pnand %p4466_p13, %p5829_p0 }
 0x95b   : > { %p4472_p4 = por %p4471_p3, %p4470_p6 }
 0x95c   : > { %p4468_p5 = pneg %p4467_p1 }
 0x95d   : > { %p4474_p9 = por %p4473_p8, %p4472_p4 }
 0x95f   : > { %p4475_p11 = pnand %p4474_p9, %p4468_p5 }
 0x961   : > { %4478 = shalt.err (!%p4475_p11)
}
 0x962   : > { %s4624_s6 = smov 128   ;;  %s4625_s27 = smov 8  }
 0x963   : > { %3917 = dma.vmem_to_hbm [thread:$0]  (%p5829_p0), %s5666_s15, 256, %s5664_s20, %s3360_s30, %s4624_s6, %s4624_s6, %s4625_s27  }
 0x964 PF: > { %p3972_p2 = scmp.ge.s32.totalorder %s4597_s23, 2  ;;  %s3390_s10 = sand.u32 1, %s4569_s16  }
 0x965   : > { %p5830_p7 = scmp.ne.s32.totalorder %s5793_s12, 0  ;;  %s3391_s7 = scalar_lea.sflag [#allocation6], %s3390_s10 }
 0x967   : > { %p3952_p10 = pnand %p3972_p2, %p5830_p7 }
 0x969   : > { %4552 = dma.done.wait (!%p3952_p10), %s3391_s7, 256  }
 0x96a   : > { %4554 = vsyncadd (!%p3952_p10), %s3391_s7, 4294967040  ;;  %s33_s23 = sadd.s32 1, %s4597_s23   ;;  %s5831_s13 = sld [smem:[#allocation31_spill]] }
 0x96b   : > { %p30_p12 = scmp.ge.s32.totalorder %s33_s23, 6   ;;  %s5832_s8 = sld [smem:[#allocation32_spill]] }
 0x96c   : > { %s5833_s9 = smov %s4980_s14  ;;  %s5835_s15 = smov %s5036_s29 }
 0x96d   : > { %s5836_s16 = smov %s4573_s17  ;;  %s5837_s17 = smov %s4577_s18 }
 0x96e   : > { %s5838_s18 = smov %s5833_s9  ;;  %s5839_s19 = smov %s4589_s21 }
 0x96f   : > { %s5840_s20 = smov %s4593_s22  ;;  %s5841_s21 = smov %s5844_s28 }
 0x970   : > { %s5842_s22 = smov %s5848_s2  ;;  %32 = sbr.rel (!%p30_p12) target bundleno = 27 (0x1b), region = 154 }
 0x971   : > { %s5834_s14 = smov %s5832_s8 }
 0x977   :  { %3396 = vsyncpa [#allocation5], 1 }
 0x978   :  { %3398 = vsyncpa [#allocation5 + $0x1], 1 }
 0x979   :  { %3399 = vsyncpa [#allocation8], 1 }
 0x97a   :  { %3401 = vsyncpa [#allocation8 + $0x1], 1 }
 0x97b   :  { %3402 = vsyncpa [#allocation11], 1 }
 0x97c   :  { %3403 = vsyncpa [#allocation14], 1 }
 0x97d   :  { %3404 = vsyncpa [#allocation17], 1 }
 0x97e   :  { %3405 = vsyncpa [#allocation20], 1 }
 0x97f   :  { %3406 = vsyncpa [#allocation6], 1 }
 0x980   :  { %3408 = vsyncpa [#allocation6 + $0x1], 1 }

</bundles_post_ra>
